<compile_context>
chip_gen: v7x
topology: tpu7x:2x2x1
jax: 0.10.0
libtpu: 0.0.40
codegen_flags: <defaults>
</compile_context>

<pallas_src>
import functools

import jax
import jax.numpy as jnp
from jax import lax
from jax.experimental import pallas as pl
from jax.experimental.pallas import tpu as pltpu


# ----------------------------- fused Pallas kernel --------------------------

def _make_kernel(NP, H, Ho, N):
    """Builds the fused kernel closed over the static layout sizes.

    Layouts (all 2D so only static, tile-aligned row slices + matmuls occur):
      xp_ref : (Hp*NP, W*Cin)  bf16  h-padded input, rows=(h, n), cols=(x, c)
      w1_ref : (3, W*Cin, W*F)  bf16  banded conv1 weights (one per row tap dy)
      w2_ref : (3, W*F, Wo*2F)  bf16  banded conv2 weights
      b1_ref / b2_ref / w3_ref : (1, W*F) / (1, Wo*2F) / (1, Wo*2F)  f32
      b3_ref : (1, 1) f32
      o_ref  : (N, 1) f32
      acc1_ref: (H*NP,  W*F)   f32  in-place conv1 accumulator
      h1_ref : (H*NP,  W*F)    bf16 conv1 activation (stays in VMEM)
      acc2_ref: (Ho*NP, Wo*2F) f32  in-place conv2 accumulator
    """
    KH = 3
    HN = H * NP
    HoN = Ho * NP

    def kernel(xp_ref, w1_ref, b1_ref, w2_ref, b2_ref, w3_ref, b3_ref,
               o_ref, acc1_ref, h1_ref, acc2_ref):
        # ---- conv1: 3 row-shifted banded bf16 MXU matmuls, f32 in-place acc ----
        for dy in range(KH):
            part = jnp.dot(xp_ref[dy * NP:dy * NP + HN, :], w1_ref[dy],
                           preferred_element_type=jnp.float32)
            if dy == 0:
                acc1_ref[...] = part
            else:
                acc1_ref[...] += part
        h1_ref[...] = jnp.maximum(acc1_ref[...] + b1_ref[...],
                                  0.0).astype(jnp.bfloat16)      # bf16 in VMEM

        # ---- conv2 (valid): 3 row-shifted banded bf16 MXU matmuls ----
        for dy in range(KH):
            part = jnp.dot(h1_ref[dy * NP:dy * NP + HoN, :], w2_ref[dy],
                           preferred_element_type=jnp.float32)
            if dy == 0:
                acc2_ref[...] = part
            else:
                acc2_ref[...] += part
        h2 = jnp.maximum(acc2_ref[...] + b2_ref[...], 0.0)       # (Ho*NP, Wo*2F)

        # ---- spatial sum + Linear(2F -> 1) + sigmoid (fused epilogue) ----
        weighted = h2 * w3_ref[...]                              # fold w3 into cols
        # In-kernel 0/1 batch-selection matrix (no HBM sel input); row r of the
        # conv2 output belongs to image (r % NP); padded batch rows are skipped.
        n_ids = lax.broadcasted_iota(jnp.int32, (N, HoN), 0)
        r_ids = lax.broadcasted_iota(jnp.int32, (N, HoN), 1)
        sel = (r_ids % NP == n_ids).astype(jnp.float32)
        per_n = jnp.dot(sel, weighted,
                        preferred_element_type=jnp.float32)      # (N, Wo*2F)
        logits = jnp.sum(per_n, axis=1, keepdims=True) + b3_ref[...]   # (N, 1)
        o_ref[...] = 1.0 / (1.0 + jnp.exp(-logits))

    return kernel


# ----------------------------- parameter preparation ------------------------

def _banded_conv_weight(w, out_w, in_w, x_offset, dtype):
    """PyTorch conv weight (Cout, Cin, 3, 3) -> (KH, in_w*Cin, out_w*Cout).

    big[dy, xi*Cin + c, xo*Cout + f] = w[f, c, dy, xi - xo - x_offset]
    with xi = xo + dx + x_offset kept only when 0 <= xi < in_w (edge taps
    truncated == implicit zero padding along x).  A 3x3 conv on the
    (rows=(h, n), cols=(x, c)) layout then becomes KH row-shifted matmuls.
    """
    Cout, Cin, KH, KW = w.shape
    wt = jnp.transpose(w, (2, 3, 1, 0)).astype(dtype)            # (KH, KW, Cin, Cout)
    big = jnp.zeros((KH, in_w * Cin, out_w * Cout), dtype)
    for dy in range(KH):
        for xo in range(out_w):
            for dx in range(KW):
                xi = xo + dx + x_offset
                if 0 <= xi < in_w:
                    big = big.at[dy,
                                 xi * Cin:(xi + 1) * Cin,
                                 xo * Cout:(xo + 1) * Cout].set(wt[dy, dx])
    return big


def prepare_params(params, width):
    """One-time transform of PyTorch-layout params into matmul-ready form."""
    F = params["b1"].shape[0]
    F2 = params["b2"].shape[0]
    W, Wo = width, width - 2
    return dict(
        # conv1: pad=1 along x folded in via x_offset=-1 + truncation (no width pad).
        w1b=_banded_conv_weight(params["w1"], out_w=W, in_w=W, x_offset=-1,
                                dtype=jnp.bfloat16),
        # conv2: valid padding, bf16 MXU path.
        w2b=_banded_conv_weight(params["w2"], out_w=Wo, in_w=W, x_offset=0,
                                dtype=jnp.bfloat16),
        b1row=jnp.tile(params["b1"], W).reshape(1, W * F).astype(jnp.float32),
        b2row=jnp.tile(params["b2"], Wo).reshape(1, Wo * F2).astype(jnp.float32),
        w3row=jnp.tile(params["w3"].reshape(-1), Wo).reshape(1, Wo * F2).astype(jnp.float32),
        b3=params["b3"].reshape(1, 1).astype(jnp.float32),
    )


# ----------------------------- forward wrapper -------------------------------

@jax.jit
def snpd_cifar_forward(x_nchw, prepped):
    """x_nchw: encoder feature map (N, 512, H, W) -> (N, 1) in [0, 1]."""
    N, Cin, H, W = x_nchw.shape
    Hp, Ho = H + 2, H - 2
    # Pad the batch to the bf16 sublane tile so the dy*NP row-shift slices in
    # the kernel are tile-aligned free views (no XLU relayout per tap).
    NP = ((N + 15) // 16) * 16

    # NCHW -> (H, N, W, C) in bf16 (single cast in the wrapper), zero-pad the
    # h axis (conv1 pad=1) and the batch axis (alignment), flatten to the
    # kernel's 2D (rows=(h, n), cols=(x, c)) layout.  No width padding.
    xt = jnp.transpose(x_nchw, (2, 0, 3, 1)).astype(jnp.bfloat16)    # (H, N, W, C)
    xp = jnp.pad(xt, ((1, 1), (0, NP - N), (0, 0), (0, 0)))          # (Hp, NP, W, C)
    xp2d = xp.reshape(Hp * NP, W * Cin)

    WF = prepped["b1row"].shape[1]                                   # W  * F
    WoF2 = prepped["b2row"].shape[1]                                 # Wo * 2F

    kernel = _make_kernel(NP, H, Ho, N)
    vmem = pl.BlockSpec(memory_space=pltpu.MemorySpace.VMEM)
    return pl.pallas_call(
        kernel,
        out_shape=jax.ShapeDtypeStruct((N, 1), jnp.float32),
        in_specs=[vmem] * 7,
        out_specs=vmem,
        scratch_shapes=[pltpu.VMEM((H * NP, WF), jnp.float32),    # conv1 f32 acc
                        pltpu.VMEM((H * NP, WF), jnp.bfloat16),   # conv1 act (bf16)
                        pltpu.VMEM((Ho * NP, WoF2), jnp.float32)],  # conv2 f32 acc
        # ~2.5 MiB actual use; 32 MiB keeps headroom on every generation
        # (v7x physical VMEM is 64 MiB — do not raise past ~48-56 MiB there).
        compiler_params=pltpu.CompilerParams(vmem_limit_bytes=32 * 1024 * 1024),
    )(xp2d, prepped["w1b"], prepped["b1row"], prepped["w2b"], prepped["b2row"],
      prepped["w3row"], prepped["b3"])


# ----------------------------- init + pure-JAX reference ---------------------

def init_params(key, num_features):
    F = num_features
    k1, k2, k3, k4, k5, k6 = jax.random.split(key, 6)
    w1 = jax.random.normal(k1, (F, 512, 3, 3), jnp.float32) * (1.0 / jnp.sqrt(512.0 * 9.0))
    b1 = jax.random.normal(k2, (F,), jnp.float32) * 0.01
    w2 = jax.random.normal(k3, (2 * F, F, 3, 3), jnp.float32) * (1.0 / jnp.sqrt(F * 9.0))
    b2 = jax.random.normal(k4, (2 * F,), jnp.float32) * 0.01
    w3 = jax.random.normal(k5, (1, 2 * F), jnp.float32) * (1.0 / jnp.sqrt(2.0 * F))
    b3 = jax.random.normal(k6, (1,), jnp.float32) * 0.01
    return dict(w1=w1, b1=b1, w2=w2, b2=b2, w3=w3, b3=b3)


def reference_forward(x_nchw, params):
    y = lax.conv_general_dilated(x_nchw, params["w1"], (1, 1), ((1, 1), (1, 1)),
                                 dimension_numbers=("NCHW", "OIHW", "NCHW"))
    y = jax.nn.relu(y + params["b1"][None, :, None, None])
    y = lax.conv_general_dilated(y, params["w2"], (1, 1), ((0, 0), (0, 0)),
                                 dimension_numbers=("NCHW", "OIHW", "NCHW"))
    y = jax.nn.relu(y + params["b2"][None, :, None, None])
    s = jnp.sum(y, axis=(2, 3))                                      # (N, 2F)
    return jax.nn.sigmoid(s @ params["w3"].T + params["b3"])


if __name__ == "__main__":
    num_features = 8
    key = jax.random.PRNGKey(0)
    kx, kp = jax.random.split(key)

    # Encoder feature map: 512 channels (conv1 in_channels), small spatial.
    x = jax.random.normal(kx, (2, 512, 4, 4), jnp.float32)
    params = init_params(kp, num_features)
    prepped = prepare_params(params, width=x.shape[3])

    out = snpd_cifar_forward(x, prepped)
    out = jax.block_until_ready(out)

    assert out.shape == (2, 1), out.shape
    assert bool(jnp.all((out >= 0.0) & (out <= 1.0)))
    ref = reference_forward(x, params)
    assert bool(jnp.all(jnp.abs(out - ref) <= 2e-2)), (out, ref)
    print("KERNEL_OK")
</pallas_src>

<mosaic_0001>
module attributes {stable_mosaic.version = 11 : i64} {
  func.func @kernel(%arg0: memref<96x2048xbf16, #tpu.memory_space<vmem>>, %arg1: memref<3x2048x32xbf16, #tpu.memory_space<vmem>>, %arg2: memref<1x32xf32, #tpu.memory_space<vmem>>, %arg3: memref<3x32x32xbf16, #tpu.memory_space<vmem>>, %arg4: memref<1x32xf32, #tpu.memory_space<vmem>>, %arg5: memref<1x32xf32, #tpu.memory_space<vmem>>, %arg6: memref<1x1xf32, #tpu.memory_space<vmem>>, %arg7: memref<2x1xf32, #tpu.memory_space<vmem>>, %arg8: memref<64x32xf32, #tpu.memory_space<vmem>>, %arg9: memref<64x32xbf16, #tpu.memory_space<vmem>>, %arg10: memref<32x32xf32, #tpu.memory_space<vmem>>) attributes {dimension_semantics = [], scalar_prefetch = 0 : i64, scratch_operands = 3 : i64, tpu.core_type = #tpu.core_type<tc>} {
    %c0 = arith.constant 0 : index
    %c0_0 = arith.constant 0 : index
    %0 = vector.load %arg0[%c0, %c0_0] : memref<96x2048xbf16, #tpu.memory_space<vmem>>, vector<64x2048xbf16>
    %c0_1 = arith.constant 0 : index
    %c0_2 = arith.constant 0 : index
    %c0_3 = arith.constant 0 : index
    %1 = vector.load %arg1[%c0_1, %c0_2, %c0_3] : memref<3x2048x32xbf16, #tpu.memory_space<vmem>>, vector<1x2048x32xbf16>
    %2 = vector.shape_cast %1 : vector<1x2048x32xbf16> to vector<2048x32xbf16>
    %cst = arith.constant dense<0.000000e+00> : vector<64x32xf32>
    %3 = tpu.matmul %0, %2, %cst {dimension_numbers = #tpu.dot_dimension_numbers<[1], [0], [0], [1], [0, 0, 1, 1], [], []>} : vector<64x2048xbf16>, vector<2048x32xbf16>, vector<64x32xf32> -> vector<64x32xf32>
    %c0_4 = arith.constant 0 : index
    %c0_5 = arith.constant 0 : index
    %4 = vector.load %arg8[%c0_4, %c0_5] : memref<64x32xf32, #tpu.memory_space<vmem>>, vector<64x32xf32>
    tpu.vector_store %arg8[%c0_4, %c0_5], %3 {strides = array<i32>} : memref<64x32xf32, #tpu.memory_space<vmem>>, vector<64x32xf32>,
    %c16 = arith.constant 16 : index
    %c0_6 = arith.constant 0 : index
    %5 = vector.load %arg0[%c16, %c0_6] : memref<96x2048xbf16, #tpu.memory_space<vmem>>, vector<64x2048xbf16>
    %c1 = arith.constant 1 : index
    %c0_7 = arith.constant 0 : index
    %c0_8 = arith.constant 0 : index
    %6 = vector.load %arg1[%c1, %c0_7, %c0_8] : memref<3x2048x32xbf16, #tpu.memory_space<vmem>>, vector<1x2048x32xbf16>
    %7 = vector.shape_cast %6 : vector<1x2048x32xbf16> to vector<2048x32xbf16>
    %cst_9 = arith.constant dense<0.000000e+00> : vector<64x32xf32>
    %8 = tpu.matmul %5, %7, %cst_9 {dimension_numbers = #tpu.dot_dimension_numbers<[1], [0], [0], [1], [0, 0, 1, 1], [], []>} : vector<64x2048xbf16>, vector<2048x32xbf16>, vector<64x32xf32> -> vector<64x32xf32>
    %c0_10 = arith.constant 0 : index
    %c0_11 = arith.constant 0 : index
    %9 = vector.load %arg8[%c0_10, %c0_11] : memref<64x32xf32, #tpu.memory_space<vmem>>, vector<64x32xf32>
    %10 = arith.addf %9, %8 : vector<64x32xf32>
    %c0_12 = arith.constant 0 : index
    %c0_13 = arith.constant 0 : index
    %11 = vector.load %arg8[%c0_12, %c0_13] : memref<64x32xf32, #tpu.memory_space<vmem>>, vector<64x32xf32>
    tpu.vector_store %arg8[%c0_12, %c0_13], %10 {strides = array<i32>} : memref<64x32xf32, #tpu.memory_space<vmem>>, vector<64x32xf32>,
    %c32 = arith.constant 32 : index
    %c0_14 = arith.constant 0 : index
    %12 = vector.load %arg0[%c32, %c0_14] : memref<96x2048xbf16, #tpu.memory_space<vmem>>, vector<64x2048xbf16>
    %c2 = arith.constant 2 : index
    %c0_15 = arith.constant 0 : index
    %c0_16 = arith.constant 0 : index
    %13 = vector.load %arg1[%c2, %c0_15, %c0_16] : memref<3x2048x32xbf16, #tpu.memory_space<vmem>>, vector<1x2048x32xbf16>
    %14 = vector.shape_cast %13 : vector<1x2048x32xbf16> to vector<2048x32xbf16>
    %cst_17 = arith.constant dense<0.000000e+00> : vector<64x32xf32>
    %15 = tpu.matmul %12, %14, %cst_17 {dimension_numbers = #tpu.dot_dimension_numbers<[1], [0], [0], [1], [0, 0, 1, 1], [], []>} : vector<64x2048xbf16>, vector<2048x32xbf16>, vector<64x32xf32> -> vector<64x32xf32>
    %c0_18 = arith.constant 0 : index
    %c0_19 = arith.constant 0 : index
    %16 = vector.load %arg8[%c0_18, %c0_19] : memref<64x32xf32, #tpu.memory_space<vmem>>, vector<64x32xf32>
    %17 = arith.addf %16, %15 : vector<64x32xf32>
    %c0_20 = arith.constant 0 : index
    %c0_21 = arith.constant 0 : index
    %18 = vector.load %arg8[%c0_20, %c0_21] : memref<64x32xf32, #tpu.memory_space<vmem>>, vector<64x32xf32>
    tpu.vector_store %arg8[%c0_20, %c0_21], %17 {strides = array<i32>} : memref<64x32xf32, #tpu.memory_space<vmem>>, vector<64x32xf32>,
    %c0_22 = arith.constant 0 : index
    %c0_23 = arith.constant 0 : index
    %19 = vector.load %arg8[%c0_22, %c0_23] : memref<64x32xf32, #tpu.memory_space<vmem>>, vector<64x32xf32>
    %c0_24 = arith.constant 0 : index
    %c0_25 = arith.constant 0 : index
    %20 = vector.load %arg2[%c0_24, %c0_25] : memref<1x32xf32, #tpu.memory_space<vmem>>, vector<1x32xf32>
    %21 = vector.broadcast %20 : vector<1x32xf32> to vector<64x32xf32>
    %22 = arith.addf %19, %21 : vector<64x32xf32>
    %cst_26 = arith.constant 0.000000e+00 : f32
    %23 = vector.broadcast %cst_26 : f32 to vector<64x32xf32>
    %24 = arith.maximumf %22, %23 : vector<64x32xf32>
    %25 = arith.truncf %24 : vector<64x32xf32> to vector<64x32xbf16>
    %c0_27 = arith.constant 0 : index
    %c0_28 = arith.constant 0 : index
    %26 = vector.load %arg9[%c0_27, %c0_28] : memref<64x32xbf16, #tpu.memory_space<vmem>>, vector<64x32xbf16>
    tpu.vector_store %arg9[%c0_27, %c0_28], %25 {strides = array<i32>} : memref<64x32xbf16, #tpu.memory_space<vmem>>, vector<64x32xbf16>,
    %c0_29 = arith.constant 0 : index
    %c0_30 = arith.constant 0 : index
    %27 = vector.load %arg9[%c0_29, %c0_30] : memref<64x32xbf16, #tpu.memory_space<vmem>>, vector<32x32xbf16>
    %c0_31 = arith.constant 0 : index
    %c0_32 = arith.constant 0 : index
    %c0_33 = arith.constant 0 : index
    %28 = vector.load %arg3[%c0_31, %c0_32, %c0_33] : memref<3x32x32xbf16, #tpu.memory_space<vmem>>, vector<1x32x32xbf16>
    %29 = vector.shape_cast %28 : vector<1x32x32xbf16> to vector<32x32xbf16>
    %cst_34 = arith.constant dense<0.000000e+00> : vector<32x32xf32>
    %30 = tpu.matmul %27, %29, %cst_34 {dimension_numbers = #tpu.dot_dimension_numbers<[1], [0], [0], [1], [0, 0, 1, 1], [], []>} : vector<32x32xbf16>, vector<32x32xbf16>, vector<32x32xf32> -> vector<32x32xf32>
    %c0_35 = arith.constant 0 : index
    %c0_36 = arith.constant 0 : index
    %31 = vector.load %arg10[%c0_35, %c0_36] : memref<32x32xf32, #tpu.memory_space<vmem>>, vector<32x32xf32>
    tpu.vector_store %arg10[%c0_35, %c0_36], %30 {strides = array<i32>} : memref<32x32xf32, #tpu.memory_space<vmem>>, vector<32x32xf32>,
    %c16_37 = arith.constant 16 : index
    %c0_38 = arith.constant 0 : index
    %32 = vector.load %arg9[%c16_37, %c0_38] : memref<64x32xbf16, #tpu.memory_space<vmem>>, vector<32x32xbf16>
    %c1_39 = arith.constant 1 : index
    %c0_40 = arith.constant 0 : index
    %c0_41 = arith.constant 0 : index
    %33 = vector.load %arg3[%c1_39, %c0_40, %c0_41] : memref<3x32x32xbf16, #tpu.memory_space<vmem>>, vector<1x32x32xbf16>
    %34 = vector.shape_cast %33 : vector<1x32x32xbf16> to vector<32x32xbf16>
    %cst_42 = arith.constant dense<0.000000e+00> : vector<32x32xf32>
    %35 = tpu.matmul %32, %34, %cst_42 {dimension_numbers = #tpu.dot_dimension_numbers<[1], [0], [0], [1], [0, 0, 1, 1], [], []>} : vector<32x32xbf16>, vector<32x32xbf16>, vector<32x32xf32> -> vector<32x32xf32>
    %c0_43 = arith.constant 0 : index
    %c0_44 = arith.constant 0 : index
    %36 = vector.load %arg10[%c0_43, %c0_44] : memref<32x32xf32, #tpu.memory_space<vmem>>, vector<32x32xf32>
    %37 = arith.addf %36, %35 : vector<32x32xf32>
    %c0_45 = arith.constant 0 : index
    %c0_46 = arith.constant 0 : index
    %38 = vector.load %arg10[%c0_45, %c0_46] : memref<32x32xf32, #tpu.memory_space<vmem>>, vector<32x32xf32>
    tpu.vector_store %arg10[%c0_45, %c0_46], %37 {strides = array<i32>} : memref<32x32xf32, #tpu.memory_space<vmem>>, vector<32x32xf32>,
    %c32_47 = arith.constant 32 : index
    %c0_48 = arith.constant 0 : index
    %39 = vector.load %arg9[%c32_47, %c0_48] : memref<64x32xbf16, #tpu.memory_space<vmem>>, vector<32x32xbf16>
    %c2_49 = arith.constant 2 : index
    %c0_50 = arith.constant 0 : index
    %c0_51 = arith.constant 0 : index
    %40 = vector.load %arg3[%c2_49, %c0_50, %c0_51] : memref<3x32x32xbf16, #tpu.memory_space<vmem>>, vector<1x32x32xbf16>
    %41 = vector.shape_cast %40 : vector<1x32x32xbf16> to vector<32x32xbf16>
    %cst_52 = arith.constant dense<0.000000e+00> : vector<32x32xf32>
    %42 = tpu.matmul %39, %41, %cst_52 {dimension_numbers = #tpu.dot_dimension_numbers<[1], [0], [0], [1], [0, 0, 1, 1], [], []>} : vector<32x32xbf16>, vector<32x32xbf16>, vector<32x32xf32> -> vector<32x32xf32>
    %c0_53 = arith.constant 0 : index
    %c0_54 = arith.constant 0 : index
    %43 = vector.load %arg10[%c0_53, %c0_54] : memref<32x32xf32, #tpu.memory_space<vmem>>, vector<32x32xf32>
    %44 = arith.addf %43, %42 : vector<32x32xf32>
    %c0_55 = arith.constant 0 : index
    %c0_56 = arith.constant 0 : index
    %45 = vector.load %arg10[%c0_55, %c0_56] : memref<32x32xf32, #tpu.memory_space<vmem>>, vector<32x32xf32>
    tpu.vector_store %arg10[%c0_55, %c0_56], %44 {strides = array<i32>} : memref<32x32xf32, #tpu.memory_space<vmem>>, vector<32x32xf32>,
    %c0_57 = arith.constant 0 : index
    %c0_58 = arith.constant 0 : index
    %46 = vector.load %arg10[%c0_57, %c0_58] : memref<32x32xf32, #tpu.memory_space<vmem>>, vector<32x32xf32>
    %c0_59 = arith.constant 0 : index
    %c0_60 = arith.constant 0 : index
    %47 = vector.load %arg4[%c0_59, %c0_60] : memref<1x32xf32, #tpu.memory_space<vmem>>, vector<1x32xf32>
    %48 = vector.broadcast %47 : vector<1x32xf32> to vector<32x32xf32>
    %49 = arith.addf %46, %48 : vector<32x32xf32>
    %cst_61 = arith.constant 0.000000e+00 : f32
    %50 = vector.broadcast %cst_61 : f32 to vector<32x32xf32>
    %51 = arith.maximumf %49, %50 : vector<32x32xf32>
    %c0_62 = arith.constant 0 : index
    %c0_63 = arith.constant 0 : index
    %52 = vector.load %arg5[%c0_62, %c0_63] : memref<1x32xf32, #tpu.memory_space<vmem>>, vector<1x32xf32>
    %53 = vector.broadcast %52 : vector<1x32xf32> to vector<32x32xf32>
    %54 = arith.mulf %51, %53 : vector<32x32xf32>
    %55 = tpu.iota {dimensions = array<i32: 0>} : vector<2x32xi32>
    %56 = tpu.iota {dimensions = array<i32: 1>} : vector<2x32xi32>
    %c16_i32 = arith.constant 16 : i32
    %c0_i32 = arith.constant 0 : i32
    %57 = arith.cmpi eq, %c16_i32, %c0_i32 : i32
    %c1_i32 = arith.constant 1 : i32
    %58 = arith.select %57, %c1_i32, %c16_i32 : i32
    %59 = vector.broadcast %58 : i32 to vector<2x32xi32>
    %60 = arith.remsi %56, %59 : vector<2x32xi32>
    %c0_i32_64 = arith.constant 0 : i32
    %61 = vector.broadcast %c0_i32_64 : i32 to vector<2x32xi32>
    %62 = arith.cmpi ne, %60, %61 : vector<2x32xi32>
    %c0_i32_65 = arith.constant 0 : i32
    %63 = vector.broadcast %c0_i32_65 : i32 to vector<2x32xi32>
    %64 = arith.cmpi slt, %60, %63 : vector<2x32xi32>
    %c0_i32_66 = arith.constant 0 : i32
    %65 = arith.cmpi slt, %58, %c0_i32_66 : i32
    %66 = vector.broadcast %65 : i1 to vector<2x32xi1>
    %67 = vector.broadcast %66 : vector<2x32xi1> to vector<2x32xi1>
    %68 = arith.xori %64, %67 : vector<2x32xi1>
    %69 = arith.andi %68, %62 : vector<2x32xi1>
    %70 = vector.broadcast %58 : i32 to vector<2x32xi32>
    %71 = arith.addi %60, %70 : vector<2x32xi32>
    %72 = arith.select %69, %71, %60 : vector<2x32xi1>, vector<2x32xi32>
    %73 = arith.cmpi eq, %72, %55 : vector<2x32xi32>
    %74 = arith.extui %73 : vector<2x32xi1> to vector<2x32xi32>
    %75 = arith.sitofp %74 : vector<2x32xi32> to vector<2x32xf32>
    %cst_67 = arith.constant dense<0.000000e+00> : vector<2x32xf32>
    %76 = tpu.matmul %75, %54, %cst_67 {dimension_numbers = #tpu.dot_dimension_numbers<[1], [0], [0], [1], [0, 0, 1, 1], [], []>} : vector<2x32xf32>, vector<32x32xf32>, vector<2x32xf32> -> vector<2x32xf32>
    %cst_68 = arith.constant dense<0.000000e+00> : vector<2xf32>
    %77 = vector.multi_reduction <add>, %76, %cst_68 [1] : vector<2x32xf32> to vector<2xf32>
    %78 = vector.shape_cast %77 : vector<2xf32> to vector<2x1xf32>
    %c0_69 = arith.constant 0 : index
    %c0_70 = arith.constant 0 : index
    %79 = vector.load %arg6[%c0_69, %c0_70] : memref<1x1xf32, #tpu.memory_space<vmem>>, vector<1x1xf32>
    %80 = vector.broadcast %79 : vector<1x1xf32> to vector<2x1xf32>
    %81 = arith.addf %78, %80 : vector<2x1xf32>
    %cst_71 = arith.constant 0.000000e+00 : f32
    %82 = vector.broadcast %cst_71 : f32 to vector<2x1xf32>
    %83 = arith.subf %82, %81 : vector<2x1xf32>
    %84 = math.exp %83 : vector<2x1xf32>
    %cst_72 = arith.constant 1.000000e+00 : f32
    %85 = vector.broadcast %cst_72 : f32 to vector<2x1xf32>
    %86 = arith.addf %85, %84 : vector<2x1xf32>
    %cst_73 = arith.constant 1.000000e+00 : f32
    %87 = vector.broadcast %cst_73 : f32 to vector<2x1xf32>
    %88 = arith.divf %87, %86 : vector<2x1xf32>
    %c0_74 = arith.constant 0 : index
    %c0_75 = arith.constant 0 : index
    %89 = vector.load %arg7[%c0_74, %c0_75] : memref<2x1xf32, #tpu.memory_space<vmem>>, vector<2x1xf32>
    tpu.vector_store %arg7[%c0_74, %c0_75], %88 {strides = array<i32>} : memref<2x1xf32, #tpu.memory_space<vmem>>, vector<2x1xf32>,
    return
  }
}

</mosaic_0001>

<bundles_post_ra>
// kernel: snpd_cifar_forward.1
= control target key start
LH: loop header
LB: loop body
LE: loop exit
PB: predicated region body
PF: predicated region fallthrough
CT: control target
= control target key end

     0   :  { %vm1957_vm0 = vcmask 261120   ;;  %vm8836_vm1 = vmmov 0   ;;  %vm6282_vm3 = vcmask 254976   ;;  %vm6300_vm4 = vcmask 1024   ;;  %s10899_s1 = inlined_call_operand.vmem [shape: bf16[3,2048,32], index: 1, kind: input, shape index: {}]   ;;  %s10900_s0 = inlined_call_operand.vmem [shape: bf16[96,2048], index: 0, kind: input, shape index: {}]   ;;  %s10901_s3 = inlined_call_operand.vmem [shape: bf16[3,32,32], index: 3, kind: input, shape index: {}]   ;;  %s10902_s2 = inlined_call_operand.vmem [shape: f32[1,32], index: 2, kind: input, shape index: {}]   ;;  %s10903_s4 = inlined_call_operand.vmem [shape: f32[1,32], index: 4, kind: input, shape index: {}]   ;;  %s10904_s5 = inlined_call_operand.vmem [shape: f32[1,32], index: 5, kind: input, shape index: {}]   ;;  %s10905_s6 = inlined_call_operand.<no memory space> [shape: f32[1,1], index: 6, kind: input, shape index: {}]   ;;  %s10906_s7 = inlined_call_operand.vmem [shape: f32[2,1], index: 7, kind: output, shape index: {}]  }
   0x1   :  { %v8441_v0 = vld [vmem:[%s10899_s1 + $0x40] sm:$0xff]   ;;  %v8445_v4 = vld [vmem:[%s10899_s1 + $0x48] sm:$0xff]   ;;  %v8449_v8 = vld [vmem:[%s10899_s1 + $0x50] sm:$0xff]  }
   0x2   :  { %v8442_v1 = vld [vmem:[%s10899_s1 + $0xc0] sm:$0xff]   ;;  %7420 = vmatprep.subr.bf16.mxu0 %v8441_v0  ;;  %v8446_v5 = vld [vmem:[%s10899_s1 + $0xc8] sm:$0xff]   ;;  %v8450_v9 = vld [vmem:[%s10899_s1 + $0xd0] sm:$0xff]  }
   0x3   :  { %v8443_v2 = vld [vmem:[%s10899_s1] sm:$0xff]   ;;  %7460 = vmatprep.subr.bf16.mxu1 %v8442_v1  ;;  %v8447_v6 = vld [vmem:[%s10899_s1 + $0x8] sm:$0xff]   ;;  %v8451_v10 = vld [vmem:[%s10899_s1 + $0x10] sm:$0xff]  }
   0x4   :  { %v8444_v3 = vld [vmem:[%s10899_s1 + $0x80] sm:$0xff]   ;;  %7421 = vmatpush3.bf16.msra.mxu0 %v8443_v2  ;;  %v8448_v7 = vld [vmem:[%s10899_s1 + $0x88] sm:$0xff]   ;;  %v8452_v11 = vld [vmem:[%s10899_s1 + $0x90] sm:$0xff]  }
   0x5   :  { %7461 = vmatpush3.bf16.msra.mxu1 %v8444_v3  ;;  %7422 = vmatprep.subr.bf16.mxu0 %v8445_v4  ;;  %v8453_v12 = vld [vmem:[%s10899_s1 + $0x58] sm:$0xff]   ;;  %v8457_v16 = vld [vmem:[%s10899_s1 + $0x60] sm:$0xff]   ;;  %v8461_v20 = vld [vmem:[%s10899_s1 + $0x68] sm:$0xff]  }
   0x6   :  { %7462 = vmatprep.subr.bf16.mxu1 %v8446_v5  ;;  %v8454_v13 = vld [vmem:[%s10899_s1 + $0xd8] sm:$0xff]   ;;  %v8458_v17 = vld [vmem:[%s10899_s1 + $0xe0] sm:$0xff]   ;;  %v8462_v21 = vld [vmem:[%s10899_s1 + $0xe8] sm:$0xff]  }
   0x7   :  { %v8455_v14 = vld [vmem:[%s10899_s1 + $0x18] sm:$0xff]   ;;  %v8459_v18 = vld [vmem:[%s10899_s1 + $0x20] sm:$0xff]   ;;  %v8463_v22 = vld [vmem:[%s10899_s1 + $0x28] sm:$0xff]  }
   0x8   :  { %7423 = vmatpush3.bf16.msra.mxu0 %v8447_v6  ;;  %v8456_v15 = vld [vmem:[%s10899_s1 + $0x98] sm:$0xff]   ;;  %v8460_v19 = vld [vmem:[%s10899_s1 + $0xa0] sm:$0xff]   ;;  %v8464_v23 = vld [vmem:[%s10899_s1 + $0xa8] sm:$0xff]  }
   0x9   :  { %7463 = vmatpush3.bf16.msra.mxu1 %v8448_v7  ;;  %7424 = vmatprep.subr.bf16.mxu0 %v8449_v8  ;;  %v8465_v24 = vld [vmem:[%s10899_s1 + $0x70] sm:$0xff]   ;;  %v8469_v28 = vld [vmem:[%s10899_s1 + $0x78] sm:$0xff]   ;;  %v29_v32 = vld [vmem:[%s10900_s0] sm:$0xff] }
   0xa   :  { %7464 = vmatprep.subr.bf16.mxu1 %v8450_v9  ;;  %v8466_v25 = vld [vmem:[%s10899_s1 + $0xf0] sm:$0xff]   ;;  %v8470_v29 = vld [vmem:[%s10899_s1 + $0xf8] sm:$0xff]   ;;  %v37_v33 = vld [vmem:[%s10900_s0 + $0x40] sm:$0xff] }
   0xb   :  { %v8467_v26 = vld [vmem:[%s10899_s1 + $0x30] sm:$0xff]   ;;  %v8471_v30 = vld [vmem:[%s10899_s1 + $0x38] sm:$0xff]   ;;  %v30_v34 = vld [vmem:[%s10900_s0 + $0x8] sm:$0xff]  ;;  %v6306_v35 = vcombine.low %v29_v32, %v37_v33  ;;  %v6307_v36 = vcombine.high %v29_v32, %v37_v33 }
   0xc   :  { %7425 = vmatpush3.bf16.msra.mxu0 %v8451_v10  ;;  %v8468_v27 = vld [vmem:[%s10899_s1 + $0xb0] sm:$0xff]   ;;  %v8472_v31 = vld [vmem:[%s10899_s1 + $0xb8] sm:$0xff]   ;;  %v38_v37 = vld [vmem:[%s10900_s0 + $0x48] sm:$0xff] }
   0xd   :  { %7465 = vmatpush3.bf16.msra.mxu1 %v8452_v11  ;;  %7426 = vmatprep.subr.bf16.mxu0 %v8453_v12  ;;  %v6308_v38 = vcombine.low %v30_v34, %v38_v37  ;;  %v6309_v39 = vcombine.high %v30_v34, %v38_v37  ;;  %v8473_v40 = vld [vmem:[%s10899_s1 + $0x140] sm:$0xff]   ;;  %v8477_v44 = vld [vmem:[%s10899_s1 + $0x148] sm:$0xff]   ;;  %v8481_v56 = vld [vmem:[%s10899_s1 + $0x150] sm:$0xff]  }
   0xe   :  { %7466 = vmatprep.subr.bf16.mxu1 %v8454_v13  ;;  %1469 = vmatprep.mubr.bf16.mxu0 %v6307_v36  ;;  %v8474_v41 = vld [vmem:[%s10899_s1 + $0x1c0] sm:$0xff]   ;;  %v8478_v45 = vld [vmem:[%s10899_s1 + $0x1c8] sm:$0xff]   ;;  %v8482_v57 = vld [vmem:[%s10899_s1 + $0x1d0] sm:$0xff]  }
   0xf   :  { %1534 = vmatprep.mubr.bf16.mxu1 %v6309_v39  ;;  %v8475_v42 = vld [vmem:[%s10899_s1 + $0x100] sm:$0xff]   ;;  %v8479_v46 = vld [vmem:[%s10899_s1 + $0x108] sm:$0xff]   ;;  %v8483_v58 = vld [vmem:[%s10899_s1 + $0x110] sm:$0xff]  }
  0x10   :  { %7427 = vmatpush3.bf16.msra.mxu0 %v8455_v14  ;;  %v8476_v43 = vld [vmem:[%s10899_s1 + $0x180] sm:$0xff]   ;;  %v8480_v47 = vld [vmem:[%s10899_s1 + $0x188] sm:$0xff]   ;;  %v8484_v59 = vld [vmem:[%s10899_s1 + $0x190] sm:$0xff]  }
  0x11   :  { %7467 = vmatpush3.bf16.msra.mxu1 %v8456_v15  ;;  %7428 = vmatprep.subr.bf16.mxu0 %v8457_v16  ;;  %v45_v48 = vld [vmem:[%s10900_s0 + $0x80] sm:$0xff]  ;;  %v46_v51 = vld [vmem:[%s10900_s0 + $0x88] sm:$0xff]  ;;  %v8485_v60 = vld [vmem:[%s10899_s1 + $0x158] sm:$0xff]  }
  0x12   :  { %7468 = vmatprep.subr.bf16.mxu1 %v8458_v17  ;;  %v53_v49 = vld [vmem:[%s10900_s0 + $0xc0] sm:$0xff]  ;;  %v54_v52 = vld [vmem:[%s10900_s0 + $0xc8] sm:$0xff]  ;;  %v8486_v61 = vld [vmem:[%s10899_s1 + $0x1d8] sm:$0xff]  }
  0x13   :  { %v6323_v50 = vcombine.high %v45_v48, %v53_v49  ;;  %v6322_v53 = vcombine.low %v45_v48, %v53_v49  ;;  %v6325_v54 = vcombine.high %v46_v51, %v54_v52  ;;  %v6324_v55 = vcombine.low %v46_v51, %v54_v52  ;;  %v8487_v62 = vld [vmem:[%s10899_s1 + $0x118] sm:$0xff]   ;;  %v61_v0 = vld [vmem:[%s10900_s0 + $0x100] sm:$0xff]  ;;  %v62_v2 = vld [vmem:[%s10900_s0 + $0x108] sm:$0xff] }
  0x14   :  { %7429 = vmatpush3.bf16.msra.mxu0 %v8459_v18  ;;  %v8488_v63 = vld [vmem:[%s10899_s1 + $0x198] sm:$0xff]   ;;  %v69_v1 = vld [vmem:[%s10900_s0 + $0x140] sm:$0xff]  ;;  %v70_v3 = vld [vmem:[%s10900_s0 + $0x148] sm:$0xff] }
  0x15   :  { %7469 = vmatpush3.bf16.msra.mxu1 %v8460_v19  ;;  %7430 = vmatprep.subr.bf16.mxu0 %v8461_v20  ;;  %v6339_v4 = vcombine.high %v61_v0, %v69_v1  ;;  %v6341_v5 = vcombine.high %v62_v2, %v70_v3  ;;  %v6338_v6 = vcombine.low %v61_v0, %v69_v1  ;;  %v8489_v8 = vld [vmem:[%s10899_s1 + $0x160] sm:$0xff]   ;;  %v8493_v12 = vld [vmem:[%s10899_s1 + $0x168] sm:$0xff]   ;;  %v31_v32 = vld [vmem:[%s10900_s0 + $0x10] sm:$0xff] }
  0x16   :  { %7470 = vmatprep.subr.bf16.mxu1 %v8462_v21  ;;  %v6340_v7 = vcombine.low %v62_v2, %v70_v3  ;;  %v8490_v9 = vld [vmem:[%s10899_s1 + $0x1e0] sm:$0xff]   ;;  %v8494_v13 = vld [vmem:[%s10899_s1 + $0x1e8] sm:$0xff]   ;;  %v39_v33 = vld [vmem:[%s10900_s0 + $0x50] sm:$0xff] }
  0x17   :  { %v8491_v10 = vld [vmem:[%s10899_s1 + $0x120] sm:$0xff]   ;;  %v8495_v14 = vld [vmem:[%s10899_s1 + $0x128] sm:$0xff]   ;;  %v6310_v34 = vcombine.low %v31_v32, %v39_v33  ;;  %v32_v36 = vld [vmem:[%s10900_s0 + $0x18] sm:$0xff] }
  0x18   :  { %7431 = vmatpush3.bf16.msra.mxu0 %v8463_v22  ;;  %v8492_v11 = vld [vmem:[%s10899_s1 + $0x1a0] sm:$0xff]   ;;  %v8496_v15 = vld [vmem:[%s10899_s1 + $0x1a8] sm:$0xff]   ;;  %v40_v37 = vld [vmem:[%s10900_s0 + $0x58] sm:$0xff] }
  0x19   :  { %7471 = vmatpush3.bf16.msra.mxu1 %v8464_v23  ;;  %7432 = vmatprep.subr.bf16.mxu0 %v8465_v24  ;;  %v77_v16 = vld [vmem:[%s10900_s0 + $0x180] sm:$0xff]  ;;  %v78_v18 = vld [vmem:[%s10900_s0 + $0x188] sm:$0xff]  ;;  %v8497_v24 = vld [vmem:[%s10899_s1 + $0x170] sm:$0xff]   ;;  %v6313_v39 = vcombine.high %v32_v36, %v40_v37 }
  0x1a   :  { %7472 = vmatprep.subr.bf16.mxu1 %v8466_v25  ;;  %v85_v17 = vld [vmem:[%s10900_s0 + $0x1c0] sm:$0xff]  ;;  %v86_v20 = vld [vmem:[%s10900_s0 + $0x1c8] sm:$0xff]  ;;  %v8498_v25 = vld [vmem:[%s10899_s1 + $0x1f0] sm:$0xff]  }
  0x1b   :  { %v6355_v19 = vcombine.high %v77_v16, %v85_v17  ;;  %v6354_v21 = vcombine.low %v77_v16, %v85_v17  ;;  %v6357_v22 = vcombine.high %v78_v18, %v86_v20  ;;  %v6356_v23 = vcombine.low %v78_v18, %v86_v20  ;;  %v47_v48 = vld [vmem:[%s10900_s0 + $0x90] sm:$0xff]  ;;  %v56_v51 = vld [vmem:[%s10900_s0 + $0xd8] sm:$0xff] }
  0x1c   :  { %7433 = vmatpush3.bf16.msra.mxu0 %v8467_v26  ;;  %v8499_v26 = vld [vmem:[%s10899_s1 + $0x130] sm:$0xff]   ;;  %v64_v2 = vld [vmem:[%s10900_s0 + $0x118] sm:$0xff] }
  0x1d   :  { %7473 = vmatpush3.bf16.msra.mxu1 %v8468_v27  ;;  %7434 = vmatprep.subr.bf16.mxu0 %v8469_v28  ;;  %v8500_v27 = vld [vmem:[%s10899_s1 + $0x1b0] sm:$0xff]   ;;  %v8501_v28 = vld [vmem:[%s10899_s1 + $0x178] sm:$0xff]  }
  0x1e   :  { %7474 = vmatprep.subr.bf16.mxu1 %v8470_v29  ;;  %v8502_v29 = vld [vmem:[%s10899_s1 + $0x1f8] sm:$0xff]   ;;  %v55_v49 = vld [vmem:[%s10900_s0 + $0xd0] sm:$0xff] }
  0x1f   :  { %v6327_v52 = vcombine.high %v47_v48, %v55_v49  ;;  %v63_v0 = vld [vmem:[%s10900_s0 + $0x110] sm:$0xff]  ;;  %v88_v20 = vld [vmem:[%s10900_s0 + $0x1d8] sm:$0xff] }
  0x20   :  { %7435 = vmatpush3.bf16.msra.mxu0 %v8471_v30  ;;  %v8503_v30 = vld [vmem:[%s10899_s1 + $0x138] sm:$0xff]   ;;  %v71_v1 = vld [vmem:[%s10900_s0 + $0x150] sm:$0xff] }
  0x21   :  { %7475 = vmatpush3.bf16.msra.mxu1 %v8472_v31  ;;  %7500 = vmatprep.subr.bf16.mxu0 %v8473_v40  ;;  %v8504_v31 = vld [vmem:[%s10899_s1 + $0x1b8] sm:$0xff]   ;;  %v8505_v40 = vld [vmem:[%s10899_s1 + $0x240] sm:$0xff]   ;;  %v6343_v3 = vcombine.high %v63_v0, %v71_v1  ;;  %v79_v16 = vld [vmem:[%s10900_s0 + $0x190] sm:$0xff] }
  0x22   :  { %7540 = vmatprep.subr.bf16.mxu1 %v8474_v41  ;;  %v8506_v41 = vld [vmem:[%s10899_s1 + $0x2c0] sm:$0xff]   ;;  %v87_v17 = vld [vmem:[%s10900_s0 + $0x1d0] sm:$0xff] }
  0x23   :  { %1470 = vmatmul.mubr.bf16.vlgmr.msra.gmra.mrb[0].mxu0 %v6306_v35  ;;  %v6311_v35 = vcombine.high %v31_v32, %v39_v33  ;;  %v6359_v18 = vcombine.high %v79_v16, %v87_v17  ;;  %v33_v32 = vld [vmem:[%s10900_s0 + $0x20] sm:$0xff] }
  0x24   :  { %1535 = vmatmul.mubr.bf16.vlgmr.msra.gmra.mrb[0].mxu1 %v6308_v38  ;;  %7501 = vmatpush3.bf16.msra.mxu0 %v8475_v42  ;;  %v6312_v38 = vcombine.low %v32_v36, %v40_v37  ;;  %v8507_v42 = vld [vmem:[%s10899_s1 + $0x200] sm:$0xff]  }
  0x25   :  { %7541 = vmatpush3.bf16.msra.mxu1 %v8476_v43  ;;  %7502 = vmatprep.subr.bf16.mxu0 %v8477_v44  ;;  %v8508_v43 = vld [vmem:[%s10899_s1 + $0x280] sm:$0xff]   ;;  %v8509_v44 = vld [vmem:[%s10899_s1 + $0x248] sm:$0xff]  }
  0x26   :  { %7542 = vmatprep.subr.bf16.mxu1 %v8478_v45  ;;  %1477 = vmatprep.mubr.bf16.mxu0 %v6323_v50  ;;  %v8510_v45 = vld [vmem:[%s10899_s1 + $0x2c8] sm:$0xff]   ;;  %v48_v50 = vld [vmem:[%s10900_s0 + $0x98] sm:$0xff]  ;;  %v41_v33 = vld [vmem:[%s10900_s0 + $0x60] sm:$0xff] }
  0x27   :  { %1542 = vmatprep.mubr.bf16.mxu1 %v6325_v54  ;;  %v6326_v54 = vcombine.low %v47_v48, %v55_v49  ;;  %v6314_v36 = vcombine.low %v33_v32, %v41_v33  ;;  %v6315_v37 = vcombine.high %v33_v32, %v41_v33  ;;  %v49_v48 = vld [vmem:[%s10900_s0 + $0xa0] sm:$0xff]  ;;  %v35_v32 = vld [vmem:[%s10900_s0 + $0x30] sm:$0xff] }
  0x28   :  { %7503 = vmatpush3.bf16.msra.mxu0 %v8479_v46  ;;  %v8511_v46 = vld [vmem:[%s10899_s1 + $0x208] sm:$0xff]   ;;  %v57_v49 = vld [vmem:[%s10900_s0 + $0xe0] sm:$0xff]  ;;  %v43_v33 = vld [vmem:[%s10900_s0 + $0x70] sm:$0xff] }
  0x29   :  { %7543 = vmatpush3.bf16.msra.mxu1 %v8480_v47  ;;  %7504 = vmatprep.subr.bf16.mxu0 %v8481_v56  ;;  %v8512_v47 = vld [vmem:[%s10899_s1 + $0x288] sm:$0xff]   ;;  %v8513_v56 = vld [vmem:[%s10899_s1 + $0x250] sm:$0xff]  }
  0x2a   :  { %7544 = vmatprep.subr.bf16.mxu1 %v8482_v57  ;;  %v8514_v57 = vld [vmem:[%s10899_s1 + $0x2d0] sm:$0xff]  }
  0x2b   :  { %1478 = vmatmul.mubr.bf16.gmra.mrb[4].mxu0 %v6322_v53  ;;  %v6329_v53 = vcombine.high %v48_v50, %v56_v51 }
  0x2c   :  { %1543 = vmatmul.mubr.bf16.gmra.mrb[4].mxu1 %v6324_v55  ;;  %7505 = vmatpush3.bf16.msra.mxu0 %v8483_v58  ;;  %v6328_v55 = vcombine.low %v48_v50, %v56_v51  ;;  %v8515_v58 = vld [vmem:[%s10899_s1 + $0x210] sm:$0xff]   ;;  %v50_v50 = vld [vmem:[%s10900_s0 + $0xa8] sm:$0xff]  ;;  %v6331_v51 = vcombine.high %v49_v48, %v57_v49 }
  0x2d   :  { %7545 = vmatpush3.bf16.msra.mxu1 %v8484_v59  ;;  %7506 = vmatprep.subr.bf16.mxu0 %v8485_v60  ;;  %v8516_v59 = vld [vmem:[%s10899_s1 + $0x290] sm:$0xff]   ;;  %v8517_v60 = vld [vmem:[%s10899_s1 + $0x258] sm:$0xff]  }
  0x2e   :  { %7546 = vmatprep.subr.bf16.mxu1 %v8486_v61  ;;  %1485 = vmatprep.mubr.bf16.mxu0 %v6339_v4  ;;  %v8518_v61 = vld [vmem:[%s10899_s1 + $0x2d8] sm:$0xff]  }
  0x2f   :  { %1550 = vmatprep.mubr.bf16.mxu1 %v6341_v5  ;;  %v72_v4 = vld [vmem:[%s10900_s0 + $0x158] sm:$0xff]  ;;  %v6342_v5 = vcombine.low %v63_v0, %v71_v1  ;;  %v65_v0 = vld [vmem:[%s10900_s0 + $0x120] sm:$0xff] }
  0x30   :  { %7507 = vmatpush3.bf16.msra.mxu0 %v8487_v62  ;;  %v8519_v62 = vld [vmem:[%s10899_s1 + $0x218] sm:$0xff]   ;;  %v73_v1 = vld [vmem:[%s10900_s0 + $0x160] sm:$0xff] }
  0x31   :  { %7547 = vmatpush3.bf16.msra.mxu1 %v8488_v63  ;;  %7508 = vmatprep.subr.bf16.mxu0 %v8489_v8  ;;  %v8520_v63 = vld [vmem:[%s10899_s1 + $0x298] sm:$0xff]   ;;  %v8521_v8 = vld [vmem:[%s10899_s1 + $0x260] sm:$0xff]  }
  0x32   :  { %7548 = vmatprep.subr.bf16.mxu1 %v8490_v9  ;;  %v8522_v9 = vld [vmem:[%s10899_s1 + $0x2e0] sm:$0xff]  }
  0x33   :  { %1486 = vmatmul.mubr.bf16.gmra.mrb[8].mxu0 %v6338_v6  ;;  %v6345_v6 = vcombine.high %v64_v2, %v72_v4 }
  0x34   :  { %1551 = vmatmul.mubr.bf16.gmra.mrb[8].mxu1 %v6340_v7  ;;  %7509 = vmatpush3.bf16.msra.mxu0 %v8491_v10  ;;  %v6344_v7 = vcombine.low %v64_v2, %v72_v4  ;;  %v8523_v10 = vld [vmem:[%s10899_s1 + $0x220] sm:$0xff]   ;;  %v6347_v2 = vcombine.high %v65_v0, %v73_v1  ;;  %v74_v4 = vld [vmem:[%s10900_s0 + $0x168] sm:$0xff] }
  0x35   :  { %7549 = vmatpush3.bf16.msra.mxu1 %v8492_v11  ;;  %7510 = vmatprep.subr.bf16.mxu0 %v8493_v12  ;;  %v8524_v11 = vld [vmem:[%s10899_s1 + $0x2a0] sm:$0xff]   ;;  %v8525_v12 = vld [vmem:[%s10899_s1 + $0x268] sm:$0xff]  }
  0x36   :  { %7550 = vmatprep.subr.bf16.mxu1 %v8494_v13  ;;  %1493 = vmatprep.mubr.bf16.mxu0 %v6355_v19  ;;  %v8526_v13 = vld [vmem:[%s10899_s1 + $0x2e8] sm:$0xff]   ;;  %v80_v19 = vld [vmem:[%s10900_s0 + $0x198] sm:$0xff] }
  0x37   :  { %1558 = vmatprep.mubr.bf16.mxu1 %v6357_v22  ;;  %v6361_v22 = vcombine.high %v80_v19, %v88_v20 }
  0x38   :  { %7511 = vmatpush3.bf16.msra.mxu0 %v8495_v14  ;;  %v8527_v14 = vld [vmem:[%s10899_s1 + $0x228] sm:$0xff]  }
  0x39   :  { %7551 = vmatpush3.bf16.msra.mxu1 %v8496_v15  ;;  %7512 = vmatprep.subr.bf16.mxu0 %v8497_v24  ;;  %v8528_v15 = vld [vmem:[%s10899_s1 + $0x2a8] sm:$0xff]   ;;  %v8529_v24 = vld [vmem:[%s10899_s1 + $0x270] sm:$0xff]  }
  0x3a   :  { %7552 = vmatprep.subr.bf16.mxu1 %v8498_v25  ;;  %v8530_v25 = vld [vmem:[%s10899_s1 + $0x2f0] sm:$0xff]  }
  0x3b   :  { %1494 = vmatmul.mubr.bf16.gmra.mrb[12].mxu0 %v6354_v21  ;;  %v6358_v21 = vcombine.low %v79_v16, %v87_v17  ;;  %v81_v16 = vld [vmem:[%s10900_s0 + $0x1a0] sm:$0xff] }
  0x3c   :  { %1559 = vmatmul.mubr.bf16.gmra.mrb[12].mxu1 %v6356_v23  ;;  %7513 = vmatpush3.bf16.msra.mxu0 %v8499_v26  ;;  %v6360_v23 = vcombine.low %v80_v19, %v88_v20  ;;  %v8531_v26 = vld [vmem:[%s10899_s1 + $0x230] sm:$0xff]   ;;  %v89_v17 = vld [vmem:[%s10900_s0 + $0x1e0] sm:$0xff]  ;;  %v90_v19 = vld [vmem:[%s10900_s0 + $0x1e8] sm:$0xff] }
  0x3d   :  { %7553 = vmatpush3.bf16.msra.mxu1 %v8500_v27  ;;  %7514 = vmatprep.subr.bf16.mxu0 %v8501_v28  ;;  %v8532_v27 = vld [vmem:[%s10899_s1 + $0x2b0] sm:$0xff]   ;;  %v8533_v28 = vld [vmem:[%s10899_s1 + $0x278] sm:$0xff]   ;;  %v6363_v20 = vcombine.high %v81_v16, %v89_v17 }
  0x3e   :  { %7554 = vmatprep.subr.bf16.mxu1 %v8502_v29  ;;  %1599 = vmatprep.mubr.bf16.mxu0 %v6311_v35  ;;  %v8534_v29 = vld [vmem:[%s10899_s1 + $0x2f8] sm:$0xff]   ;;  %v42_v35 = vld [vmem:[%s10900_s0 + $0x68] sm:$0xff] }
  0x3f   :  { %1664 = vmatprep.mubr.bf16.mxu1 %v6313_v39 }
  0x40   :  { %7515 = vmatpush3.bf16.msra.mxu0 %v8503_v30  ;;  %v8535_v30 = vld [vmem:[%s10899_s1 + $0x238] sm:$0xff]  }
  0x41   :  { %7555 = vmatpush3.bf16.msra.mxu1 %v8504_v31  ;;  %7580 = vmatprep.subr.bf16.mxu0 %v8505_v40  ;;  %v8536_v31 = vld [vmem:[%s10899_s1 + $0x2b8] sm:$0xff]   ;;  %v8537_v40 = vld [vmem:[%s10899_s1 + $0x340] sm:$0xff]  }
  0x42   :  { %7620 = vmatprep.subr.bf16.mxu1 %v8506_v41  ;;  %v8538_v41 = vld [vmem:[%s10899_s1 + $0x3c0] sm:$0xff]  }
  0x43   :  { %1600 = vmatmul.mubr.bf16.vlgmr.msra.gmra.mrb[16].mxu0 %v6310_v34  ;;  %v34_v34 = vld [vmem:[%s10900_s0 + $0x28] sm:$0xff] }
  0x44   :  { %1665 = vmatmul.mubr.bf16.vlgmr.msra.gmra.mrb[16].mxu1 %v6312_v38  ;;  %7581 = vmatpush3.bf16.msra.mxu0 %v8507_v42  ;;  %v6316_v38 = vcombine.low %v34_v34, %v42_v35  ;;  %v6317_v39 = vcombine.high %v34_v34, %v42_v35  ;;  %v8539_v42 = vld [vmem:[%s10899_s1 + $0x300] sm:$0xff]   ;;  %v36_v34 = vld [vmem:[%s10900_s0 + $0x38] sm:$0xff]  ;;  %v6318_v35 = vcombine.low %v35_v32, %v43_v33 }
  0x45   :  { %7621 = vmatpush3.bf16.msra.mxu1 %v8508_v43  ;;  %7582 = vmatprep.subr.bf16.mxu0 %v8509_v44  ;;  %v8540_v43 = vld [vmem:[%s10899_s1 + $0x380] sm:$0xff]   ;;  %v8541_v44 = vld [vmem:[%s10899_s1 + $0x348] sm:$0xff]  }
  0x46   :  { %7622 = vmatprep.subr.bf16.mxu1 %v8510_v45  ;;  %1607 = vmatprep.mubr.bf16.mxu0 %v6327_v52  ;;  %v8542_v45 = vld [vmem:[%s10899_s1 + $0x3c8] sm:$0xff]  }
  0x47   :  { %1672 = vmatprep.mubr.bf16.mxu1 %v6329_v53  ;;  %v58_v52 = vld [vmem:[%s10900_s0 + $0xe8] sm:$0xff]  ;;  %v6330_v53 = vcombine.low %v49_v48, %v57_v49  ;;  %v51_v48 = vld [vmem:[%s10900_s0 + $0xb0] sm:$0xff] }
  0x48   :  { %7583 = vmatpush3.bf16.msra.mxu0 %v8511_v46  ;;  %v8543_v46 = vld [vmem:[%s10899_s1 + $0x308] sm:$0xff]   ;;  %v59_v49 = vld [vmem:[%s10900_s0 + $0xf0] sm:$0xff] }
  0x49   :  { %7623 = vmatpush3.bf16.msra.mxu1 %v8512_v47  ;;  %7584 = vmatprep.subr.bf16.mxu0 %v8513_v56  ;;  %v8544_v47 = vld [vmem:[%s10899_s1 + $0x388] sm:$0xff]   ;;  %v8545_v56 = vld [vmem:[%s10899_s1 + $0x350] sm:$0xff]  }
  0x4a   :  { %7624 = vmatprep.subr.bf16.mxu1 %v8514_v57  ;;  %v8546_v57 = vld [vmem:[%s10899_s1 + $0x3d0] sm:$0xff]  }
  0x4b   :  { %1608 = vmatmul.mubr.bf16.gmra.mrb[20].mxu0 %v6326_v54  ;;  %v6333_v54 = vcombine.high %v50_v50, %v58_v52 }
  0x4c   :  { %1673 = vmatmul.mubr.bf16.gmra.mrb[20].mxu1 %v6328_v55  ;;  %7585 = vmatpush3.bf16.msra.mxu0 %v8515_v58  ;;  %v6332_v55 = vcombine.low %v50_v50, %v58_v52  ;;  %v8547_v58 = vld [vmem:[%s10899_s1 + $0x310] sm:$0xff]   ;;  %v6335_v50 = vcombine.high %v51_v48, %v59_v49  ;;  %v60_v52 = vld [vmem:[%s10900_s0 + $0xf8] sm:$0xff] }
  0x4d   :  { %7625 = vmatpush3.bf16.msra.mxu1 %v8516_v59  ;;  %7586 = vmatprep.subr.bf16.mxu0 %v8517_v60  ;;  %v8548_v59 = vld [vmem:[%s10899_s1 + $0x390] sm:$0xff]   ;;  %v8549_v60 = vld [vmem:[%s10899_s1 + $0x358] sm:$0xff]  }
  0x4e   :  { %7626 = vmatprep.subr.bf16.mxu1 %v8518_v61  ;;  %1615 = vmatprep.mubr.bf16.mxu0 %v6343_v3  ;;  %v8550_v61 = vld [vmem:[%s10899_s1 + $0x3d8] sm:$0xff]   ;;  %v66_v3 = vld [vmem:[%s10900_s0 + $0x128] sm:$0xff] }
  0x4f   :  { %1680 = vmatprep.mubr.bf16.mxu1 %v6345_v6  ;;  %v6349_v6 = vcombine.high %v66_v3, %v74_v4 }
  0x50   :  { %7587 = vmatpush3.bf16.msra.mxu0 %v8519_v62  ;;  %v8551_v62 = vld [vmem:[%s10899_s1 + $0x318] sm:$0xff]  }
  0x51   :  { %7627 = vmatpush3.bf16.msra.mxu1 %v8520_v63  ;;  %7588 = vmatprep.subr.bf16.mxu0 %v8521_v8  ;;  %v8552_v63 = vld [vmem:[%s10899_s1 + $0x398] sm:$0xff]   ;;  %v8553_v8 = vld [vmem:[%s10899_s1 + $0x360] sm:$0xff]  }
  0x52   :  { %7628 = vmatprep.subr.bf16.mxu1 %v8522_v9  ;;  %v8554_v9 = vld [vmem:[%s10899_s1 + $0x3e0] sm:$0xff]  }
  0x53   :  { %1616 = vmatmul.mubr.bf16.gmra.mrb[24].mxu0 %v6342_v5  ;;  %v6346_v5 = vcombine.low %v65_v0, %v73_v1  ;;  %v67_v0 = vld [vmem:[%s10900_s0 + $0x130] sm:$0xff] }
  0x54   :  { %1681 = vmatmul.mubr.bf16.gmra.mrb[24].mxu1 %v6344_v7  ;;  %7589 = vmatpush3.bf16.msra.mxu0 %v8523_v10  ;;  %v6348_v7 = vcombine.low %v66_v3, %v74_v4  ;;  %v8555_v10 = vld [vmem:[%s10899_s1 + $0x320] sm:$0xff]   ;;  %v75_v1 = vld [vmem:[%s10900_s0 + $0x170] sm:$0xff]  ;;  %v76_v3 = vld [vmem:[%s10900_s0 + $0x178] sm:$0xff] }
  0x55   :  { %7629 = vmatpush3.bf16.msra.mxu1 %v8524_v11  ;;  %7590 = vmatprep.subr.bf16.mxu0 %v8525_v12  ;;  %v8556_v11 = vld [vmem:[%s10899_s1 + $0x3a0] sm:$0xff]   ;;  %v8557_v12 = vld [vmem:[%s10899_s1 + $0x368] sm:$0xff]   ;;  %v6351_v4 = vcombine.high %v67_v0, %v75_v1 }
  0x56   :  { %7630 = vmatprep.subr.bf16.mxu1 %v8526_v13  ;;  %1623 = vmatprep.mubr.bf16.mxu0 %v6359_v18  ;;  %v8558_v13 = vld [vmem:[%s10899_s1 + $0x3e8] sm:$0xff]  }
  0x57   :  { %1688 = vmatprep.mubr.bf16.mxu1 %v6361_v22  ;;  %v82_v18 = vld [vmem:[%s10900_s0 + $0x1a8] sm:$0xff]  ;;  %v6362_v22 = vcombine.low %v81_v16, %v89_v17  ;;  %v83_v16 = vld [vmem:[%s10900_s0 + $0x1b0] sm:$0xff] }
  0x58   :  { %7591 = vmatpush3.bf16.msra.mxu0 %v8527_v14  ;;  %v8559_v14 = vld [vmem:[%s10899_s1 + $0x328] sm:$0xff]   ;;  %v91_v17 = vld [vmem:[%s10900_s0 + $0x1f0] sm:$0xff] }
  0x59   :  { %7631 = vmatpush3.bf16.msra.mxu1 %v8528_v15  ;;  %7592 = vmatprep.subr.bf16.mxu0 %v8529_v24  ;;  %v8560_v15 = vld [vmem:[%s10899_s1 + $0x3a8] sm:$0xff]   ;;  %v8561_v24 = vld [vmem:[%s10899_s1 + $0x370] sm:$0xff]  }
  0x5a   :  { %7632 = vmatprep.subr.bf16.mxu1 %v8530_v25  ;;  %v8562_v25 = vld [vmem:[%s10899_s1 + $0x3f0] sm:$0xff]  }
  0x5b   :  { %1624 = vmatmul.mubr.bf16.gmra.mrb[28].mxu0 %v6358_v21  ;;  %v6365_v21 = vcombine.high %v82_v18, %v90_v19 }
  0x5c   :  { %1689 = vmatmul.mubr.bf16.gmra.mrb[28].mxu1 %v6360_v23  ;;  %7593 = vmatpush3.bf16.msra.mxu0 %v8531_v26  ;;  %v6364_v23 = vcombine.low %v82_v18, %v90_v19  ;;  %v8563_v26 = vld [vmem:[%s10899_s1 + $0x330] sm:$0xff]   ;;  %v84_v18 = vld [vmem:[%s10900_s0 + $0x1b8] sm:$0xff]  ;;  %v6367_v19 = vcombine.high %v83_v16, %v91_v17 }
  0x5d   :  { %7633 = vmatpush3.bf16.msra.mxu1 %v8532_v27  ;;  %7594 = vmatprep.subr.bf16.mxu0 %v8533_v28  ;;  %v8564_v27 = vld [vmem:[%s10899_s1 + $0x3b0] sm:$0xff]   ;;  %v8565_v28 = vld [vmem:[%s10899_s1 + $0x378] sm:$0xff]  }
  0x5e   :  { %7634 = vmatprep.subr.bf16.mxu1 %v8534_v29  ;;  %1729 = vmatprep.mubr.bf16.mxu0 %v6315_v37  ;;  %v8566_v29 = vld [vmem:[%s10899_s1 + $0x3f8] sm:$0xff]  }
  0x5f   :  { %1794 = vmatprep.mubr.bf16.mxu1 %v6317_v39  ;;  %v44_v37 = vld [vmem:[%s10900_s0 + $0x78] sm:$0xff] }
  0x60   :  { %7595 = vmatpush3.bf16.msra.mxu0 %v8535_v30  ;;  %v8567_v30 = vld [vmem:[%s10899_s1 + $0x338] sm:$0xff]   ;;  %v6321_v39 = vcombine.high %v36_v34, %v44_v37 }
  0x61   :  { %7635 = vmatpush3.bf16.msra.mxu1 %v8536_v31  ;;  %7660 = vmatprep.subr.bf16.mxu0 %v8537_v40  ;;  %v8568_v31 = vld [vmem:[%s10899_s1 + $0x3b8] sm:$0xff]   ;;  %v8569_v40 = vld [vmem:[%s10899_s1 + $0x440] sm:$0xff]  }
  0x62   :  { %7700 = vmatprep.subr.bf16.mxu1 %v8538_v41  ;;  %v8570_v41 = vld [vmem:[%s10899_s1 + $0x4c0] sm:$0xff]  }
  0x63   :  { %1730 = vmatmul.mubr.bf16.vlgmr.msra.gmra.mrb[32].mxu0 %v6314_v36  ;;  %v6319_v36 = vcombine.high %v35_v32, %v43_v33  ;;  %v1966_v32 = vld [vmem:[%s10900_s0 + $0x80] sm:$0xff] }
  0x64   :  { %1795 = vmatmul.mubr.bf16.vlgmr.msra.gmra.mrb[32].mxu1 %v6316_v38  ;;  %7661 = vmatpush3.bf16.msra.mxu0 %v8539_v42  ;;  %v6320_v38 = vcombine.low %v36_v34, %v44_v37  ;;  %v8571_v42 = vld [vmem:[%s10899_s1 + $0x400] sm:$0xff]   ;;  %v1975_v37 = vld [vmem:[%s10900_s0 + $0xc8] sm:$0xff] }
  0x65   :  { %7701 = vmatpush3.bf16.msra.mxu1 %v8540_v43  ;;  %7662 = vmatprep.subr.bf16.mxu0 %v8541_v44  ;;  %v8572_v43 = vld [vmem:[%s10899_s1 + $0x480] sm:$0xff]   ;;  %v8573_v44 = vld [vmem:[%s10899_s1 + $0x448] sm:$0xff]  }
  0x66   :  { %7702 = vmatprep.subr.bf16.mxu1 %v8542_v45  ;;  %1737 = vmatprep.mubr.bf16.mxu0 %v6331_v51  ;;  %v8574_v45 = vld [vmem:[%s10899_s1 + $0x4c8] sm:$0xff]   ;;  %v52_v51 = vld [vmem:[%s10900_s0 + $0xb8] sm:$0xff]  ;;  %v1974_v33 = vld [vmem:[%s10900_s0 + $0xc0] sm:$0xff] }
  0x67   :  { %1802 = vmatprep.mubr.bf16.mxu1 %v6333_v54  ;;  %v6337_v54 = vcombine.high %v52_v51, %v60_v52  ;;  %v6754_v34 = vcombine.low %v1966_v32, %v1974_v33 }
  0x68   :  { %7663 = vmatpush3.bf16.msra.mxu0 %v8543_v46  ;;  %v8575_v46 = vld [vmem:[%s10899_s1 + $0x408] sm:$0xff]  }
  0x69   :  { %7703 = vmatpush3.bf16.msra.mxu1 %v8544_v47  ;;  %7664 = vmatprep.subr.bf16.mxu0 %v8545_v56  ;;  %v8576_v47 = vld [vmem:[%s10899_s1 + $0x488] sm:$0xff]   ;;  %v8577_v56 = vld [vmem:[%s10899_s1 + $0x450] sm:$0xff]  }
  0x6a   :  { %7704 = vmatprep.subr.bf16.mxu1 %v8546_v57  ;;  %v8578_v57 = vld [vmem:[%s10899_s1 + $0x4d0] sm:$0xff]  }
  0x6b   :  { %1738 = vmatmul.mubr.bf16.gmra.mrb[36].mxu0 %v6330_v53  ;;  %v6334_v53 = vcombine.low %v51_v48, %v59_v49  ;;  %v1982_v48 = vld [vmem:[%s10900_s0 + $0x100] sm:$0xff] }
  0x6c   :  { %1803 = vmatmul.mubr.bf16.gmra.mrb[36].mxu1 %v6332_v55  ;;  %7665 = vmatpush3.bf16.msra.mxu0 %v8547_v58  ;;  %v6336_v55 = vcombine.low %v52_v51, %v60_v52  ;;  %v8579_v58 = vld [vmem:[%s10899_s1 + $0x410] sm:$0xff]   ;;  %v1990_v49 = vld [vmem:[%s10900_s0 + $0x140] sm:$0xff]  ;;  %v1991_v51 = vld [vmem:[%s10900_s0 + $0x148] sm:$0xff] }
  0x6d   :  { %7705 = vmatpush3.bf16.msra.mxu1 %v8548_v59  ;;  %7666 = vmatprep.subr.bf16.mxu0 %v8549_v60  ;;  %v8580_v59 = vld [vmem:[%s10899_s1 + $0x490] sm:$0xff]   ;;  %v8581_v60 = vld [vmem:[%s10899_s1 + $0x458] sm:$0xff]   ;;  %v6771_v52 = vcombine.high %v1982_v48, %v1990_v49 }
  0x6e   :  { %7706 = vmatprep.subr.bf16.mxu1 %v8550_v61  ;;  %1745 = vmatprep.mubr.bf16.mxu0 %v6347_v2  ;;  %v8582_v61 = vld [vmem:[%s10899_s1 + $0x4d8] sm:$0xff]  }
  0x6f   :  { %1810 = vmatprep.mubr.bf16.mxu1 %v6349_v6  ;;  %v68_v2 = vld [vmem:[%s10900_s0 + $0x138] sm:$0xff]  ;;  %v6350_v6 = vcombine.low %v67_v0, %v75_v1  ;;  %v1998_v0 = vld [vmem:[%s10900_s0 + $0x180] sm:$0xff] }
  0x70   :  { %7667 = vmatpush3.bf16.msra.mxu0 %v8551_v62  ;;  %v8583_v62 = vld [vmem:[%s10899_s1 + $0x418] sm:$0xff]   ;;  %v2006_v1 = vld [vmem:[%s10900_s0 + $0x1c0] sm:$0xff] }
  0x71   :  { %7707 = vmatpush3.bf16.msra.mxu1 %v8552_v63  ;;  %7668 = vmatprep.subr.bf16.mxu0 %v8553_v8  ;;  %v8584_v63 = vld [vmem:[%s10899_s1 + $0x498] sm:$0xff]   ;;  %v8585_v8 = vld [vmem:[%s10899_s1 + $0x460] sm:$0xff]  }
  0x72   :  { %7708 = vmatprep.subr.bf16.mxu1 %v8554_v9  ;;  %v8586_v9 = vld [vmem:[%s10899_s1 + $0x4e0] sm:$0xff]  }
  0x73   :  { %1746 = vmatmul.mubr.bf16.gmra.mrb[40].mxu0 %v6346_v5  ;;  %v6353_v5 = vcombine.high %v68_v2, %v76_v3 }
  0x74   :  { %1811 = vmatmul.mubr.bf16.gmra.mrb[40].mxu1 %v6348_v7  ;;  %7669 = vmatpush3.bf16.msra.mxu0 %v8555_v10  ;;  %v6352_v7 = vcombine.low %v68_v2, %v76_v3  ;;  %v8587_v10 = vld [vmem:[%s10899_s1 + $0x420] sm:$0xff]   ;;  %v1999_v2 = vld [vmem:[%s10900_s0 + $0x188] sm:$0xff]  ;;  %v6787_v3 = vcombine.high %v1998_v0, %v2006_v1 }
  0x75   :  { %7709 = vmatpush3.bf16.msra.mxu1 %v8556_v11  ;;  %7670 = vmatprep.subr.bf16.mxu0 %v8557_v12  ;;  %v8588_v11 = vld [vmem:[%s10899_s1 + $0x4a0] sm:$0xff]   ;;  %v8589_v12 = vld [vmem:[%s10899_s1 + $0x468] sm:$0xff]  }
  0x76   :  { %7710 = vmatprep.subr.bf16.mxu1 %v8558_v13  ;;  %1753 = vmatprep.mubr.bf16.mxu0 %v6363_v20  ;;  %v8590_v13 = vld [vmem:[%s10899_s1 + $0x4e8] sm:$0xff]   ;;  %v92_v20 = vld [vmem:[%s10900_s0 + $0x1f8] sm:$0xff] }
  0x77   :  { %1818 = vmatprep.mubr.bf16.mxu1 %v6365_v21  ;;  %v6366_v21 = vcombine.low %v83_v16, %v91_v17  ;;  %v2014_v16 = vld [vmem:[%s10900_s0 + $0x200] sm:$0xff] }
  0x78   :  { %7671 = vmatpush3.bf16.msra.mxu0 %v8559_v14  ;;  %v8591_v14 = vld [vmem:[%s10899_s1 + $0x428] sm:$0xff]   ;;  %v2022_v17 = vld [vmem:[%s10900_s0 + $0x240] sm:$0xff] }
  0x79   :  { %7711 = vmatpush3.bf16.msra.mxu1 %v8560_v15  ;;  %7672 = vmatprep.subr.bf16.mxu0 %v8561_v24  ;;  %v8592_v15 = vld [vmem:[%s10899_s1 + $0x4a8] sm:$0xff]   ;;  %v8593_v24 = vld [vmem:[%s10899_s1 + $0x470] sm:$0xff]  }
  0x7a   :  { %7712 = vmatprep.subr.bf16.mxu1 %v8562_v25  ;;  %v8594_v25 = vld [vmem:[%s10899_s1 + $0x4f0] sm:$0xff]  }
  0x7b   :  { %1754 = vmatmul.mubr.bf16.gmra.mrb[44].mxu0 %v6362_v22  ;;  %v6369_v22 = vcombine.high %v84_v18, %v92_v20 }
  0x7c   :  { %1819 = vmatmul.mubr.bf16.gmra.mrb[44].mxu1 %v6364_v23  ;;  %7673 = vmatpush3.bf16.msra.mxu0 %v8563_v26  ;;  %v6368_v23 = vcombine.low %v84_v18, %v92_v20  ;;  %v8595_v26 = vld [vmem:[%s10899_s1 + $0x430] sm:$0xff]   ;;  %v6803_v18 = vcombine.high %v2014_v16, %v2022_v17  ;;  %v2023_v20 = vld [vmem:[%s10900_s0 + $0x248] sm:$0xff] }
  0x7d   :  { %7713 = vmatpush3.bf16.msra.mxu1 %v8564_v27  ;;  %7674 = vmatprep.subr.bf16.mxu0 %v8565_v28  ;;  %v8596_v27 = vld [vmem:[%s10899_s1 + $0x4b0] sm:$0xff]   ;;  %v8597_v28 = vld [vmem:[%s10899_s1 + $0x478] sm:$0xff]  }
  0x7e   :  { %7714 = vmatprep.subr.bf16.mxu1 %v8566_v29  ;;  %1859 = vmatprep.mubr.bf16.mxu0 %v6319_v36  ;;  %v8598_v29 = vld [vmem:[%s10899_s1 + $0x4f8] sm:$0xff]   ;;  %v1967_v36 = vld [vmem:[%s10900_s0 + $0x88] sm:$0xff] }
  0x7f   :  { %1924 = vmatprep.mubr.bf16.mxu1 %v6321_v39  ;;  %v6757_v39 = vcombine.high %v1967_v36, %v1975_v37 }
  0x80   :  { %7675 = vmatpush3.bf16.msra.mxu0 %v8567_v30  ;;  %v8599_v30 = vld [vmem:[%s10899_s1 + $0x438] sm:$0xff]  }
  0x81   :  { %7715 = vmatpush3.bf16.msra.mxu1 %v8568_v31  ;;  %7740 = vmatprep.subr.bf16.mxu0 %v8569_v40  ;;  %v8600_v31 = vld [vmem:[%s10899_s1 + $0x4b8] sm:$0xff]   ;;  %v8601_v40 = vld [vmem:[%s10899_s1 + $0x540] sm:$0xff]  }
  0x82   :  { %7780 = vmatprep.subr.bf16.mxu1 %v8570_v41  ;;  %v8602_v41 = vld [vmem:[%s10899_s1 + $0x5c0] sm:$0xff]  }
  0x83   :  { %1860 = vmatmul.mubr.bf16.vlgmr.msra.gmra.mrb[48].mxu0 %v6318_v35  ;;  %v6755_v35 = vcombine.high %v1966_v32, %v1974_v33  ;;  %v1968_v32 = vld [vmem:[%s10900_s0 + $0x90] sm:$0xff] }
  0x84   :  { %1925 = vmatmul.mubr.bf16.vlgmr.msra.gmra.mrb[48].mxu1 %v6320_v38  ;;  %7741 = vmatpush3.bf16.msra.mxu0 %v8571_v42  ;;  %v6756_v38 = vcombine.low %v1967_v36, %v1975_v37  ;;  %v8603_v42 = vld [vmem:[%s10899_s1 + $0x500] sm:$0xff]   ;;  %v1976_v33 = vld [vmem:[%s10900_s0 + $0xd0] sm:$0xff] }
  0x85   :  { %7781 = vmatpush3.bf16.msra.mxu1 %v8572_v43  ;;  %7742 = vmatprep.subr.bf16.mxu0 %v8573_v44  ;;  %v8604_v43 = vld [vmem:[%s10899_s1 + $0x580] sm:$0xff]   ;;  %v8605_v44 = vld [vmem:[%s10899_s1 + $0x548] sm:$0xff]   ;;  %v6758_v36 = vcombine.low %v1968_v32, %v1976_v33  ;;  %v6759_v37 = vcombine.high %v1968_v32, %v1976_v33  ;;  %v8660_v32 = vld [vmem:[%s10899_s1 + $0x6b0] sm:$0xff]  }
  0x86   :  { %7782 = vmatprep.subr.bf16.mxu1 %v8574_v45  ;;  %1867 = vmatprep.mubr.bf16.mxu0 %v6335_v50  ;;  %v8606_v45 = vld [vmem:[%s10899_s1 + $0x5c8] sm:$0xff]  }
  0x87   :  { %1932 = vmatprep.mubr.bf16.mxu1 %v6337_v54  ;;  %v1983_v50 = vld [vmem:[%s10900_s0 + $0x108] sm:$0xff]  ;;  %v6770_v54 = vcombine.low %v1982_v48, %v1990_v49  ;;  %v1984_v48 = vld [vmem:[%s10900_s0 + $0x110] sm:$0xff] }
  0x88   :  { %7743 = vmatpush3.bf16.msra.mxu0 %v8575_v46  ;;  %v8607_v46 = vld [vmem:[%s10899_s1 + $0x508] sm:$0xff]   ;;  %v1992_v49 = vld [vmem:[%s10900_s0 + $0x150] sm:$0xff] }
  0x89   :  { %7783 = vmatpush3.bf16.msra.mxu1 %v8576_v47  ;;  %7744 = vmatprep.subr.bf16.mxu0 %v8577_v56  ;;  %v8608_v47 = vld [vmem:[%s10899_s1 + $0x588] sm:$0xff]   ;;  %v8609_v56 = vld [vmem:[%s10899_s1 + $0x550] sm:$0xff]  }
  0x8a   :  { %7784 = vmatprep.subr.bf16.mxu1 %v8578_v57  ;;  %v8610_v57 = vld [vmem:[%s10899_s1 + $0x5d0] sm:$0xff]  }
  0x8b   :  { %1868 = vmatmul.mubr.bf16.gmra.mrb[52].mxu0 %v6334_v53  ;;  %v6773_v53 = vcombine.high %v1983_v50, %v1991_v51 }
  0x8c   :  { %1933 = vmatmul.mubr.bf16.gmra.mrb[52].mxu1 %v6336_v55  ;;  %7745 = vmatpush3.bf16.msra.mxu0 %v8579_v58  ;;  %v6772_v55 = vcombine.low %v1983_v50, %v1991_v51  ;;  %v8611_v58 = vld [vmem:[%s10899_s1 + $0x510] sm:$0xff]   ;;  %v1985_v50 = vld [vmem:[%s10900_s0 + $0x118] sm:$0xff]  ;;  %v6775_v51 = vcombine.high %v1984_v48, %v1992_v49 }
  0x8d   :  { %7785 = vmatpush3.bf16.msra.mxu1 %v8580_v59  ;;  %7746 = vmatprep.subr.bf16.mxu0 %v8581_v60  ;;  %v8612_v59 = vld [vmem:[%s10899_s1 + $0x590] sm:$0xff]   ;;  %v8613_v60 = vld [vmem:[%s10899_s1 + $0x558] sm:$0xff]  }
  0x8e   :  { %7786 = vmatprep.subr.bf16.mxu1 %v8582_v61  ;;  %1875 = vmatprep.mubr.bf16.mxu0 %v6351_v4  ;;  %v8614_v61 = vld [vmem:[%s10899_s1 + $0x5d8] sm:$0xff]   ;;  %v2007_v4 = vld [vmem:[%s10900_s0 + $0x1c8] sm:$0xff] }
  0x8f   :  { %1940 = vmatprep.mubr.bf16.mxu1 %v6353_v5  ;;  %v6786_v5 = vcombine.low %v1998_v0, %v2006_v1  ;;  %v2000_v0 = vld [vmem:[%s10900_s0 + $0x190] sm:$0xff] }
  0x90   :  { %7747 = vmatpush3.bf16.msra.mxu0 %v8583_v62  ;;  %v8615_v62 = vld [vmem:[%s10899_s1 + $0x518] sm:$0xff]   ;;  %v2008_v1 = vld [vmem:[%s10900_s0 + $0x1d0] sm:$0xff] }
  0x91   :  { %7787 = vmatpush3.bf16.msra.mxu1 %v8584_v63  ;;  %7748 = vmatprep.subr.bf16.mxu0 %v8585_v8  ;;  %v8616_v63 = vld [vmem:[%s10899_s1 + $0x598] sm:$0xff]   ;;  %v8617_v8 = vld [vmem:[%s10899_s1 + $0x560] sm:$0xff]  }
  0x92   :  { %7788 = vmatprep.subr.bf16.mxu1 %v8586_v9  ;;  %v8618_v9 = vld [vmem:[%s10899_s1 + $0x5e0] sm:$0xff]  }
  0x93   :  { %1876 = vmatmul.mubr.bf16.gmra.mrb[56].mxu0 %v6350_v6  ;;  %v6789_v6 = vcombine.high %v1999_v2, %v2007_v4 }
  0x94   :  { %1941 = vmatmul.mubr.bf16.gmra.mrb[56].mxu1 %v6352_v7  ;;  %7749 = vmatpush3.bf16.msra.mxu0 %v8587_v10  ;;  %v6788_v7 = vcombine.low %v1999_v2, %v2007_v4  ;;  %v8619_v10 = vld [vmem:[%s10899_s1 + $0x520] sm:$0xff]   ;;  %v6791_v2 = vcombine.high %v2000_v0, %v2008_v1  ;;  %v2009_v4 = vld [vmem:[%s10900_s0 + $0x1d8] sm:$0xff] }
  0x95   :  { %7789 = vmatpush3.bf16.msra.mxu1 %v8588_v11  ;;  %7750 = vmatprep.subr.bf16.mxu0 %v8589_v12  ;;  %v8620_v11 = vld [vmem:[%s10899_s1 + $0x5a0] sm:$0xff]   ;;  %v8621_v12 = vld [vmem:[%s10899_s1 + $0x568] sm:$0xff]  }
  0x96   :  { %7790 = vmatprep.subr.bf16.mxu1 %v8590_v13  ;;  %1883 = vmatprep.mubr.bf16.mxu0 %v6367_v19  ;;  %v8622_v13 = vld [vmem:[%s10899_s1 + $0x5e8] sm:$0xff]  }
  0x97   :  { %1948 = vmatprep.mubr.bf16.mxu1 %v6369_v22  ;;  %v2015_v19 = vld [vmem:[%s10900_s0 + $0x208] sm:$0xff] }
  0x98   :  { %7751 = vmatpush3.bf16.msra.mxu0 %v8591_v14  ;;  %v8623_v14 = vld [vmem:[%s10899_s1 + $0x528] sm:$0xff]   ;;  %v6805_v22 = vcombine.high %v2015_v19, %v2023_v20 }
  0x99   :  { %7791 = vmatpush3.bf16.msra.mxu1 %v8592_v15  ;;  %7752 = vmatprep.subr.bf16.mxu0 %v8593_v24  ;;  %v8624_v15 = vld [vmem:[%s10899_s1 + $0x5a8] sm:$0xff]   ;;  %v8625_v24 = vld [vmem:[%s10899_s1 + $0x570] sm:$0xff]  }
  0x9a   :  { %7792 = vmatprep.subr.bf16.mxu1 %v8594_v25  ;;  %v8626_v25 = vld [vmem:[%s10899_s1 + $0x5f0] sm:$0xff]  }
  0x9b   :  { %1884 = vmatmul.mubr.bf16.gmra.mrb[60].mxu0 %v6366_v21  ;;  %v6802_v21 = vcombine.low %v2014_v16, %v2022_v17  ;;  %v2016_v16 = vld [vmem:[%s10900_s0 + $0x210] sm:$0xff] }
  0x9c   :  { %1949 = vmatmul.mubr.bf16.gmra.mrb[60].mxu1 %v6368_v23  ;;  %7753 = vmatpush3.bf16.msra.mxu0 %v8595_v26  ;;  %v6804_v23 = vcombine.low %v2015_v19, %v2023_v20  ;;  %v8627_v26 = vld [vmem:[%s10899_s1 + $0x530] sm:$0xff]   ;;  %v2025_v19 = vld [vmem:[%s10900_s0 + $0x258] sm:$0xff] }
  0x9d   :  { %7793 = vmatpush3.bf16.msra.mxu1 %v8596_v27  ;;  %7754 = vmatprep.subr.bf16.mxu0 %v8597_v28  ;;  %v8628_v27 = vld [vmem:[%s10899_s1 + $0x5b0] sm:$0xff]   ;;  %v8629_v28 = vld [vmem:[%s10899_s1 + $0x578] sm:$0xff]  }
  0x9e   :  { %7794 = vmatprep.subr.bf16.mxu1 %v8598_v29  ;;  %3407 = vmatprep.mubr.bf16.mxu0 %v6755_v35  ;;  %v8630_v29 = vld [vmem:[%s10899_s1 + $0x5f8] sm:$0xff]   ;;  %v2024_v17 = vld [vmem:[%s10900_s0 + $0x250] sm:$0xff] }
  0x9f   :  { %3472 = vmatprep.mubr.bf16.mxu1 %v6757_v39  ;;  %v1977_v35 = vld [vmem:[%s10900_s0 + $0xd8] sm:$0xff] }
  0xa0   :  { %7755 = vmatpush3.bf16.msra.mxu0 %v8599_v30  ;;  %v8631_v30 = vld [vmem:[%s10899_s1 + $0x538] sm:$0xff]  }
  0xa1   :  { %7795 = vmatpush3.bf16.msra.mxu1 %v8600_v31  ;;  %7820 = vmatprep.subr.bf16.mxu0 %v8601_v40  ;;  %v8632_v31 = vld [vmem:[%s10899_s1 + $0x5b8] sm:$0xff]   ;;  %v8633_v40 = vld [vmem:[%s10899_s1 + $0x640] sm:$0xff]  }
  0xa2   :  { %7860 = vmatprep.subr.bf16.mxu1 %v8602_v41  ;;  %v8634_v41 = vld [vmem:[%s10899_s1 + $0x6c0] sm:$0xff]  }
  0xa3   :  { %3408 = vmatmul.mubr.bf16.vlgmr.msra.gmra.mrb[64].mxu0 %v6754_v34  ;;  %v1969_v34 = vld [vmem:[%s10900_s0 + $0x98] sm:$0xff] }
  0xa4   :  { %3473 = vmatmul.mubr.bf16.vlgmr.msra.gmra.mrb[64].mxu1 %v6756_v38  ;;  %7821 = vmatpush3.bf16.msra.mxu0 %v8603_v42  ;;  %v6760_v38 = vcombine.low %v1969_v34, %v1977_v35  ;;  %v6761_v39 = vcombine.high %v1969_v34, %v1977_v35  ;;  %v8635_v42 = vld [vmem:[%s10899_s1 + $0x600] sm:$0xff]   ;;  %v8661_v35 = vld [vmem:[%s10899_s1 + $0x678] sm:$0xff]  }
  0xa5   :  { %7861 = vmatpush3.bf16.msra.mxu1 %v8604_v43  ;;  %7822 = vmatprep.subr.bf16.mxu0 %v8605_v44  ;;  %v8636_v43 = vld [vmem:[%s10899_s1 + $0x680] sm:$0xff]   ;;  %v8637_v44 = vld [vmem:[%s10899_s1 + $0x648] sm:$0xff]  }
  0xa6   :  { %7862 = vmatprep.subr.bf16.mxu1 %v8606_v45  ;;  %3415 = vmatprep.mubr.bf16.mxu0 %v6771_v52  ;;  %v8638_v45 = vld [vmem:[%s10899_s1 + $0x6c8] sm:$0xff]   ;;  %v1993_v52 = vld [vmem:[%s10900_s0 + $0x158] sm:$0xff] }
  0xa7   :  { %3480 = vmatprep.mubr.bf16.mxu1 %v6773_v53  ;;  %v6774_v53 = vcombine.low %v1984_v48, %v1992_v49 }
  0xa8   :  { %7823 = vmatpush3.bf16.msra.mxu0 %v8607_v46  ;;  %v8639_v46 = vld [vmem:[%s10899_s1 + $0x608] sm:$0xff]  }
  0xa9   :  { %7863 = vmatpush3.bf16.msra.mxu1 %v8608_v47  ;;  %7824 = vmatprep.subr.bf16.mxu0 %v8609_v56  ;;  %v8640_v47 = vld [vmem:[%s10899_s1 + $0x688] sm:$0xff]   ;;  %v8641_v56 = vld [vmem:[%s10899_s1 + $0x650] sm:$0xff]  }
  0xaa   :  { %7864 = vmatprep.subr.bf16.mxu1 %v8610_v57  ;;  %v8642_v57 = vld [vmem:[%s10899_s1 + $0x6d0] sm:$0xff]  }
  0xab   :  { %3416 = vmatmul.mubr.bf16.gmra.mrb[68].mxu0 %v6770_v54  ;;  %v6777_v54 = vcombine.high %v1985_v50, %v1993_v52 }
  0xac   :  { %3481 = vmatmul.mubr.bf16.gmra.mrb[68].mxu1 %v6772_v55  ;;  %7825 = vmatpush3.bf16.msra.mxu0 %v8611_v58  ;;  %v6776_v55 = vcombine.low %v1985_v50, %v1993_v52  ;;  %v8643_v58 = vld [vmem:[%s10899_s1 + $0x610] sm:$0xff]  }
  0xad   :  { %7865 = vmatpush3.bf16.msra.mxu1 %v8612_v59  ;;  %7826 = vmatprep.subr.bf16.mxu0 %v8613_v60  ;;  %v8644_v59 = vld [vmem:[%s10899_s1 + $0x690] sm:$0xff]   ;;  %v8645_v60 = vld [vmem:[%s10899_s1 + $0x658] sm:$0xff]  }
  0xae   :  { %7866 = vmatprep.subr.bf16.mxu1 %v8614_v61  ;;  %3423 = vmatprep.mubr.bf16.mxu0 %v6787_v3  ;;  %v8646_v61 = vld [vmem:[%s10899_s1 + $0x6d8] sm:$0xff]  }
  0xaf   :  { %3488 = vmatprep.mubr.bf16.mxu1 %v6789_v6  ;;  %v2001_v3 = vld [vmem:[%s10900_s0 + $0x198] sm:$0xff] }
  0xb0   :  { %7827 = vmatpush3.bf16.msra.mxu0 %v8615_v62  ;;  %v8647_v62 = vld [vmem:[%s10899_s1 + $0x618] sm:$0xff]   ;;  %v6793_v6 = vcombine.high %v2001_v3, %v2009_v4 }
  0xb1   :  { %7867 = vmatpush3.bf16.msra.mxu1 %v8616_v63  ;;  %7828 = vmatprep.subr.bf16.mxu0 %v8617_v8  ;;  %v8648_v63 = vld [vmem:[%s10899_s1 + $0x698] sm:$0xff]   ;;  %v8649_v8 = vld [vmem:[%s10899_s1 + $0x660] sm:$0xff]  }
  0xb2   :  { %7868 = vmatprep.subr.bf16.mxu1 %v8618_v9  ;;  %v8650_v9 = vld [vmem:[%s10899_s1 + $0x6e0] sm:$0xff]  }
  0xb3   :  { %3424 = vmatmul.mubr.bf16.gmra.mrb[72].mxu0 %v6786_v5  ;;  %v6790_v5 = vcombine.low %v2000_v0, %v2008_v1  ;;  %v8668_v0 = vld [vmem:[%s10899_s1 + $0x780] sm:$0xff]  }
  0xb4   :  { %3489 = vmatmul.mubr.bf16.gmra.mrb[72].mxu1 %v6788_v7  ;;  %7829 = vmatpush3.bf16.msra.mxu0 %v8619_v10  ;;  %v6792_v7 = vcombine.low %v2001_v3, %v2009_v4  ;;  %v8651_v10 = vld [vmem:[%s10899_s1 + $0x620] sm:$0xff]  }
  0xb5   :  { %7869 = vmatpush3.bf16.msra.mxu1 %v8620_v11  ;;  %7830 = vmatprep.subr.bf16.mxu0 %v8621_v12  ;;  %v8652_v11 = vld [vmem:[%s10899_s1 + $0x6a0] sm:$0xff]   ;;  %v8653_v12 = vld [vmem:[%s10899_s1 + $0x668] sm:$0xff]  }
  0xb6   :  { %7870 = vmatprep.subr.bf16.mxu1 %v8622_v13  ;;  %3431 = vmatprep.mubr.bf16.mxu0 %v6803_v18  ;;  %v8654_v13 = vld [vmem:[%s10899_s1 + $0x6e8] sm:$0xff]   ;;  %v2017_v18 = vld [vmem:[%s10900_s0 + $0x218] sm:$0xff] }
  0xb7   :  { %3496 = vmatprep.mubr.bf16.mxu1 %v6805_v22  ;;  %v6809_v22 = vcombine.high %v2017_v18, %v2025_v19 }
  0xb8   :  { %7831 = vmatpush3.bf16.msra.mxu0 %v8623_v14  ;;  %v8655_v14 = vld [vmem:[%s10899_s1 + $0x628] sm:$0xff]  }
  0xb9   :  { %7871 = vmatpush3.bf16.msra.mxu1 %v8624_v15  ;;  %7832 = vmatprep.subr.bf16.mxu0 %v8625_v24  ;;  %v8656_v15 = vld [vmem:[%s10899_s1 + $0x6a8] sm:$0xff]   ;;  %v6808_v24 = vcombine.low %v2017_v18, %v2025_v19 }
  0xba   :  { %7872 = vmatprep.subr.bf16.mxu1 %v8626_v25  ;;  %v8657_v25 = vld [vmem:[%s10899_s1 + $0x670] sm:$0xff]  }
  0xbb   :  { %3432 = vmatmul.mubr.bf16.gmra.mrb[76].mxu0 %v6802_v21  ;;  %v6807_v21 = vcombine.high %v2016_v16, %v2024_v17 }
  0xbc   :  { %3497 = vmatmul.mubr.bf16.gmra.mrb[76].mxu1 %v6804_v23  ;;  %7833 = vmatpush3.bf16.msra.mxu0 %v8627_v26  ;;  %v6806_v23 = vcombine.low %v2016_v16, %v2024_v17 }
  0xbd   :  { %7873 = vmatpush3.bf16.msra.mxu1 %v8628_v27  ;;  %7834 = vmatprep.subr.bf16.mxu0 %v8629_v28  ;;  %v8658_v27 = vld [vmem:[%s10899_s1 + $0x6f0] sm:$0xff]  }
  0xbe   :  { %7874 = vmatprep.subr.bf16.mxu1 %v8630_v29  ;;  %3537 = vmatprep.mubr.bf16.mxu0 %v6759_v37  ;;  %v8659_v29 = vld [vmem:[%s10899_s1 + $0x630] sm:$0xff]   ;;  %v8662_v37 = vld [vmem:[%s10899_s1 + $0x6f8] sm:$0xff]  }
  0xbf   :  { %3602 = vmatprep.mubr.bf16.mxu1 %v6761_v39 }
  0xc0   :  { %7835 = vmatpush3.bf16.msra.mxu0 %v8631_v30 }
  0xc1   :  { %7875 = vmatpush3.bf16.msra.mxu1 %v8632_v31  ;;  %7900 = vmatprep.subr.bf16.mxu0 %v8633_v40  ;;  %v8663_v40 = vld [vmem:[%s10899_s1 + $0x638] sm:$0xff]  }
  0xc2   :  { %7940 = vmatprep.subr.bf16.mxu1 %v8634_v41 }
  0xc3   :  { %3538 = vmatmul.mubr.bf16.vlgmr.msra.gmra.mrb[80].mxu0 %v6758_v36 }
  0xc4   :  { %3603 = vmatmul.mubr.bf16.vlgmr.msra.gmra.mrb[80].mxu1 %v6760_v38  ;;  %7901 = vmatpush3.bf16.msra.mxu0 %v8635_v42 }
  0xc5   :  { %7941 = vmatpush3.bf16.msra.mxu1 %v8636_v43  ;;  %7902 = vmatprep.subr.bf16.mxu0 %v8637_v44  ;;  %v8664_v43 = vld [vmem:[%s10899_s1 + $0x6b8] sm:$0xff]  }
  0xc6   :  { %7942 = vmatprep.subr.bf16.mxu1 %v8638_v45  ;;  %3545 = vmatprep.mubr.bf16.mxu0 %v6775_v51  ;;  %v1970_v45 = vld [vmem:[%s10900_s0 + $0xa0] sm:$0xff]  ;;  %v1979_v51 = vld [vmem:[%s10900_s0 + $0xe8] sm:$0xff] }
  0xc7   :  { %3610 = vmatprep.mubr.bf16.mxu1 %v6777_v54 }
  0xc8   :  { %7903 = vmatpush3.bf16.msra.mxu0 %v8639_v46  ;;  %v1978_v46 = vld [vmem:[%s10900_s0 + $0xe0] sm:$0xff] }
  0xc9   :  { %7943 = vmatpush3.bf16.msra.mxu1 %v8640_v47  ;;  %7904 = vmatprep.subr.bf16.mxu0 %v8641_v56  ;;  %v1971_v47 = vld [vmem:[%s10900_s0 + $0xa8] sm:$0xff]  ;;  %v6762_v49 = vcombine.low %v1970_v45, %v1978_v46  ;;  %v6763_v50 = vcombine.high %v1970_v45, %v1978_v46  ;;  %v8665_v56 = vld [vmem:[%s10899_s1 + $0x740] sm:$0xff]  }
  0xca   :  { %7944 = vmatprep.subr.bf16.mxu1 %v8642_v57  ;;  %v6764_v54 = vcombine.low %v1971_v47, %v1979_v51  ;;  %v2011_v45 = vld [vmem:[%s10900_s0 + $0x1e8] sm:$0xff] }
  0xcb   :  { %3546 = vmatmul.mubr.bf16.gmra.mrb[84].mxu0 %v6774_v53 }
  0xcc   :  { %3611 = vmatmul.mubr.bf16.gmra.mrb[84].mxu1 %v6776_v55  ;;  %7905 = vmatpush3.bf16.msra.mxu0 %v8643_v58  ;;  %v6765_v55 = vcombine.high %v1971_v47, %v1979_v51  ;;  %v8666_v58 = vld [vmem:[%s10899_s1 + $0x7c0] sm:$0xff]  }
  0xcd   :  { %7945 = vmatpush3.bf16.msra.mxu1 %v8644_v59  ;;  %7906 = vmatprep.subr.bf16.mxu0 %v8645_v60 }
  0xce   :  { %7946 = vmatprep.subr.bf16.mxu1 %v8646_v61  ;;  %3553 = vmatprep.mubr.bf16.mxu0 %v6791_v2  ;;  %v8667_v61 = vld [vmem:[%s10899_s1 + $0x700] sm:$0xff]   ;;  %v8669_v2 = vld [vmem:[%s10899_s1 + $0x748] sm:$0xff]  }
  0xcf   :  { %3618 = vmatprep.mubr.bf16.mxu1 %v6793_v6 }
  0xd0   :  { %7907 = vmatpush3.bf16.msra.mxu0 %v8647_v62 }
  0xd1   :  { %7947 = vmatpush3.bf16.msra.mxu1 %v8648_v63  ;;  %7908 = vmatprep.subr.bf16.mxu0 %v8649_v8  ;;  %v8671_v8 = vld [vmem:[%s10899_s1 + $0x708] sm:$0xff]  }
  0xd2   :  { %7948 = vmatprep.subr.bf16.mxu1 %v8650_v9 }
  0xd3   :  { %3554 = vmatmul.mubr.bf16.gmra.mrb[88].mxu0 %v6790_v5  ;;  %v8670_v5 = vld [vmem:[%s10899_s1 + $0x7c8] sm:$0xff]  }
  0xd4   :  { %3619 = vmatmul.mubr.bf16.gmra.mrb[88].mxu1 %v6792_v7  ;;  %7909 = vmatpush3.bf16.msra.mxu0 %v8651_v10  ;;  %v8672_v10 = vld [vmem:[%s10899_s1 + $0x788] sm:$0xff]  }
  0xd5   :  { %7949 = vmatpush3.bf16.msra.mxu1 %v8652_v11  ;;  %7910 = vmatprep.subr.bf16.mxu0 %v8653_v12  ;;  %v1986_v11 = vld [vmem:[%s10900_s0 + $0x120] sm:$0xff] }
  0xd6   :  { %7950 = vmatprep.subr.bf16.mxu1 %v8654_v13  ;;  %3561 = vmatprep.mubr.bf16.mxu0 %v6807_v21  ;;  %v1994_v12 = vld [vmem:[%s10900_s0 + $0x160] sm:$0xff] }
  0xd7   :  { %3626 = vmatprep.mubr.bf16.mxu1 %v6809_v22  ;;  %v6779_v13 = vcombine.high %v1986_v11, %v1994_v12  ;;  %v6778_v16 = vcombine.low %v1986_v11, %v1994_v12  ;;  %v8673_v22 = vld [vmem:[%s10899_s1 + $0x750] sm:$0xff]   ;;  %v2026_v11 = vld [vmem:[%s10900_s0 + $0x260] sm:$0xff]  ;;  %v2019_v12 = vld [vmem:[%s10900_s0 + $0x228] sm:$0xff] }
  0xd8   :  { %7911 = vmatpush3.bf16.msra.mxu0 %v8655_v14  ;;  %v1987_v14 = vld [vmem:[%s10900_s0 + $0x128] sm:$0xff] }
  0xd9   :  { %7951 = vmatpush3.bf16.msra.mxu1 %v8656_v15  ;;  %7912 = vmatprep.subr.bf16.mxu0 %v8657_v25  ;;  %v1995_v15 = vld [vmem:[%s10900_s0 + $0x168] sm:$0xff] }
  0xda   :  { %7952 = vmatprep.subr.bf16.mxu1 %v8658_v27  ;;  %v6780_v21 = vcombine.low %v1987_v14, %v1995_v15  ;;  %v8675_v27 = vld [vmem:[%s10899_s1 + $0x710] sm:$0xff]  }
  0xdb   :  { %3562 = vmatmul.mubr.bf16.gmra.mrb[92].mxu0 %v6806_v23 }
  0xdc   :  { %3627 = vmatmul.mubr.bf16.gmra.mrb[92].mxu1 %v6808_v24  ;;  %7913 = vmatpush3.bf16.msra.mxu0 %v8659_v29  ;;  %v8674_v24 = vld [vmem:[%s10899_s1 + $0x7d0] sm:$0xff]  }
  0xdd   :  { %7953 = vmatpush3.bf16.msra.mxu1 %v8660_v32  ;;  %7914 = vmatprep.subr.bf16.mxu0 %v8661_v35  ;;  %v8677_v32 = vld [vmem:[%s10899_s1 + $0x758] sm:$0xff]  }
  0xde   :  { %7954 = vmatprep.subr.bf16.mxu1 %v8662_v37  ;;  %3667 = vmatprep.mubr.bf16.mxu0 %v6763_v50  ;;  %v8678_v35 = vld [vmem:[%s10899_s1 + $0x7d8] sm:$0xff]  }
  0xdf   :  { %3732 = vmatprep.mubr.bf16.mxu1 %v6765_v55  ;;  %v8682_v55 = vld [vmem:[%s10899_s1 + $0x7e0] sm:$0xff]  }
  0xe0   :  { %7915 = vmatpush3.bf16.msra.mxu0 %v8663_v40 }
  0xe1   :  { %7955 = vmatpush3.bf16.msra.mxu1 %v8664_v43  ;;  %7980 = vmatprep.subr.bf16.mxu0 %v8665_v56  ;;  %v2010_v43 = vld [vmem:[%s10900_s0 + $0x1e0] sm:$0xff] }
  0xe2   :  { %8020 = vmatprep.subr.bf16.mxu1 %v8666_v58 }
  0xe3   :  { %3668 = vmatmul.mubr.bf16.vlgmr.msra.gmra.mrb[96].mxu0 %v6762_v49 }
  0xe4   :  { %3733 = vmatmul.mubr.bf16.vlgmr.msra.gmra.mrb[96].mxu1 %v6764_v54  ;;  %7981 = vmatpush3.bf16.msra.mxu0 %v8667_v61 }
  0xe5   :  { %8021 = vmatpush3.bf16.msra.mxu1 %v8668_v0  ;;  %7982 = vmatprep.subr.bf16.mxu0 %v8669_v2 }
  0xe6   :  { %8022 = vmatprep.subr.bf16.mxu1 %v8670_v5  ;;  %3675 = vmatprep.mubr.bf16.mxu0 %v6779_v13  ;;  %v8687_v5 = vld [vmem:[%s10899_s1 + $0x728] sm:$0xff]  }
  0xe8   :  { %7983 = vmatpush3.bf16.msra.mxu0 %v8671_v8  ;;  %v8688_v8 = vld [vmem:[%s10899_s1 + $0x7a8] sm:$0xff]  }
  0xe9   :  { %8023 = vmatpush3.bf16.msra.mxu1 %v8672_v10  ;;  %7984 = vmatprep.subr.bf16.mxu0 %v8673_v22  ;;  %v2018_v10 = vld [vmem:[%s10900_s0 + $0x220] sm:$0xff]  ;;  %v8689_v22 = vld [vmem:[%s10899_s1 + $0x770] sm:$0xff]  }
  0xea   :  { %8024 = vmatprep.subr.bf16.mxu1 %v8674_v24  ;;  %v8690_v24 = vld [vmem:[%s10899_s1 + $0x7f0] sm:$0xff]  }
  0xeb   :  { %3676 = vmatmul.mubr.bf16.gmra.mrb[100].mxu0 %v6778_v16  ;;  %v6810_v16 = vcombine.low %v2018_v10, %v2026_v11 }
  0xec   :  { %7985 = vmatpush3.bf16.msra.mxu0 %v8675_v27  ;;  %v8691_v27 = vld [vmem:[%s10899_s1 + $0x730] sm:$0xff]  }
  0xed   :  { %7986 = vmatprep.subr.bf16.mxu0 %v8677_v32 }
  0xf6   :  { %v7436_v20 = vpop.f32.mrb[0].mxu0 }
  0xf7   :  { %v7476_v26 = vpop.f32.mrb[0].mxu1  ;;  %v7437_v28 = vpop.f32.mrb[1].mxu0 }
  0xf8   :  { %v7438_v30 = vadd.f32 %v7437_v28, %v7436_v20  ;;  %v7477_v31 = vpop.f32.mrb[1].mxu1  ;;  %v7439_v34 = vpop.f32.mrb[2].mxu0  ;;  %v6781_v20 = vcombine.high %v1987_v14, %v1995_v15  ;;  %v6811_v14 = vcombine.high %v2018_v10, %v2026_v11  ;;  %v2027_v15 = vld [vmem:[%s10900_s0 + $0x268] sm:$0xff] }
  0xf9   :  { %v7478_v33 = vadd.f32 %v7477_v31, %v7476_v26  ;;  %v7479_v36 = vpop.f32.mrb[2].mxu1  ;;  %v7440_v39 = vpop.f32.mrb[3].mxu0 }
  0xfa   :  { %v7441_v41 = vadd.f32 %v7440_v39, %v7439_v34  ;;  %v7480_v42 = vpop.f32.mrb[3].mxu1  ;;  %3740 = vmatprep.mubr.bf16.mxu1 %v6781_v20  ;;  %v8679_v39 = vld [vmem:[%s10899_s1 + $0x718] sm:$0xff]   ;;  %v6813_v20 = vcombine.high %v2019_v12, %v2027_v15 }
  0xfb   :  { %v9832_v38 = vadd.f32 %v7478_v33, %v7438_v30  ;;  %v7481_v44 = vadd.f32 %v7480_v42, %v7479_v36  ;;  %3741 = vmatmul.mubr.bf16.gmra.mrb[100].mxu1 %v6780_v21  ;;  %v8676_v30 = vld [vmem:[%s10899_s1 + $0x790] sm:$0xff]   ;;  %v2002_v42 = vld [vmem:[%s10900_s0 + $0x1a0] sm:$0xff]  ;;  %7987 = vmatpush3.bf16.msra.mxu0 %v8679_v39  ;;  %v6812_v21 = vcombine.low %v2019_v12, %v2027_v15  ;;  %v8704_v12 = vld [vmem:[%s10899_s1 + $0x888] sm:$0xff]  }
  0xfc   :  { %8025 = vmatpush3.bf16.msra.mxu1 %v8676_v30  ;;  %v6794_v50 = vcombine.low %v2002_v42, %v2010_v43  ;;  %v8692_v30 = vld [vmem:[%s10899_s1 + $0x7b0] sm:$0xff]  }
  0xfd   :  { %v9852_v52 = vadd.f32 %v7481_v44, %v7441_v41  ;;  %8026 = vmatprep.subr.bf16.mxu1 %v8678_v35  ;;  %v8680_v41 = vld [vmem:[%s10899_s1 + $0x798] sm:$0xff]   ;;  %v2003_v44 = vld [vmem:[%s10900_s0 + $0x1a8] sm:$0xff]  ;;  %v1996_v15 = vld [vmem:[%s10900_s0 + $0x170] sm:$0xff] }
  0xfe   :  { %v7442_v48 = vpop.f32.mrb[4].mxu0  ;;  %v6797_v49 = vcombine.high %v2003_v44, %v2011_v45  ;;  %v6796_v51 = vcombine.low %v2003_v44, %v2011_v45  ;;  %v1980_v44 = vld [vmem:[%s10900_s0 + $0xf0] sm:$0xff] }
  0xff   :  { %v7482_v53 = vpop.f32.mrb[4].mxu1  ;;  %v7443_v57 = vpop.f32.mrb[5].mxu0 }
 0x100   :  { %v7444_v59 = vadd.f32 %v7443_v57, %v7442_v48  ;;  %v7483_v60 = vpop.f32.mrb[5].mxu1  ;;  %v7445_v63 = vpop.f32.mrb[6].mxu0  ;;  %8027 = vmatpush3.bf16.msra.mxu1 %v8680_v41  ;;  %v6795_v48 = vcombine.high %v2002_v42, %v2010_v43  ;;  %3748 = vmatprep.mubr.bf16.mxu1 %v6797_v49  ;;  %v8683_v57 = vld [vmem:[%s10899_s1 + $0x720] sm:$0xff]   ;;  %v8696_v42 = vld [vmem:[%s10899_s1 + $0x7b8] sm:$0xff]   ;;  %v1972_v43 = vld [vmem:[%s10900_s0 + $0xb0] sm:$0xff] }
 0x101   :  { %v7484_v62 = vadd.f32 %v7483_v60, %v7482_v53  ;;  %v7485_v1 = vpop.f32.mrb[6].mxu1  ;;  %v7446_v4 = vpop.f32.mrb[7].mxu0  ;;  %v8681_v53 = vld [vmem:[%s10899_s1 + $0x760] sm:$0xff]   ;;  %8028 = vmatprep.subr.bf16.mxu1 %v8682_v55  ;;  %v1973_v49 = vld [vmem:[%s10900_s0 + $0xb8] sm:$0xff] }
 0x102   :  { %v7447_v6 = vadd.f32 %v7446_v4, %v7445_v63  ;;  %v7486_v7 = vpop.f32.mrb[7].mxu1  ;;  %3683 = vmatprep.mubr.bf16.mxu0 %v6795_v48  ;;  %v8684_v60 = vld [vmem:[%s10899_s1 + $0x7a0] sm:$0xff]   ;;  %7988 = vmatprep.subr.bf16.mxu0 %v8681_v53  ;;  %v8685_v63 = vld [vmem:[%s10899_s1 + $0x768] sm:$0xff]   ;;  %v6767_v48 = vcombine.high %v1972_v43, %v1980_v44 }
 0x103   :  { %v9869_v3 = vadd.f32 %v7484_v62, %v7444_v59  ;;  %v7487_v9 = vadd.f32 %v7486_v7, %v7485_v1  ;;  %3684 = vmatmul.mubr.bf16.gmra.mrb[104].mxu0 %v6794_v50  ;;  %3749 = vmatmul.mubr.bf16.gmra.mrb[104].mxu1 %v6796_v51  ;;  %v8686_v1 = vld [vmem:[%s10899_s1 + $0x7e8] sm:$0xff]   ;;  %v1981_v50 = vld [vmem:[%s10900_s0 + $0xf8] sm:$0xff] }
 0x104   :  { %7989 = vmatpush3.bf16.msra.mxu0 %v8683_v57  ;;  %8029 = vmatpush3.bf16.msra.mxu1 %v8684_v60  ;;  %v6769_v55 = vcombine.high %v1973_v49, %v1981_v50 }
 0x105   :  { %v9892_v17 = vadd.f32 %v7487_v9, %v7447_v6  ;;  %7990 = vmatprep.subr.bf16.mxu0 %v8685_v63  ;;  %8030 = vmatprep.subr.bf16.mxu1 %v8686_v1 }
 0x106   :  { %v7448_v18 = vpop.f32.mrb[8].mxu0  ;;  %3691 = vmatprep.mubr.bf16.mxu0 %v6811_v14  ;;  %3756 = vmatprep.mubr.bf16.mxu1 %v6813_v20 }
 0x107   :  { %v7488_v19 = vpop.f32.mrb[8].mxu1  ;;  %v7449_v23 = vpop.f32.mrb[9].mxu0 }
 0x108   :  { %v7450_v25 = vadd.f32 %v7449_v23, %v7448_v18  ;;  %v7489_v26 = vpop.f32.mrb[9].mxu1  ;;  %v7451_v29 = vpop.f32.mrb[10].mxu0  ;;  %7991 = vmatpush3.bf16.msra.mxu0 %v8687_v5  ;;  %8031 = vmatpush3.bf16.msra.mxu1 %v8688_v8  ;;  %v8701_v5 = vld [vmem:[%s10899_s1 + $0x848] sm:$0xff]  }
 0x109   :  { %v7490_v28 = vadd.f32 %v7489_v26, %v7488_v19  ;;  %v7491_v31 = vpop.f32.mrb[10].mxu1  ;;  %v7452_v34 = vpop.f32.mrb[11].mxu0  ;;  %7992 = vmatprep.subr.bf16.mxu0 %v8689_v22  ;;  %8032 = vmatprep.subr.bf16.mxu1 %v8690_v24 }
 0x10a   :  { %v7453_v36 = vadd.f32 %v7452_v34, %v7451_v29  ;;  %v7492_v37 = vpop.f32.mrb[11].mxu1  ;;  %v8693_v34 = vld [vmem:[%s10899_s1 + $0x778] sm:$0xff]  }
 0x10b   :  { %v9909_v33 = vadd.f32 %v7490_v28, %v7450_v25  ;;  %v7493_v40 = vadd.f32 %v7492_v37, %v7491_v31  ;;  %3692 = vmatmul.mubr.bf16.gmra.mrb[108].mxu0 %v6810_v16  ;;  %3757 = vmatmul.mubr.bf16.gmra.mrb[108].mxu1 %v6812_v21  ;;  %v1989_v16 = vld [vmem:[%s10900_s0 + $0x138] sm:$0xff] }
 0x10c   :  { %7993 = vmatpush3.bf16.msra.mxu0 %v8691_v27  ;;  %8033 = vmatpush3.bf16.msra.mxu1 %v8692_v30 }
 0x10d   :  { %v9932_v46 = vadd.f32 %v7493_v40, %v7453_v36  ;;  %v8694_v36 = vld [vmem:[%s10899_s1 + $0x7f8] sm:$0xff]   ;;  %7994 = vmatprep.subr.bf16.mxu0 %v8693_v34  ;;  %3797 = vmatprep.mubr.bf16.mxu0 %v6767_v48  ;;  %v2004_v48 = vld [vmem:[%s10900_s0 + $0x1b0] sm:$0xff] }
 0x10e   :  { %v7454_v47 = vpop.f32.mrb[12].mxu0  ;;  %8034 = vmatprep.subr.bf16.mxu1 %v8694_v36  ;;  %3862 = vmatprep.mubr.bf16.mxu1 %v6769_v55  ;;  %v8709_v36 = vld [vmem:[%s10899_s1 + $0x858] sm:$0xff]  }
 0x10f   :  { %v7494_v54 = vpop.f32.mrb[12].mxu1  ;;  %v7455_v56 = vpop.f32.mrb[13].mxu0  ;;  %v2013_v55 = vld [vmem:[%s10900_s0 + $0x1f8] sm:$0xff] }
 0x110   :  { %v7456_v58 = vadd.f32 %v7455_v56, %v7454_v47  ;;  %v7495_v59 = vpop.f32.mrb[13].mxu1  ;;  %v7457_v62 = vpop.f32.mrb[14].mxu0  ;;  %v6766_v47 = vcombine.low %v1972_v43, %v1980_v44  ;;  %8035 = vmatpush3.bf16.msra.mxu1 %v8696_v42  ;;  %v8711_v42 = vld [vmem:[%s10899_s1 + $0x818] sm:$0xff]  }
 0x111   :  { %v7496_v61 = vadd.f32 %v7495_v59, %v7494_v54  ;;  %v7497_v0 = vpop.f32.mrb[14].mxu1  ;;  %v7458_v4 = vpop.f32.mrb[15].mxu0  ;;  %v6768_v54 = vcombine.low %v1973_v49, %v1981_v50  ;;  %v2012_v49 = vld [vmem:[%s10900_s0 + $0x1f0] sm:$0xff]  ;;  %v2005_v50 = vld [vmem:[%s10900_s0 + $0x1b8] sm:$0xff] }
 0x112   :  { %v7459_v6 = vadd.f32 %v7458_v4, %v7457_v62  ;;  %v7498_v7 = vpop.f32.mrb[15].mxu1 }
 0x113   :  { %v9952_v2 = vadd.f32 %v7496_v61, %v7456_v58  ;;  %v7499_v9 = vadd.f32 %v7498_v7, %v7497_v0  ;;  %v8698_v58 = vld [vmem:[%s10899_s1 + $0x8c0] sm:$0xff]   ;;  %3863 = vmatmul.mubr.bf16.vlgmr.msra.gmra.mrb[112].mxu1 %v6768_v54  ;;  %v8702_v7 = vld [vmem:[%s10899_s1 + $0x8c8] sm:$0xff]   ;;  %v6799_v54 = vcombine.high %v2004_v48, %v2012_v49 }
 0x114   :  { %v8699_v61 = vld [vmem:[%s10899_s1 + $0x800] sm:$0xff]   ;;  %8100 = vmatprep.subr.bf16.mxu1 %v8698_v58  ;;  %v6801_v58 = vcombine.high %v2005_v50, %v2013_v55 }
 0x115   :  { %v9972_v18 = vadd.f32 %v7499_v9, %v7459_v6  ;;  %v8700_v0 = vld [vmem:[%s10899_s1 + $0x880] sm:$0xff]  }
 0x116   :  { %v7516_v13 = vpop.f32.mrb[16].mxu0  ;;  %8101 = vmatpush3.bf16.msra.mxu1 %v8700_v0 }
 0x117   :  { %v7556_v19 = vpop.f32.mrb[16].mxu1  ;;  %v7517_v23 = vpop.f32.mrb[17].mxu0  ;;  %8102 = vmatprep.subr.bf16.mxu1 %v8702_v7 }
 0x118   :  { %v7518_v25 = vadd.f32 %v7517_v23, %v7516_v13  ;;  %v7557_v26 = vpop.f32.mrb[17].mxu1  ;;  %v7519_v29 = vpop.f32.mrb[18].mxu0  ;;  %v1988_v13 = vld [vmem:[%s10900_s0 + $0x130] sm:$0xff] }
 0x119   :  { %v7558_v28 = vadd.f32 %v7557_v26, %v7556_v19  ;;  %v7559_v32 = vpop.f32.mrb[18].mxu1  ;;  %v7520_v35 = vpop.f32.mrb[19].mxu0  ;;  %v1997_v19 = vld [vmem:[%s10900_s0 + $0x178] sm:$0xff]  ;;  %v6783_v21 = vcombine.high %v1988_v13, %v1996_v15  ;;  %v6782_v23 = vcombine.low %v1988_v13, %v1996_v15  ;;  %v8706_v26 = vld [vmem:[%s10899_s1 + $0x8d0] sm:$0xff]  }
 0x11a   :  { %v1602_v31 = vadd.f32 %v7518_v25, %v9832_v38  ;;  %v7521_v39 = vadd.f32 %v7520_v35, %v7519_v29  ;;  %v7560_v40 = vpop.f32.mrb[19].mxu1  ;;  %v8695_v38 = vld [vmem:[%s10899_s1 + $0x738] sm:$0xff]   ;;  %8103 = vmatpush3.bf16.msra.mxu1 %v8704_v12  ;;  %v6785_v22 = vcombine.high %v1989_v16, %v1997_v19  ;;  %v6784_v24 = vcombine.low %v1989_v16, %v1997_v19  ;;  %v8707_v29 = vld [vmem:[%s10899_s1 + $0x810] sm:$0xff]   ;;  %v8720_v16 = vld [vmem:[%s10899_s1 + $0x8a8] sm:$0xff]  }
 0x11b   :  { %v7561_v41 = vadd.f32 %v7560_v40, %v7559_v32  ;;  %7995 = vmatpush3.bf16.msra.mxu0 %v8695_v38  ;;  %v8708_v32 = vld [vmem:[%s10899_s1 + $0x890] sm:$0xff]   ;;  %8104 = vmatprep.subr.bf16.mxu1 %v8706_v26  ;;  %v8710_v38 = vld [vmem:[%s10899_s1 + $0x8d8] sm:$0xff]  }
 0x11c   :  { %v9993_v37 = vadd.f32 %v7558_v28, %v1602_v31  ;;  %v1605_v45 = vadd.f32 %v7521_v39, %v9852_v52  ;;  %v8697_v52 = vld [vmem:[%s10899_s1 + $0x840] sm:$0xff]   ;;  %3870 = vmatprep.mubr.bf16.mxu1 %v6785_v22  ;;  %v2020_v19 = vld [vmem:[%s10900_s0 + $0x230] sm:$0xff] }
 0x11d   :  { %8060 = vmatprep.subr.bf16.mxu0 %v8697_v52  ;;  %3871 = vmatmul.mubr.bf16.gmra.mrb[116].mxu1 %v6784_v24  ;;  %v6798_v52 = vcombine.low %v2004_v48, %v2012_v49  ;;  %v2029_v24 = vld [vmem:[%s10900_s0 + $0x278] sm:$0xff] }
 0x11e   :  { %v7522_v51 = vpop.f32.mrb[20].mxu0  ;;  %v10017_v56 = vadd.f32 %v7561_v41, %v1605_v45  ;;  %3798 = vmatmul.mubr.bf16.vlgmr.msra.gmra.mrb[112].mxu0 %v6766_v47  ;;  %8105 = vmatpush3.bf16.msra.mxu1 %v8708_v32  ;;  %v8722_v32 = vld [vmem:[%s10899_s1 + $0x8f0] sm:$0xff]  }
 0x11f   :  { %v7562_v53 = vpop.f32.mrb[20].mxu1  ;;  %v7523_v57 = vpop.f32.mrb[21].mxu0  ;;  %8061 = vmatpush3.bf16.msra.mxu0 %v8699_v61  ;;  %3805 = vmatprep.mubr.bf16.mxu0 %v6783_v21 }
 0x120   :  { %v7524_v59 = vadd.f32 %v7523_v57, %v7522_v51  ;;  %v7563_v60 = vpop.f32.mrb[21].mxu1  ;;  %v7525_v63 = vpop.f32.mrb[22].mxu0  ;;  %8062 = vmatprep.subr.bf16.mxu0 %v8701_v5  ;;  %8106 = vmatprep.subr.bf16.mxu1 %v8710_v38  ;;  %v8724_v38 = vld [vmem:[%s10899_s1 + $0x8b0] sm:$0xff]  }
 0x121   :  { %v7564_v62 = vadd.f32 %v7563_v60, %v7562_v53  ;;  %v7565_v4 = vpop.f32.mrb[22].mxu1  ;;  %v7526_v6 = vpop.f32.mrb[23].mxu0  ;;  %v8713_v60 = vld [vmem:[%s10899_s1 + $0x860] sm:$0xff]   ;;  %3878 = vmatprep.mubr.bf16.mxu1 %v6801_v58 }
 0x122   :  { %v1610_v1 = vadd.f32 %v7524_v59, %v9869_v3  ;;  %v7527_v9 = vadd.f32 %v7526_v6, %v7525_v63  ;;  %v7566_v10 = vpop.f32.mrb[23].mxu1  ;;  %v8703_v3 = vld [vmem:[%s10899_s1 + $0x808] sm:$0xff]   ;;  %v6800_v59 = vcombine.low %v2005_v50, %v2013_v55  ;;  %v8716_v6 = vld [vmem:[%s10899_s1 + $0x8a0] sm:$0xff]  }
 0x123   :  { %v7567_v11 = vadd.f32 %v7566_v10, %v7565_v4  ;;  %8063 = vmatpush3.bf16.msra.mxu0 %v8703_v3  ;;  %v8717_v10 = vld [vmem:[%s10899_s1 + $0x868] sm:$0xff]   ;;  %v3927_v55 = vld [vmem:[%s10900_s0 + $0x140] sm:$0xff] }
 0x124   :  { %v10035_v8 = vadd.f32 %v7564_v62, %v1610_v1  ;;  %v1613_v14 = vadd.f32 %v7527_v9, %v9892_v17  ;;  %v8705_v17 = vld [vmem:[%s10899_s1 + $0x850] sm:$0xff]   ;;  %v8715_v1 = vld [vmem:[%s10899_s1 + $0x820] sm:$0xff]  }
 0x125   :  { %8064 = vmatprep.subr.bf16.mxu0 %v8705_v17  ;;  %3879 = vmatmul.mubr.bf16.gmra.mrb[120].mxu1 %v6800_v59 }
 0x126   :  { %v7528_v20 = vpop.f32.mrb[24].mxu0  ;;  %v10062_v27 = vadd.f32 %v7567_v11, %v1613_v14  ;;  %3806 = vmatmul.mubr.bf16.gmra.mrb[116].mxu0 %v6782_v23  ;;  %v8718_v11 = vld [vmem:[%s10899_s1 + $0x8e8] sm:$0xff]   ;;  %v2021_v23 = vld [vmem:[%s10900_s0 + $0x238] sm:$0xff] }
 0x127   :  { %v7568_v25 = vpop.f32.mrb[24].mxu1  ;;  %v7529_v28 = vpop.f32.mrb[25].mxu0  ;;  %8065 = vmatpush3.bf16.msra.mxu0 %v8707_v29  ;;  %3813 = vmatprep.mubr.bf16.mxu0 %v6799_v54  ;;  %v6816_v29 = vcombine.low %v2021_v23, %v2029_v24 }
 0x128   :  { %v7530_v30 = vadd.f32 %v7529_v28, %v7528_v20  ;;  %v7569_v31 = vpop.f32.mrb[25].mxu1  ;;  %v7531_v35 = vpop.f32.mrb[26].mxu0  ;;  %8066 = vmatprep.subr.bf16.mxu0 %v8709_v36  ;;  %v2028_v20 = vld [vmem:[%s10900_s0 + $0x270] sm:$0xff]  ;;  %v6817_v28 = vcombine.high %v2021_v23, %v2029_v24  ;;  %v3935_v23 = vld [vmem:[%s10900_s0 + $0x180] sm:$0xff] }
 0x129   :  { %v7570_v34 = vadd.f32 %v7569_v31, %v7568_v25  ;;  %v7571_v40 = vpop.f32.mrb[26].mxu1  ;;  %v7532_v41 = vpop.f32.mrb[27].mxu0  ;;  %v6815_v22 = vcombine.high %v2020_v19, %v2028_v20  ;;  %v6814_v17 = vcombine.low %v2020_v19, %v2028_v20  ;;  %v8723_v36 = vld [vmem:[%s10899_s1 + $0x830] sm:$0xff]   ;;  %v3943_v24 = vld [vmem:[%s10900_s0 + $0x1c0] sm:$0xff] }
 0x12a   :  { %v1618_v39 = vadd.f32 %v7530_v30, %v9909_v33  ;;  %v7533_v44 = vadd.f32 %v7532_v41, %v7531_v35  ;;  %v7572_v45 = vpop.f32.mrb[27].mxu1  ;;  %v8712_v33 = vld [vmem:[%s10899_s1 + $0x898] sm:$0xff]   ;;  %3886 = vmatprep.mubr.bf16.mxu1 %v6817_v28  ;;  %v7219_v28 = vcombine.high %v3935_v23, %v3943_v24 }
 0x12b   :  { %v7573_v47 = vadd.f32 %v7572_v45, %v7571_v40  ;;  %8067 = vmatpush3.bf16.msra.mxu0 %v8711_v42  ;;  %8107 = vmatpush3.bf16.msra.mxu1 %v8712_v33  ;;  %v8726_v33 = vld [vmem:[%s10899_s1 + $0x8f8] sm:$0xff]  }
 0x12c   :  { %v10080_v43 = vadd.f32 %v7570_v34, %v1618_v39  ;;  %v1621_v51 = vadd.f32 %v7533_v44, %v9932_v46  ;;  %v8714_v46 = vld [vmem:[%s10899_s1 + $0x8e0] sm:$0xff]   ;;  %8068 = vmatprep.subr.bf16.mxu0 %v8713_v60  ;;  %v8725_v44 = vld [vmem:[%s10899_s1 + $0x878] sm:$0xff]  }
 0x12d   :  { %8108 = vmatprep.subr.bf16.mxu1 %v8714_v46  ;;  %3887 = vmatmul.mubr.bf16.gmra.mrb[124].mxu1 %v6816_v29  ;;  %v3944_v29 = vld [vmem:[%s10900_s0 + $0x1c8] sm:$0xff] }
 0x12e   :  { %v7534_v53 = vpop.f32.mrb[28].mxu0  ;;  %v10101_v61 = vadd.f32 %v7573_v47, %v1621_v51  ;;  %3814 = vmatmul.mubr.bf16.gmra.mrb[120].mxu0 %v6798_v52  ;;  %v8728_v51 = vld [vmem:[%s10899_s1 + $0x8b8] sm:$0xff]   ;;  %v3920_v52 = vld [vmem:[%s10900_s0 + $0x108] sm:$0xff] }
 0x12f   :  { %v7574_v57 = vpop.f32.mrb[28].mxu1  ;;  %v7535_v62 = vpop.f32.mrb[29].mxu0  ;;  %8069 = vmatpush3.bf16.msra.mxu0 %v8715_v1  ;;  %8109 = vmatpush3.bf16.msra.mxu1 %v8716_v6 }
 0x130   :  { %v7536_v63 = vadd.f32 %v7535_v62, %v7534_v53  ;;  %v7575_v0 = vpop.f32.mrb[29].mxu1  ;;  %v7537_v5 = vpop.f32.mrb[30].mxu0  ;;  %8070 = vmatprep.subr.bf16.mxu0 %v8717_v10  ;;  %8110 = vmatprep.subr.bf16.mxu1 %v8718_v11  ;;  %v3919_v53 = vld [vmem:[%s10900_s0 + $0x100] sm:$0xff]  ;;  %v8733_v11 = vld [vmem:[%s10899_s1 + $0x948] sm:$0xff]  }
 0x131   :  { %v7576_v4 = vadd.f32 %v7575_v0, %v7574_v57  ;;  %v7577_v9 = vpop.f32.mrb[30].mxu1  ;;  %v7538_v3 = vpop.f32.mrb[31].mxu0  ;;  %3821 = vmatprep.mubr.bf16.mxu0 %v6815_v22  ;;  %v3928_v57 = vld [vmem:[%s10900_s0 + $0x148] sm:$0xff]  ;;  %v7202_v59 = vcombine.low %v3919_v53, %v3927_v55  ;;  %v7203_v60 = vcombine.high %v3919_v53, %v3927_v55  ;;  %v8730_v0 = vld [vmem:[%s10899_s1 + $0x9c0] sm:$0xff]  }
 0x132   :  { %v1626_v7 = vadd.f32 %v7536_v63, %v9952_v2  ;;  %v7539_v13 = vadd.f32 %v7538_v3, %v7537_v5  ;;  %v7578_v14 = vpop.f32.mrb[31].mxu1  ;;  %v8719_v2 = vld [vmem:[%s10899_s1 + $0x828] sm:$0xff]   ;;  %v7204_v62 = vcombine.low %v3920_v52, %v3928_v57  ;;  %v7205_v46 = vcombine.high %v3920_v52, %v3928_v57  ;;  %v8731_v5 = vld [vmem:[%s10899_s1 + $0x900] sm:$0xff]   ;;  %v8744_v52 = vld [vmem:[%s10899_s1 + $0x998] sm:$0xff]  }
 0x133   :  { %v7579_v15 = vadd.f32 %v7578_v14, %v7577_v9  ;;  %8071 = vmatpush3.bf16.msra.mxu0 %v8719_v2  ;;  %8111 = vmatpush3.bf16.msra.mxu1 %v8720_v16  ;;  %v8732_v9 = vld [vmem:[%s10899_s1 + $0x980] sm:$0xff]   ;;  %v8734_v2 = vld [vmem:[%s10899_s1 + $0x9c8] sm:$0xff]  }
 0x134   :  { %v10119_v12 = vadd.f32 %v7576_v4, %v1626_v7  ;;  %v1629_v21 = vadd.f32 %v7539_v13, %v9972_v18  ;;  %v8721_v18 = vld [vmem:[%s10899_s1 + $0x870] sm:$0xff]   ;;  %8112 = vmatprep.subr.bf16.mxu1 %v8722_v32  ;;  %5425 = vmatprep.mubr.bf16.mxu1 %v7205_v46  ;;  %v8735_v16 = vld [vmem:[%s10899_s1 + $0x908] sm:$0xff]   ;;  %v3951_v57 = vld [vmem:[%s10900_s0 + $0x200] sm:$0xff] }
 0x135   :  { %8072 = vmatprep.subr.bf16.mxu0 %v8721_v18  ;;  %v7218_v18 = vcombine.low %v3935_v23, %v3943_v24  ;;  %v3960_v46 = vld [vmem:[%s10900_s0 + $0x248] sm:$0xff] }
 0x136   :  { %v7596_v25 = vpop.f32.mrb[32].mxu0  ;;  %v10143_v30 = vadd.f32 %v7579_v15, %v1629_v21  ;;  %3822 = vmatmul.mubr.bf16.gmra.mrb[124].mxu0 %v6814_v17  ;;  %v3936_v17 = vld [vmem:[%s10900_s0 + $0x188] sm:$0xff] }
 0x137   :  { %v7636_v26 = vpop.f32.mrb[32].mxu1  ;;  %v7597_v31 = vpop.f32.mrb[33].mxu0  ;;  %8073 = vmatpush3.bf16.msra.mxu0 %v8723_v36  ;;  %8113 = vmatpush3.bf16.msra.mxu1 %v8724_v38  ;;  %v7221_v32 = vcombine.high %v3936_v17, %v3944_v29 }
 0x138   :  { %v7598_v34 = vadd.f32 %v7597_v31, %v7596_v25  ;;  %v7637_v35 = vpop.f32.mrb[33].mxu1  ;;  %v7599_v40 = vpop.f32.mrb[34].mxu0  ;;  %8074 = vmatprep.subr.bf16.mxu0 %v8725_v44  ;;  %8114 = vmatprep.subr.bf16.mxu1 %v8726_v33 }
 0x139   :  { %v7638_v39 = vadd.f32 %v7637_v35, %v7636_v26  ;;  %v7639_v42 = vpop.f32.mrb[34].mxu1  ;;  %v7600_v45 = vpop.f32.mrb[35].mxu0  ;;  %5360 = vmatprep.mubr.bf16.mxu0 %v7203_v60  ;;  %v8737_v35 = vld [vmem:[%s10899_s1 + $0x950] sm:$0xff]  }
 0x13a   :  { %v1732_v41 = vadd.f32 %v7598_v34, %v9993_v37  ;;  %v7601_v48 = vadd.f32 %v7600_v45, %v7599_v40  ;;  %v7640_v49 = vpop.f32.mrb[35].mxu1  ;;  %v8727_v37 = vld [vmem:[%s10899_s1 + $0x838] sm:$0xff]   ;;  %v7220_v34 = vcombine.low %v3936_v17, %v3944_v29  ;;  %v8740_v45 = vld [vmem:[%s10899_s1 + $0x990] sm:$0xff]   ;;  %v3975_v29 = vld [vmem:[%s10900_s0 + $0x2c0] sm:$0xff] }
 0x13b   :  { %v7641_v50 = vadd.f32 %v7640_v49, %v7639_v42  ;;  %8075 = vmatpush3.bf16.msra.mxu0 %v8727_v37  ;;  %8115 = vmatpush3.bf16.msra.mxu1 %v8728_v51  ;;  %v8741_v49 = vld [vmem:[%s10899_s1 + $0x958] sm:$0xff]  }
 0x13c   :  { %v10161_v47 = vadd.f32 %v7638_v39, %v1732_v41  ;;  %v1735_v54 = vadd.f32 %v7601_v48, %v10017_v56  ;;  %v8729_v56 = vld [vmem:[%s10899_s1 + $0x940] sm:$0xff]   ;;  %8180 = vmatprep.subr.bf16.mxu1 %v8730_v0  ;;  %v8739_v41 = vld [vmem:[%s10899_s1 + $0x910] sm:$0xff]  }
 0x13d   :  { %8140 = vmatprep.subr.bf16.mxu0 %v8729_v56 }
 0x13e   :  { %v7602_v58 = vpop.f32.mrb[36].mxu0  ;;  %v10188_v1 = vadd.f32 %v7641_v50, %v1735_v54  ;;  %5361 = vmatmul.mubr.bf16.vlgmr.msra.gmra.mrb[128].mxu0 %v7202_v59  ;;  %5426 = vmatmul.mubr.bf16.vlgmr.msra.gmra.mrb[128].mxu1 %v7204_v62  ;;  %v8742_v50 = vld [vmem:[%s10899_s1 + $0x9d8] sm:$0xff]   ;;  %v3952_v62 = vld [vmem:[%s10900_s0 + $0x208] sm:$0xff] }
 0x13f   :  { %v7642_v63 = vpop.f32.mrb[36].mxu1  ;;  %v7603_v4 = vpop.f32.mrb[37].mxu0  ;;  %8141 = vmatpush3.bf16.msra.mxu0 %v8731_v5  ;;  %8181 = vmatpush3.bf16.msra.mxu1 %v8732_v9  ;;  %v7236_v5 = vcombine.low %v3952_v62, %v3960_v46  ;;  %v8746_v9 = vld [vmem:[%s10899_s1 + $0x9e0] sm:$0xff]  }
 0x140   :  { %v7604_v6 = vadd.f32 %v7603_v4, %v7602_v58  ;;  %v7643_v7 = vpop.f32.mrb[37].mxu1  ;;  %v7605_v3 = vpop.f32.mrb[38].mxu0  ;;  %8142 = vmatprep.subr.bf16.mxu0 %v8733_v11  ;;  %8182 = vmatprep.subr.bf16.mxu1 %v8734_v2  ;;  %v3959_v58 = vld [vmem:[%s10900_s0 + $0x240] sm:$0xff]  ;;  %v7237_v4 = vcombine.high %v3952_v62, %v3960_v46  ;;  %v3921_v62 = vld [vmem:[%s10900_s0 + $0x110] sm:$0xff] }
 0x141   :  { %v7644_v10 = vadd.f32 %v7643_v7, %v7642_v63  ;;  %v7645_v14 = vpop.f32.mrb[38].mxu1  ;;  %v7606_v15 = vpop.f32.mrb[39].mxu0  ;;  %5368 = vmatprep.mubr.bf16.mxu0 %v7219_v28  ;;  %5433 = vmatprep.mubr.bf16.mxu1 %v7221_v32  ;;  %v7235_v60 = vcombine.high %v3951_v57, %v3959_v58  ;;  %v7234_v56 = vcombine.low %v3951_v57, %v3959_v58  ;;  %v8747_v11 = vld [vmem:[%s10899_s1 + $0x920] sm:$0xff]   ;;  %v3929_v46 = vld [vmem:[%s10900_s0 + $0x150] sm:$0xff] }
 0x142   :  { %v1740_v13 = vadd.f32 %v7604_v6, %v10035_v8  ;;  %v7607_v20 = vadd.f32 %v7606_v15, %v7605_v3  ;;  %v7646_v21 = vpop.f32.mrb[39].mxu1  ;;  %v8736_v8 = vld [vmem:[%s10899_s1 + $0x988] sm:$0xff]   ;;  %v8748_v2 = vld [vmem:[%s10899_s1 + $0x9a0] sm:$0xff]  }
 0x143   :  { %v7647_v22 = vadd.f32 %v7646_v21, %v7645_v14  ;;  %8143 = vmatpush3.bf16.msra.mxu0 %v8735_v16  ;;  %8183 = vmatpush3.bf16.msra.mxu1 %v8736_v8  ;;  %v8750_v8 = vld [vmem:[%s10899_s1 + $0x9e8] sm:$0xff]  }
 0x144   :  { %v10206_v19 = vadd.f32 %v7644_v10, %v1740_v13  ;;  %v1743_v25 = vadd.f32 %v7607_v20, %v10062_v27  ;;  %v8738_v27 = vld [vmem:[%s10899_s1 + $0x9d0] sm:$0xff]   ;;  %8144 = vmatprep.subr.bf16.mxu0 %v8737_v35  ;;  %v8749_v20 = vld [vmem:[%s10899_s1 + $0x968] sm:$0xff]  }
 0x145   :  { %8184 = vmatprep.subr.bf16.mxu1 %v8738_v27  ;;  %v8753_v27 = vld [vmem:[%s10899_s1 + $0x970] sm:$0xff]  }
 0x146   :  { %v7608_v26 = vpop.f32.mrb[40].mxu0  ;;  %v10227_v36 = vadd.f32 %v7647_v22, %v1743_v25  ;;  %5369 = vmatmul.mubr.bf16.gmra.mrb[132].mxu0 %v7218_v18  ;;  %5434 = vmatmul.mubr.bf16.gmra.mrb[132].mxu1 %v7220_v34  ;;  %v8752_v25 = vld [vmem:[%s10899_s1 + $0x9a8] sm:$0xff]  }
 0x147   :  { %v7648_v31 = vpop.f32.mrb[40].mxu1  ;;  %v7609_v39 = vpop.f32.mrb[41].mxu0  ;;  %8145 = vmatpush3.bf16.msra.mxu0 %v8739_v41  ;;  %8185 = vmatpush3.bf16.msra.mxu1 %v8740_v45  ;;  %v3968_v18 = vld [vmem:[%s10900_s0 + $0x288] sm:$0xff] }
 0x148   :  { %v7610_v40 = vadd.f32 %v7609_v39, %v7608_v26  ;;  %v7649_v38 = vpop.f32.mrb[41].mxu1  ;;  %v7611_v44 = vpop.f32.mrb[42].mxu0  ;;  %8146 = vmatprep.subr.bf16.mxu0 %v8741_v49  ;;  %8186 = vmatprep.subr.bf16.mxu1 %v8742_v50  ;;  %v3967_v26 = vld [vmem:[%s10900_s0 + $0x280] sm:$0xff]  ;;  %v8757_v50 = vld [vmem:[%s10899_s1 + $0x978] sm:$0xff]  }
 0x149   :  { %v7650_v42 = vadd.f32 %v7649_v38, %v7648_v31  ;;  %v7651_v48 = vpop.f32.mrb[42].mxu1  ;;  %v7612_v37 = vpop.f32.mrb[43].mxu0  ;;  %5376 = vmatprep.mubr.bf16.mxu0 %v7235_v60  ;;  %5441 = vmatprep.mubr.bf16.mxu1 %v7237_v4  ;;  %v3976_v31 = vld [vmem:[%s10900_s0 + $0x2c8] sm:$0xff]  ;;  %v7251_v34 = vcombine.high %v3967_v26, %v3975_v29  ;;  %v7250_v39 = vcombine.low %v3967_v26, %v3975_v29  ;;  %v8754_v38 = vld [vmem:[%s10899_s1 + $0x9f0] sm:$0xff]  }
 0x14a   :  { %v1748_v33 = vadd.f32 %v7610_v40, %v10080_v43  ;;  %v7613_v53 = vadd.f32 %v7612_v37, %v7611_v44  ;;  %v7652_v54 = vpop.f32.mrb[43].mxu1  ;;  %v8743_v43 = vld [vmem:[%s10899_s1 + $0x918] sm:$0xff]   ;;  %v7253_v35 = vcombine.high %v3968_v18, %v3976_v31  ;;  %v8755_v44 = vld [vmem:[%s10899_s1 + $0x930] sm:$0xff]   ;;  %v7206_v4 = vcombine.low %v3921_v62, %v3929_v46 }
 0x14b   :  { %v7653_v55 = vadd.f32 %v7652_v54, %v7651_v48  ;;  %8147 = vmatpush3.bf16.msra.mxu0 %v8743_v43  ;;  %8187 = vmatpush3.bf16.msra.mxu1 %v8744_v52  ;;  %v8756_v48 = vld [vmem:[%s10899_s1 + $0x9b0] sm:$0xff]   ;;  %v8758_v43 = vld [vmem:[%s10899_s1 + $0x9f8] sm:$0xff]  }
 0x14c   :  { %v10245_v51 = vadd.f32 %v7650_v42, %v1748_v33  ;;  %v1751_v59 = vadd.f32 %v7613_v53, %v10101_v61  ;;  %v8745_v61 = vld [vmem:[%s10899_s1 + $0x960] sm:$0xff]   ;;  %8188 = vmatprep.subr.bf16.mxu1 %v8746_v9  ;;  %v8759_v52 = vld [vmem:[%s10899_s1 + $0x938] sm:$0xff]  }
 0x14d   :  { %8148 = vmatprep.subr.bf16.mxu0 %v8745_v61  ;;  %v3930_v61 = vld [vmem:[%s10900_s0 + $0x158] sm:$0xff] }
 0x14e   :  { %v7614_v63 = vpop.f32.mrb[44].mxu0  ;;  %v10269_v6 = vadd.f32 %v7653_v55, %v1751_v59  ;;  %5377 = vmatmul.mubr.bf16.gmra.mrb[136].mxu0 %v7234_v56  ;;  %5442 = vmatmul.mubr.bf16.gmra.mrb[136].mxu1 %v7236_v5  ;;  %v3922_v56 = vld [vmem:[%s10900_s0 + $0x118] sm:$0xff]  ;;  %v7207_v5 = vcombine.high %v3921_v62, %v3929_v46 }
 0x14f   :  { %v7654_v0 = vpop.f32.mrb[44].mxu1  ;;  %v7615_v7 = vpop.f32.mrb[45].mxu0  ;;  %8149 = vmatpush3.bf16.msra.mxu0 %v8747_v11  ;;  %8189 = vmatpush3.bf16.msra.mxu1 %v8748_v2  ;;  %v7208_v9 = vcombine.low %v3922_v56, %v3930_v61 }
 0x150   :  { %v7616_v10 = vadd.f32 %v7615_v7, %v7614_v63  ;;  %v7655_v3 = vpop.f32.mrb[45].mxu1  ;;  %v7617_v14 = vpop.f32.mrb[46].mxu0  ;;  %8150 = vmatprep.subr.bf16.mxu0 %v8749_v20  ;;  %8190 = vmatprep.subr.bf16.mxu1 %v8750_v8 }
 0x151   :  { %v7656_v13 = vadd.f32 %v7655_v3, %v7654_v0  ;;  %v7657_v16 = vpop.f32.mrb[46].mxu1  ;;  %v7618_v21 = vpop.f32.mrb[47].mxu0  ;;  %5384 = vmatprep.mubr.bf16.mxu0 %v7251_v34  ;;  %5449 = vmatprep.mubr.bf16.mxu1 %v7253_v35  ;;  %v8761_v3 = vld [vmem:[%s10899_s1 + $0xa40] sm:$0xff]  }
 0x152   :  { %v1756_v15 = vadd.f32 %v7616_v10, %v10119_v12  ;;  %v7619_v23 = vadd.f32 %v7618_v21, %v7617_v14  ;;  %v7658_v24 = vpop.f32.mrb[47].mxu1  ;;  %v8751_v12 = vld [vmem:[%s10899_s1 + $0x928] sm:$0xff]   ;;  %v7209_v10 = vcombine.high %v3922_v56, %v3930_v61  ;;  %v8764_v21 = vld [vmem:[%s10899_s1 + $0xa80] sm:$0xff]   ;;  %v8776_v56 = vld [vmem:[%s10899_s1 + $0xa98] sm:$0xff]  }
 0x153   :  { %v7659_v17 = vadd.f32 %v7658_v24, %v7657_v16  ;;  %8151 = vmatpush3.bf16.msra.mxu0 %v8751_v12  ;;  %8191 = vmatpush3.bf16.msra.mxu1 %v8752_v25  ;;  %v8765_v24 = vld [vmem:[%s10899_s1 + $0xa48] sm:$0xff]   ;;  %v3962_v61 = vld [vmem:[%s10900_s0 + $0x258] sm:$0xff] }
 0x154   :  { %v10287_v22 = vadd.f32 %v7656_v13, %v1756_v15  ;;  %v1759_v28 = vadd.f32 %v7619_v23, %v10143_v30  ;;  %v7252_v30 = vcombine.low %v3968_v18, %v3976_v31  ;;  %8152 = vmatprep.subr.bf16.mxu0 %v8753_v27  ;;  %8192 = vmatprep.subr.bf16.mxu1 %v8754_v38  ;;  %v8763_v15 = vld [vmem:[%s10899_s1 + $0xa00] sm:$0xff]   ;;  %v8768_v18 = vld [vmem:[%s10899_s1 + $0xa88] sm:$0xff]   ;;  %v3937_v31 = vld [vmem:[%s10900_s0 + $0x190] sm:$0xff] }
 0x156   :  { %v7676_v32 = vpop.f32.mrb[48].mxu0  ;;  %v10314_v41 = vadd.f32 %v7659_v17, %v1759_v28  ;;  %5385 = vmatmul.mubr.bf16.gmra.mrb[140].mxu0 %v7250_v39  ;;  %5450 = vmatmul.mubr.bf16.gmra.mrb[140].mxu1 %v7252_v30  ;;  %v8766_v17 = vld [vmem:[%s10899_s1 + $0xac8] sm:$0xff]   ;;  %v3938_v39 = vld [vmem:[%s10900_s0 + $0x198] sm:$0xff] }
 0x157   :  { %v7716_v40 = vpop.f32.mrb[48].mxu1  ;;  %v7677_v42 = vpop.f32.mrb[49].mxu0  ;;  %8153 = vmatpush3.bf16.msra.mxu0 %v8755_v44  ;;  %8193 = vmatpush3.bf16.msra.mxu1 %v8756_v48  ;;  %v3946_v30 = vld [vmem:[%s10900_s0 + $0x1d8] sm:$0xff]  ;;  %v8770_v48 = vld [vmem:[%s10899_s1 + $0xad0] sm:$0xff]  }
 0x158   :  { %v7678_v45 = vadd.f32 %v7677_v42, %v7676_v32  ;;  %v7717_v33 = vpop.f32.mrb[49].mxu1  ;;  %v7679_v37 = vpop.f32.mrb[50].mxu0  ;;  %8154 = vmatprep.subr.bf16.mxu0 %v8757_v50  ;;  %8194 = vmatprep.subr.bf16.mxu1 %v8758_v43  ;;  %v3945_v32 = vld [vmem:[%s10900_s0 + $0x1d0] sm:$0xff]  ;;  %v7225_v42 = vcombine.high %v3938_v39, %v3946_v30  ;;  %v7224_v44 = vcombine.low %v3938_v39, %v3946_v30 }
 0x159   :  { %v7718_v49 = vadd.f32 %v7717_v33, %v7716_v40  ;;  %v7719_v54 = vpop.f32.mrb[50].mxu1  ;;  %v7680_v55 = vpop.f32.mrb[51].mxu0  ;;  %5490 = vmatprep.mubr.bf16.mxu0 %v7207_v5  ;;  %5555 = vmatprep.mubr.bf16.mxu1 %v7209_v10  ;;  %v7223_v35 = vcombine.high %v3937_v31, %v3945_v32  ;;  %v7222_v27 = vcombine.low %v3937_v31, %v3945_v32  ;;  %v8771_v50 = vld [vmem:[%s10899_s1 + $0xa10] sm:$0xff]   ;;  %v3954_v5 = vld [vmem:[%s10900_s0 + $0x218] sm:$0xff] }
 0x15a   :  { %v1862_v53 = vadd.f32 %v7678_v45, %v10161_v47  ;;  %v7681_v58 = vadd.f32 %v7680_v55, %v7679_v37  ;;  %v7720_v59 = vpop.f32.mrb[51].mxu1  ;;  %v8760_v47 = vld [vmem:[%s10899_s1 + $0x9b8] sm:$0xff]   ;;  %v8772_v43 = vld [vmem:[%s10899_s1 + $0xa90] sm:$0xff]   ;;  %v7241_v10 = vcombine.high %v3954_v5, %v3962_v61 }
 0x15b   :  { %v7721_v60 = vadd.f32 %v7720_v59, %v7719_v54  ;;  %8155 = vmatpush3.bf16.msra.mxu0 %v8759_v52  ;;  %8195 = vmatpush3.bf16.msra.mxu1 %v8760_v47  ;;  %v8774_v59 = vld [vmem:[%s10899_s1 + $0xad8] sm:$0xff]   ;;  %v3969_v32 = vld [vmem:[%s10900_s0 + $0x290] sm:$0xff] }
 0x15c   :  { %v1927_v57 = vadd.f32 %v7718_v49, %v1862_v53  ;;  %v1865_v63 = vadd.f32 %v7681_v58, %v10188_v1  ;;  %v8762_v1 = vld [vmem:[%s10899_s1 + $0xac0] sm:$0xff]   ;;  %8220 = vmatprep.subr.bf16.mxu0 %v8761_v3 }
 0x15d   :  { %8260 = vmatprep.subr.bf16.mxu1 %v8762_v1  ;;  %v8778_v1 = vld [vmem:[%s10899_s1 + $0xae0] sm:$0xff]  }
 0x15e   :  { %1958 = vst.msk [vmem:[#allocation2] sm:$0xff] %vm1957_vm0, %v1927_v57  ;;  %v7682_v0 = vpop.f32.mrb[52].mxu0  ;;  %v1930_v11 = vadd.f32 %v7721_v60, %v1865_v63  ;;  %5491 = vmatmul.mubr.bf16.vlgmr.msra.gmra.mrb[144].mxu0 %v7206_v4  ;;  %5556 = vmatmul.mubr.bf16.vlgmr.msra.gmra.mrb[144].mxu1 %v7208_v9  ;;  %v8773_v57 = vld [vmem:[%s10899_s1 + $0xa58] sm:$0xff]   ;;  %v3953_v63 = vld [vmem:[%s10900_s0 + $0x210] sm:$0xff] }
 0x15f   :  { %v7722_v7 = vpop.f32.mrb[52].mxu1  ;;  %v7683_v13 = vpop.f32.mrb[53].mxu0  ;;  %8221 = vmatpush3.bf16.msra.mxu0 %v8763_v15  ;;  %8261 = vmatpush3.bf16.msra.mxu1 %v8764_v21  ;;  %v3961_v4 = vld [vmem:[%s10900_s0 + $0x250] sm:$0xff]  ;;  %v8779_v15 = vld [vmem:[%s10899_s1 + $0xa20] sm:$0xff]  }
 0x160   :  { %v7684_v14 = vadd.f32 %v7683_v13, %v7682_v0  ;;  %v7723_v2 = vpop.f32.mrb[53].mxu1  ;;  %1959 = vst.msk [vmem:[#allocation2 + $0x8] sm:$0xff] %vm1957_vm0, %v1930_v11  ;;  %v7685_v20 = vpop.f32.mrb[54].mxu0  ;;  %8222 = vmatprep.subr.bf16.mxu0 %v8765_v24  ;;  %8262 = vmatprep.subr.bf16.mxu1 %v8766_v17  ;;  %v7239_v9 = vcombine.high %v3953_v63, %v3961_v4  ;;  %v8780_v21 = vld [vmem:[%s10899_s1 + $0xaa0] sm:$0xff]   ;;  %v8781_v24 = vld [vmem:[%s10899_s1 + $0xa68] sm:$0xff]  }
 0x161   :  { %v7724_v16 = vadd.f32 %v7723_v2, %v7722_v7  ;;  %v7725_v23 = vpop.f32.mrb[54].mxu1  ;;  %v7686_v12 = vpop.f32.mrb[55].mxu0  ;;  %5498 = vmatprep.mubr.bf16.mxu0 %v7223_v35  ;;  %5563 = vmatprep.mubr.bf16.mxu1 %v7225_v42  ;;  %v7238_v3 = vcombine.low %v3953_v63, %v3961_v4  ;;  %v7240_v11 = vcombine.low %v3954_v5, %v3962_v61  ;;  %v3970_v35 = vld [vmem:[%s10900_s0 + $0x298] sm:$0xff]  ;;  %v3931_v63 = vld [vmem:[%s10900_s0 + $0x160] sm:$0xff]  ;;  %v3924_v5 = vld [vmem:[%s10900_s0 + $0x128] sm:$0xff] }
 0x162   :  { %v1870_v8 = vadd.f32 %v7684_v14, %v10206_v19  ;;  %v7687_v26 = vadd.f32 %v7686_v12, %v7685_v20  ;;  %v7726_v28 = vpop.f32.mrb[55].mxu1  ;;  %v8767_v19 = vld [vmem:[%s10899_s1 + $0xa08] sm:$0xff]  }
 0x163   :  { %v7727_v29 = vadd.f32 %v7726_v28, %v7725_v23  ;;  %8223 = vmatpush3.bf16.msra.mxu0 %v8767_v19  ;;  %8263 = vmatpush3.bf16.msra.mxu1 %v8768_v18  ;;  %v8783_v28 = vld [vmem:[%s10899_s1 + $0xa28] sm:$0xff]  }
 0x164   :  { %v1935_v25 = vadd.f32 %v7724_v16, %v1870_v8  ;;  %v1873_v34 = vadd.f32 %v7687_v26, %v10227_v36  ;;  %v8769_v36 = vld [vmem:[%s10899_s1 + $0xa50] sm:$0xff]   ;;  %8264 = vmatprep.subr.bf16.mxu1 %v8770_v48  ;;  %v3932_v61 = vld [vmem:[%s10900_s0 + $0x168] sm:$0xff] }
 0x165   :  { %8224 = vmatprep.subr.bf16.mxu0 %v8769_v36 }
 0x166   :  { %1960 = vst.msk [vmem:[#allocation2 + $0x10] sm:$0xff] %vm1957_vm0, %v1935_v25  ;;  %v7688_v40 = vpop.f32.mrb[56].mxu0  ;;  %v1938_v45 = vadd.f32 %v7727_v29, %v1873_v34  ;;  %5499 = vmatmul.mubr.bf16.gmra.mrb[148].mxu0 %v7222_v27  ;;  %5564 = vmatmul.mubr.bf16.gmra.mrb[148].mxu1 %v7224_v44  ;;  %v8782_v25 = vld [vmem:[%s10899_s1 + $0xae8] sm:$0xff]   ;;  %v3977_v34 = vld [vmem:[%s10900_s0 + $0x2d0] sm:$0xff] }
 0x167   :  { %v7728_v38 = vpop.f32.mrb[56].mxu1  ;;  %v7689_v33 = vpop.f32.mrb[57].mxu0  ;;  %8225 = vmatpush3.bf16.msra.mxu0 %v8771_v50  ;;  %8265 = vmatpush3.bf16.msra.mxu1 %v8772_v43  ;;  %v7255_v27 = vcombine.high %v3969_v32, %v3977_v34  ;;  %v8787_v50 = vld [vmem:[%s10899_s1 + $0xa30] sm:$0xff]  }
 0x168   :  { %v7690_v49 = vadd.f32 %v7689_v33, %v7688_v40  ;;  %v7729_v37 = vpop.f32.mrb[57].mxu1  ;;  %1961 = vst.msk [vmem:[#allocation2 + $0x18] sm:$0xff] %vm1957_vm0, %v1938_v45  ;;  %v7691_v54 = vpop.f32.mrb[58].mxu0  ;;  %8226 = vmatprep.subr.bf16.mxu0 %v8773_v57  ;;  %8266 = vmatprep.subr.bf16.mxu1 %v8774_v59  ;;  %v3978_v40 = vld [vmem:[%s10900_s0 + $0x2d8] sm:$0xff]  ;;  %v8785_v45 = vld [vmem:[%s10899_s1 + $0xa70] sm:$0xff]  }
 0x169   :  { %v7730_v53 = vadd.f32 %v7729_v37, %v7728_v38  ;;  %v7731_v52 = vpop.f32.mrb[58].mxu1  ;;  %v7692_v58 = vpop.f32.mrb[59].mxu0  ;;  %5506 = vmatprep.mubr.bf16.mxu0 %v7239_v9  ;;  %5571 = vmatprep.mubr.bf16.mxu1 %v7241_v10  ;;  %v7254_v38 = vcombine.low %v3969_v32, %v3977_v34  ;;  %v7257_v44 = vcombine.high %v3970_v35, %v3978_v40  ;;  %v8788_v43 = vld [vmem:[%s10899_s1 + $0xab0] sm:$0xff]   ;;  %v8790_v59 = vld [vmem:[%s10899_s1 + $0xaf8] sm:$0xff]   ;;  %v3948_v32 = vld [vmem:[%s10900_s0 + $0x1e8] sm:$0xff] }
 0x16a   :  { %v1878_v55 = vadd.f32 %v7690_v49, %v10245_v51  ;;  %v7693_v60 = vadd.f32 %v7692_v58, %v7691_v54  ;;  %v7732_v62 = vpop.f32.mrb[59].mxu1  ;;  %v8775_v51 = vld [vmem:[%s10899_s1 + $0xa18] sm:$0xff]   ;;  %v7256_v36 = vcombine.low %v3970_v35, %v3978_v40 }
 0x16b   :  { %v7733_v46 = vadd.f32 %v7732_v62, %v7731_v52  ;;  %8227 = vmatpush3.bf16.msra.mxu0 %v8775_v51  ;;  %8267 = vmatpush3.bf16.msra.mxu1 %v8776_v56  ;;  %v8789_v52 = vld [vmem:[%s10899_s1 + $0xa78] sm:$0xff]   ;;  %v3923_v56 = vld [vmem:[%s10900_s0 + $0x120] sm:$0xff] }
 0x16c   :  { %v1943_v47 = vadd.f32 %v7730_v53, %v1878_v55  ;;  %v1881_v0 = vadd.f32 %v7693_v60, %v10269_v6  ;;  %v8777_v6 = vld [vmem:[%s10899_s1 + $0xa60] sm:$0xff]   ;;  %8268 = vmatprep.subr.bf16.mxu1 %v8778_v1  ;;  %v8791_v62 = vld [vmem:[%s10899_s1 + $0xa38] sm:$0xff]   ;;  %v7211_v4 = vcombine.high %v3923_v56, %v3931_v63 }
 0x16d   :  { %8228 = vmatprep.subr.bf16.mxu0 %v8777_v6  ;;  %v8793_v6 = vld [vmem:[%s10899_s1 + $0xb40] sm:$0xff]  }
 0x16e   :  { %1962 = vst.msk [vmem:[#allocation2 + $0x20] sm:$0xff] %vm1957_vm0, %v1943_v47  ;;  %v7694_v7 = vpop.f32.mrb[60].mxu0  ;;  %v1946_v14 = vadd.f32 %v7733_v46, %v1881_v0  ;;  %5507 = vmatmul.mubr.bf16.gmra.mrb[152].mxu0 %v7238_v3  ;;  %5572 = vmatmul.mubr.bf16.gmra.mrb[152].mxu1 %v7240_v11  ;;  %v8792_v46 = vld [vmem:[%s10899_s1 + $0xab8] sm:$0xff]   ;;  %v7210_v0 = vcombine.low %v3923_v56, %v3931_v63  ;;  %v8794_v1 = vld [vmem:[%s10899_s1 + $0xbc0] sm:$0xff]  }
 0x16f   :  { %v7734_v13 = vpop.f32.mrb[60].mxu1  ;;  %v7695_v2 = vpop.f32.mrb[61].mxu0  ;;  %8229 = vmatpush3.bf16.msra.mxu0 %v8779_v15  ;;  %8269 = vmatpush3.bf16.msra.mxu1 %v8780_v21  ;;  %v7212_v3 = vcombine.low %v3924_v5, %v3932_v61  ;;  %v7213_v11 = vcombine.high %v3924_v5, %v3932_v61  ;;  %v8795_v15 = vld [vmem:[%s10899_s1 + $0xb00] sm:$0xff]  }
 0x170   :  { %v7696_v16 = vadd.f32 %v7695_v2, %v7694_v7  ;;  %v7735_v20 = vpop.f32.mrb[61].mxu1  ;;  %1963 = vst.msk [vmem:[#allocation2 + $0x28] sm:$0xff] %vm1957_vm0, %v1946_v14  ;;  %v7697_v23 = vpop.f32.mrb[62].mxu0  ;;  %8230 = vmatprep.subr.bf16.mxu0 %v8781_v24  ;;  %8270 = vmatprep.subr.bf16.mxu1 %v8782_v25  ;;  %v8796_v21 = vld [vmem:[%s10899_s1 + $0xb80] sm:$0xff]  }
 0x171   :  { %v7736_v8 = vadd.f32 %v7735_v20, %v7734_v13  ;;  %v7737_v17 = vpop.f32.mrb[62].mxu1  ;;  %v7698_v26 = vpop.f32.mrb[63].mxu0  ;;  %5514 = vmatprep.mubr.bf16.mxu0 %v7255_v27  ;;  %5579 = vmatprep.mubr.bf16.mxu1 %v7257_v44  ;;  %v8802_v44 = vld [vmem:[%s10899_s1 + $0xbd0] sm:$0xff]  }
 0x172   :  { %v1886_v12 = vadd.f32 %v7696_v16, %v10287_v22  ;;  %v7699_v29 = vadd.f32 %v7698_v26, %v7697_v23  ;;  %v7738_v18 = vpop.f32.mrb[63].mxu1  ;;  %v8784_v22 = vld [vmem:[%s10899_s1 + $0xaa8] sm:$0xff]  }
 0x173   :  { %v7739_v31 = vadd.f32 %v7738_v18, %v7737_v17  ;;  %8231 = vmatpush3.bf16.msra.mxu0 %v8783_v28  ;;  %8271 = vmatpush3.bf16.msra.mxu1 %v8784_v22  ;;  %v8797_v23 = vld [vmem:[%s10899_s1 + $0xb48] sm:$0xff]   ;;  %v3939_v18 = vld [vmem:[%s10900_s0 + $0x1a0] sm:$0xff] }
 0x174   :  { %v1951_v19 = vadd.f32 %v7736_v8, %v1886_v12  ;;  %v1889_v39 = vadd.f32 %v7699_v29, %v10314_v41  ;;  %v8786_v41 = vld [vmem:[%s10899_s1 + $0xaf0] sm:$0xff]   ;;  %8232 = vmatprep.subr.bf16.mxu0 %v8785_v45  ;;  %v8798_v17 = vld [vmem:[%s10899_s1 + $0xbc8] sm:$0xff]   ;;  %v3947_v22 = vld [vmem:[%s10900_s0 + $0x1e0] sm:$0xff] }
 0x175   :  { %8272 = vmatprep.subr.bf16.mxu1 %v8786_v41  ;;  %v8799_v28 = vld [vmem:[%s10899_s1 + $0xb08] sm:$0xff]   ;;  %v7226_v27 = vcombine.low %v3939_v18, %v3947_v22  ;;  %v8803_v45 = vld [vmem:[%s10899_s1 + $0xb10] sm:$0xff]  }
 0x176   :  { %1964 = vst.msk [vmem:[#allocation2 + $0x30] sm:$0xff] %vm1957_vm0, %v1951_v19  ;;  %v7756_v30 = vpop.f32.mrb[64].mxu0  ;;  %v1954_v33 = vadd.f32 %v7739_v31, %v1889_v39  ;;  %5515 = vmatmul.mubr.bf16.gmra.mrb[156].mxu0 %v7254_v38  ;;  %5580 = vmatmul.mubr.bf16.gmra.mrb[156].mxu1 %v7256_v36  ;;  %v8800_v29 = vld [vmem:[%s10899_s1 + $0xb88] sm:$0xff]   ;;  %v7227_v39 = vcombine.high %v3939_v18, %v3947_v22  ;;  %v8801_v38 = vld [vmem:[%s10899_s1 + $0xb50] sm:$0xff]   ;;  %v3979_v18 = vld [vmem:[%s10900_s0 + $0x2e0] sm:$0xff] }
 0x177   :  { %v7796_v42 = vpop.f32.mrb[64].mxu1  ;;  %v7757_v48 = vpop.f32.mrb[65].mxu0  ;;  %8233 = vmatpush3.bf16.msra.mxu0 %v8787_v50  ;;  %8273 = vmatpush3.bf16.msra.mxu1 %v8788_v43  ;;  %v3940_v31 = vld [vmem:[%s10900_s0 + $0x1a8] sm:$0xff]  ;;  %v8804_v41 = vld [vmem:[%s10899_s1 + $0xb90] sm:$0xff]   ;;  %v8805_v50 = vld [vmem:[%s10899_s1 + $0xb58] sm:$0xff]  }
 0x178   :  { %v7758_v49 = vadd.f32 %v7757_v48, %v7756_v30  ;;  %v7797_v37 = vpop.f32.mrb[65].mxu1  ;;  %1965 = vst.msk [vmem:[#allocation2 + $0x38] sm:$0xff] %vm1957_vm0, %v1954_v33  ;;  %v7759_v54 = vpop.f32.mrb[66].mxu0  ;;  %8234 = vmatprep.subr.bf16.mxu0 %v8789_v52  ;;  %8274 = vmatprep.subr.bf16.mxu1 %v8790_v59  ;;  %v7229_v30 = vcombine.high %v3940_v31, %v3948_v32  ;;  %v8807_v52 = vld [vmem:[%s10899_s1 + $0xb18] sm:$0xff]  }
 0x179   :  { %v7798_v53 = vadd.f32 %v7797_v37, %v7796_v42  ;;  %v7799_v55 = vpop.f32.mrb[66].mxu1  ;;  %v7760_v58 = vpop.f32.mrb[67].mxu0  ;;  %5620 = vmatprep.mubr.bf16.mxu0 %v7211_v4  ;;  %5685 = vmatprep.mubr.bf16.mxu1 %v7213_v11  ;;  %v7228_v40 = vcombine.low %v3940_v31, %v3948_v32  ;;  %v3972_v31 = vld [vmem:[%s10900_s0 + $0x2a8] sm:$0xff] }
 0x17a   :  { %v7761_v47 = vadd.f32 %v7760_v58, %v7759_v54  ;;  %v7800_v60 = vpop.f32.mrb[67].mxu1  ;;  %v8806_v54 = vld [vmem:[%s10899_s1 + $0xbd8] sm:$0xff]   ;;  %v3980_v32 = vld [vmem:[%s10900_s0 + $0x2e8] sm:$0xff] }
 0x17b   :  { %v10485_v57 = vadd.f32 %v7798_v53, %v7758_v49  ;;  %v7801_v51 = vadd.f32 %v7800_v60, %v7799_v55  ;;  %8235 = vmatpush3.bf16.msra.mxu0 %v8791_v62  ;;  %8275 = vmatpush3.bf16.msra.mxu1 %v8792_v46  ;;  %v3955_v62 = vld [vmem:[%s10900_s0 + $0x220] sm:$0xff]  ;;  %v3956_v46 = vld [vmem:[%s10900_s0 + $0x228] sm:$0xff] }
 0x17c   :  { %8300 = vmatprep.subr.bf16.mxu0 %v8793_v6  ;;  %8340 = vmatprep.subr.bf16.mxu1 %v8794_v1  ;;  %v8810_v6 = vld [vmem:[%s10899_s1 + $0xbe0] sm:$0xff]  }
 0x17d   :  { %v10508_v7 = vadd.f32 %v7801_v51, %v7761_v47  ;;  %v8808_v47 = vld [vmem:[%s10899_s1 + $0xb98] sm:$0xff]   ;;  %v3963_v51 = vld [vmem:[%s10900_s0 + $0x260] sm:$0xff] }
 0x17e   :  { %v7762_v9 = vpop.f32.mrb[68].mxu0  ;;  %5621 = vmatmul.mubr.bf16.vlgmr.msra.gmra.mrb[160].mxu0 %v7210_v0  ;;  %5686 = vmatmul.mubr.bf16.vlgmr.msra.gmra.mrb[160].mxu1 %v7212_v3  ;;  %v7243_v63 = vcombine.high %v3955_v62, %v3963_v51  ;;  %v3964_v0 = vld [vmem:[%s10900_s0 + $0x268] sm:$0xff]  ;;  %v7242_v4 = vcombine.low %v3955_v62, %v3963_v51  ;;  %v8809_v3 = vld [vmem:[%s10899_s1 + $0xb60] sm:$0xff]   ;;  %v8824_v62 = vld [vmem:[%s10899_s1 + $0xbb8] sm:$0xff]  }
 0x17f   :  { %v7802_v10 = vpop.f32.mrb[68].mxu1  ;;  %v7763_v13 = vpop.f32.mrb[69].mxu0  ;;  %8301 = vmatpush3.bf16.msra.mxu0 %v8795_v15  ;;  %8341 = vmatpush3.bf16.msra.mxu1 %v8796_v21  ;;  %v8813_v21 = vld [vmem:[%s10899_s1 + $0xb68] sm:$0xff]   ;;  %v3925_v51 = vld [vmem:[%s10900_s0 + $0x130] sm:$0xff] }
 0x180   :  { %v7764_v14 = vadd.f32 %v7763_v13, %v7762_v9  ;;  %v7803_v2 = vpop.f32.mrb[69].mxu1  ;;  %v7765_v20 = vpop.f32.mrb[70].mxu0  ;;  %8302 = vmatprep.subr.bf16.mxu0 %v8797_v23  ;;  %8342 = vmatprep.subr.bf16.mxu1 %v8798_v17  ;;  %v7245_v9 = vcombine.high %v3956_v46, %v3964_v0 }
 0x181   :  { %v7804_v16 = vadd.f32 %v7803_v2, %v7802_v10  ;;  %v7805_v8 = vpop.f32.mrb[70].mxu1  ;;  %v7766_v12 = vpop.f32.mrb[71].mxu0  ;;  %5628 = vmatprep.mubr.bf16.mxu0 %v7227_v39  ;;  %5693 = vmatprep.mubr.bf16.mxu1 %v7229_v30  ;;  %v7244_v10 = vcombine.low %v3956_v46, %v3964_v0  ;;  %v3934_v0 = vld [vmem:[%s10900_s0 + $0x178] sm:$0xff] }
 0x182   :  { %v7767_v25 = vadd.f32 %v7766_v12, %v7765_v20  ;;  %v7806_v26 = vpop.f32.mrb[71].mxu1  ;;  %v8814_v12 = vld [vmem:[%s10899_s1 + $0xbe8] sm:$0xff]  }
 0x183   :  { %v10525_v24 = vadd.f32 %v7804_v16, %v7764_v14  ;;  %v7807_v19 = vadd.f32 %v7806_v26, %v7805_v8  ;;  %8303 = vmatpush3.bf16.msra.mxu0 %v8799_v28  ;;  %8343 = vmatpush3.bf16.msra.mxu1 %v8800_v29  ;;  %v8811_v14 = vld [vmem:[%s10899_s1 + $0xb20] sm:$0xff]   ;;  %v8815_v26 = vld [vmem:[%s10899_s1 + $0xb28] sm:$0xff]  }
 0x184   :  { %8304 = vmatprep.subr.bf16.mxu0 %v8801_v38  ;;  %8344 = vmatprep.subr.bf16.mxu1 %v8802_v44  ;;  %v8812_v16 = vld [vmem:[%s10899_s1 + $0xba0] sm:$0xff]   ;;  %v7260_v38 = vcombine.low %v3972_v31, %v3980_v32 }
 0x185   :  { %v10548_v34 = vadd.f32 %v7807_v19, %v7767_v25  ;;  %v8816_v19 = vld [vmem:[%s10899_s1 + $0xba8] sm:$0xff]   ;;  %v3971_v29 = vld [vmem:[%s10900_s0 + $0x2a0] sm:$0xff] }
 0x186   :  { %v7768_v35 = vpop.f32.mrb[72].mxu0  ;;  %5629 = vmatmul.mubr.bf16.gmra.mrb[164].mxu0 %v7226_v27  ;;  %5694 = vmatmul.mubr.bf16.gmra.mrb[164].mxu1 %v7228_v40  ;;  %v7259_v22 = vcombine.high %v3971_v29, %v3979_v18  ;;  %v7261_v40 = vcombine.high %v3972_v31, %v3980_v32 }
 0x187   :  { %v7808_v42 = vpop.f32.mrb[72].mxu1  ;;  %v7769_v36 = vpop.f32.mrb[73].mxu0  ;;  %8305 = vmatpush3.bf16.msra.mxu0 %v8803_v45  ;;  %8345 = vmatpush3.bf16.msra.mxu1 %v8804_v41 }
 0x188   :  { %v7770_v33 = vadd.f32 %v7769_v36, %v7768_v35  ;;  %v7809_v48 = vpop.f32.mrb[73].mxu1  ;;  %v7771_v37 = vpop.f32.mrb[74].mxu0  ;;  %8306 = vmatprep.subr.bf16.mxu0 %v8805_v50  ;;  %8346 = vmatprep.subr.bf16.mxu1 %v8806_v54  ;;  %v7258_v35 = vcombine.low %v3971_v29, %v3979_v18  ;;  %v8818_v36 = vld [vmem:[%s10899_s1 + $0xbf0] sm:$0xff]   ;;  %v8821_v54 = vld [vmem:[%s10899_s1 + $0xb78] sm:$0xff]  }
 0x189   :  { %v7810_v49 = vadd.f32 %v7809_v48, %v7808_v42  ;;  %v7811_v53 = vpop.f32.mrb[74].mxu1  ;;  %v7772_v55 = vpop.f32.mrb[75].mxu0  ;;  %5636 = vmatprep.mubr.bf16.mxu0 %v7243_v63  ;;  %5701 = vmatprep.mubr.bf16.mxu1 %v7245_v9  ;;  %v8817_v42 = vld [vmem:[%s10899_s1 + $0xb70] sm:$0xff]   ;;  %v3926_v63 = vld [vmem:[%s10900_s0 + $0x138] sm:$0xff] }
 0x18a   :  { %v7773_v58 = vadd.f32 %v7772_v55, %v7771_v37  ;;  %v7812_v59 = vpop.f32.mrb[75].mxu1  ;;  %v8819_v48 = vld [vmem:[%s10899_s1 + $0xb30] sm:$0xff]   ;;  %v3966_v29 = vld [vmem:[%s10900_s0 + $0x278] sm:$0xff] }
 0x18b   :  { %v10568_v43 = vadd.f32 %v7810_v49, %v7770_v33  ;;  %v7813_v60 = vadd.f32 %v7812_v59, %v7811_v53  ;;  %8307 = vmatpush3.bf16.msra.mxu0 %v8807_v52  ;;  %8347 = vmatpush3.bf16.msra.mxu1 %v8808_v47  ;;  %v8820_v37 = vld [vmem:[%s10899_s1 + $0xbb0] sm:$0xff]   ;;  %v8822_v52 = vld [vmem:[%s10899_s1 + $0xbf8] sm:$0xff]  }
 0x18c   :  { %8308 = vmatprep.subr.bf16.mxu0 %v8809_v3  ;;  %8348 = vmatprep.subr.bf16.mxu1 %v8810_v6  ;;  %v7217_v3 = vcombine.high %v3926_v63, %v3934_v0  ;;  %v3942_v6 = vld [vmem:[%s10900_s0 + $0x1b8] sm:$0xff] }
 0x18d   :  { %v10588_v5 = vadd.f32 %v7813_v60, %v7773_v58 }
 0x18e   :  { %v7774_v56 = vpop.f32.mrb[76].mxu0  ;;  %5637 = vmatmul.mubr.bf16.gmra.mrb[168].mxu0 %v7242_v4  ;;  %5702 = vmatmul.mubr.bf16.gmra.mrb[168].mxu1 %v7244_v10  ;;  %v7216_v10 = vcombine.low %v3926_v63, %v3934_v0 }
 0x18f   :  { %v7814_v61 = vpop.f32.mrb[76].mxu1  ;;  %v7775_v11 = vpop.f32.mrb[77].mxu0  ;;  %8309 = vmatpush3.bf16.msra.mxu0 %v8811_v14  ;;  %8349 = vmatpush3.bf16.msra.mxu1 %v8812_v16 }
 0x190   :  { %v7776_v13 = vadd.f32 %v7775_v11, %v7774_v56  ;;  %v7815_v1 = vpop.f32.mrb[77].mxu1  ;;  %v7777_v15 = vpop.f32.mrb[78].mxu0  ;;  %8310 = vmatprep.subr.bf16.mxu0 %v8813_v21  ;;  %8350 = vmatprep.subr.bf16.mxu1 %v8814_v12  ;;  %v3933_v56 = vld [vmem:[%s10900_s0 + $0x170] sm:$0xff] }
 0x191   :  { %v7816_v2 = vadd.f32 %v7815_v1, %v7814_v61  ;;  %v7817_v20 = vpop.f32.mrb[78].mxu1  ;;  %v7778_v23 = vpop.f32.mrb[79].mxu0  ;;  %5644 = vmatprep.mubr.bf16.mxu0 %v7259_v22  ;;  %5709 = vmatprep.mubr.bf16.mxu1 %v7261_v40  ;;  %v7214_v61 = vcombine.low %v3925_v51, %v3933_v56  ;;  %v7215_v9 = vcombine.high %v3925_v51, %v3933_v56  ;;  %v3949_v11 = vld [vmem:[%s10900_s0 + $0x1f0] sm:$0xff] }
 0x192   :  { %v7779_v17 = vadd.f32 %v7778_v23, %v7777_v15  ;;  %v7818_v25 = vpop.f32.mrb[79].mxu1 }
 0x193   :  { %v10605_v8 = vadd.f32 %v7816_v2, %v7776_v13  ;;  %v7819_v28 = vadd.f32 %v7818_v25, %v7817_v20  ;;  %8311 = vmatpush3.bf16.msra.mxu0 %v8815_v26  ;;  %8351 = vmatpush3.bf16.msra.mxu1 %v8816_v19  ;;  %v3950_v2 = vld [vmem:[%s10900_s0 + $0x1f8] sm:$0xff]  ;;  %v3957_v26 = vld [vmem:[%s10900_s0 + $0x230] sm:$0xff] }
 0x194   :  { %8312 = vmatprep.subr.bf16.mxu0 %v8817_v42  ;;  %8352 = vmatprep.subr.bf16.mxu1 %v8818_v36  ;;  %v7233_v23 = vcombine.high %v3942_v6, %v3950_v2  ;;  %v3958_v19 = vld [vmem:[%s10900_s0 + $0x238] sm:$0xff] }
 0x195   :  { %v10628_v39 = vadd.f32 %v7819_v28, %v7779_v17  ;;  %v3965_v28 = vld [vmem:[%s10900_s0 + $0x270] sm:$0xff]  ;;  %v7249_v42 = vcombine.high %v3958_v19, %v3966_v29  ;;  %v7248_v51 = vcombine.low %v3958_v19, %v3966_v29 }
 0x196   :  { %v7836_v30 = vpop.f32.mrb[80].mxu0  ;;  %5645 = vmatmul.mubr.bf16.gmra.mrb[172].mxu0 %v7258_v35  ;;  %5710 = vmatmul.mubr.bf16.gmra.mrb[172].mxu1 %v7260_v38  ;;  %v7247_v38 = vcombine.high %v3957_v26, %v3965_v28 }
 0x197   :  { %v7876_v27 = vpop.f32.mrb[80].mxu1  ;;  %v7837_v44 = vpop.f32.mrb[81].mxu0  ;;  %8313 = vmatpush3.bf16.msra.mxu0 %v8819_v48  ;;  %8353 = vmatpush3.bf16.msra.mxu1 %v8820_v37 }
 0x198   :  { %v7838_v45 = vadd.f32 %v7837_v44, %v7836_v30  ;;  %v7877_v33 = vpop.f32.mrb[81].mxu1  ;;  %v7839_v49 = vpop.f32.mrb[82].mxu0  ;;  %8314 = vmatprep.subr.bf16.mxu0 %v8821_v54  ;;  %8354 = vmatprep.subr.bf16.mxu1 %v8822_v52  ;;  %v7232_v30 = vcombine.low %v3942_v6, %v3950_v2  ;;  %v3981_v52 = vld [vmem:[%s10900_s0 + $0x2f0] sm:$0xff] }
 0x199   :  { %v7878_v41 = vadd.f32 %v7877_v33, %v7876_v27  ;;  %v7879_v53 = vpop.f32.mrb[82].mxu1  ;;  %v7840_v55 = vpop.f32.mrb[83].mxu0  ;;  %5750 = vmatprep.mubr.bf16.mxu0 %v7215_v9  ;;  %5815 = vmatprep.mubr.bf16.mxu1 %v7217_v3 }
 0x19a   :  { %v3540_v50 = vadd.f32 %v7838_v45, %v10485_v57  ;;  %v7841_v59 = vadd.f32 %v7840_v55, %v7839_v49  ;;  %v7880_v47 = vpop.f32.mrb[83].mxu1  ;;  %v8823_v57 = vld [vmem:[%s10899_s1 + $0xb38] sm:$0xff]  }
 0x19b   :  { %v7881_v60 = vadd.f32 %v7880_v47, %v7879_v53  ;;  %8315 = vmatpush3.bf16.msra.mxu0 %v8823_v57  ;;  %8355 = vmatpush3.bf16.msra.mxu1 %v8824_v62  ;;  %v3982_v47 = vld [vmem:[%s10900_s0 + $0x2f8] sm:$0xff] }
 0x19c   :  { %v10649_v58 = vadd.f32 %v7878_v41, %v3540_v50  ;;  %v3543_v46 = vadd.f32 %v7841_v59, %v10508_v7  ;;  %v3941_v7 = vld [vmem:[%s10900_s0 + $0x1b0] sm:$0xff]  ;;  %v3974_v59 = vld [vmem:[%s10900_s0 + $0x2b8] sm:$0xff] }
 0x19d   :  { %v7231_v14 = vcombine.high %v3941_v7, %v3949_v11  ;;  %v7230_v35 = vcombine.low %v3941_v7, %v3949_v11  ;;  %v7265_v56 = vcombine.high %v3974_v59, %v3982_v47 }
 0x19e   :  { %v7842_v4 = vpop.f32.mrb[84].mxu0  ;;  %v10682_v15 = vadd.f32 %v7881_v60, %v3543_v46  ;;  %5751 = vmatmul.mubr.bf16.vlgmr.msra.gmra.mrb[176].mxu0 %v7214_v61  ;;  %5816 = vmatmul.mubr.bf16.vlgmr.msra.gmra.mrb[176].mxu1 %v7216_v10 }
 0x19f   :  { %v7882_v13 = vpop.f32.mrb[84].mxu1  ;;  %v7843_v1 = vpop.f32.mrb[85].mxu0  ;;  %5758 = vmatprep.mubr.bf16.mxu0 %v7231_v14  ;;  %5823 = vmatprep.mubr.bf16.mxu1 %v7233_v23 }
 0x1a0   :  { %v7844_v16 = vadd.f32 %v7843_v1, %v7842_v4  ;;  %v7883_v20 = vpop.f32.mrb[85].mxu1  ;;  %v7845_v21 = vpop.f32.mrb[86].mxu0 }
 0x1a1   :  { %v7885_v12 = vpop.f32.mrb[86].mxu1  ;;  %v7846_v17 = vpop.f32.mrb[87].mxu0  ;;  %v7884_v22 = vadd.f32 %v7883_v20, %v7882_v13 }
 0x1a2   :  { %v7886_v25 = vpop.f32.mrb[87].mxu1  ;;  %v3548_v18 = vadd.f32 %v7844_v16, %v10525_v24  ;;  %v7847_v31 = vadd.f32 %v7846_v17, %v7845_v21  ;;  %v7264_v16 = vcombine.low %v3974_v59, %v3982_v47 }
 0x1a3   :  { %v7887_v32 = vadd.f32 %v7886_v25, %v7885_v12 }
 0x1a4   :  { %v10697_v27 = vadd.f32 %v7884_v22, %v3548_v18  ;;  %v3551_v40 = vadd.f32 %v7847_v31, %v10548_v34  ;;  %v3973_v34 = vld [vmem:[%s10900_s0 + $0x2b0] sm:$0xff] }
 0x1a5   :  { %v7263_v46 = vcombine.high %v3973_v34, %v3981_v52  ;;  %v7262_v2 = vcombine.low %v3973_v34, %v3981_v52 }
 0x1a6   :  { %v7848_v44 = vpop.f32.mrb[88].mxu0  ;;  %v10700_v36 = vadd.f32 %v7887_v32, %v3551_v40  ;;  %5759 = vmatmul.mubr.bf16.gmra.mrb[180].mxu0 %v7230_v35  ;;  %5824 = vmatmul.mubr.bf16.gmra.mrb[180].mxu1 %v7232_v30 }
 0x1a7   :  { %v7888_v45 = vpop.f32.mrb[88].mxu1  ;;  %v7849_v33 = vpop.f32.mrb[89].mxu0  ;;  %5766 = vmatprep.mubr.bf16.mxu0 %v7247_v38  ;;  %5831 = vmatprep.mubr.bf16.mxu1 %v7249_v42 }
 0x1a8   :  { %v7850_v48 = vadd.f32 %v7849_v33, %v7848_v44  ;;  %v7889_v41 = vpop.f32.mrb[89].mxu1  ;;  %v7851_v49 = vpop.f32.mrb[90].mxu0 }
 0x1a9   :  { %v7890_v24 = vadd.f32 %v7889_v41, %v7888_v45  ;;  %v7891_v37 = vpop.f32.mrb[90].mxu1  ;;  %v7852_v50 = vpop.f32.mrb[91].mxu0 }
 0x1aa   :  { %v3556_v53 = vadd.f32 %v7850_v48, %v10568_v43  ;;  %v7853_v54 = vadd.f32 %v7852_v50, %v7851_v49  ;;  %v7892_v55 = vpop.f32.mrb[91].mxu1  ;;  %v7246_v43 = vcombine.low %v3957_v26, %v3965_v28 }
 0x1ab   :  { %v7893_v57 = vadd.f32 %v7892_v55, %v7891_v37 }
 0x1ac   :  { %v10715_v60 = vadd.f32 %v7890_v24, %v3556_v53  ;;  %v3559_v62 = vadd.f32 %v7853_v54, %v10588_v5 }
 0x1ae   :  { %v10718_v63 = vadd.f32 %v7893_v57, %v3559_v62  ;;  %v7854_v0 = vpop.f32.mrb[92].mxu0  ;;  %5767 = vmatmul.mubr.bf16.gmra.mrb[184].mxu0 %v7246_v43  ;;  %5832 = vmatmul.mubr.bf16.gmra.mrb[184].mxu1 %v7248_v51 }
 0x1af   :  { %v7894_v4 = vpop.f32.mrb[92].mxu1  ;;  %v7855_v61 = vpop.f32.mrb[93].mxu0  ;;  %5774 = vmatprep.mubr.bf16.mxu0 %v7263_v46  ;;  %5839 = vmatprep.mubr.bf16.mxu1 %v7265_v56 }
 0x1b0   :  { %v7895_v9 = vpop.f32.mrb[93].mxu1  ;;  %v7856_v10 = vadd.f32 %v7855_v61, %v7854_v0  ;;  %v7857_v7 = vpop.f32.mrb[94].mxu0 }
 0x1b1   :  { %v7896_v3 = vadd.f32 %v7895_v9, %v7894_v4  ;;  %v7897_v11 = vpop.f32.mrb[94].mxu1  ;;  %v7858_v6 = vpop.f32.mrb[95].mxu0 }
 0x1b2   :  { %v7898_v5 = vpop.f32.mrb[95].mxu1  ;;  %v3564_v13 = vadd.f32 %v7856_v10, %v10605_v8  ;;  %v7859_v1 = vadd.f32 %v7858_v6, %v7857_v7 }
 0x1b3   :  { %v7899_v14 = vadd.f32 %v7898_v5, %v7897_v11 }
 0x1b4   :  { %v3629_v20 = vadd.f32 %v7896_v3, %v3564_v13  ;;  %v3567_v21 = vadd.f32 %v7859_v1, %v10628_v39 }
 0x1b6   :  { %v10722_v23 = vadd.f32 %v7899_v14, %v3567_v21  ;;  %5775 = vmatmul.mubr.bf16.gmra.mrb[188].mxu0 %v7262_v2  ;;  %5840 = vmatmul.mubr.bf16.gmra.mrb[188].mxu1 %v7264_v16  ;;  %v7916_v12 = vpop.f32.mrb[96].mxu0 }
 0x1b7   :  { %v7956_v17 = vpop.f32.mrb[96].mxu1  ;;  %v7917_v25 = vpop.f32.mrb[97].mxu0 }
 0x1b8   :  { %v7918_v26 = vadd.f32 %v7917_v25, %v7916_v12  ;;  %v7957_v28 = vpop.f32.mrb[97].mxu1  ;;  %v7919_v19 = vpop.f32.mrb[98].mxu0 }
 0x1b9   :  { %v7958_v29 = vadd.f32 %v7957_v28, %v7956_v17  ;;  %v7959_v18 = vpop.f32.mrb[98].mxu1  ;;  %v7920_v8 = vpop.f32.mrb[99].mxu0 }
 0x1ba   :  { %v3670_v22 = vadd.f32 %v7918_v26, %v10649_v58  ;;  %v7921_v31 = vadd.f32 %v7920_v8, %v7919_v19  ;;  %v7960_v32 = vpop.f32.mrb[99].mxu1 }
 0x1bb   :  { %v7961_v35 = vadd.f32 %v7960_v32, %v7959_v18 }
 0x1bc   :  { %v3735_v30 = vadd.f32 %v7958_v29, %v3670_v22  ;;  %v3673_v39 = vadd.f32 %v7921_v31, %v10682_v15 }
 0x1be   :  { %v10726_v40 = vadd.f32 %v7961_v35, %v3673_v39  ;;  %v7922_v38 = vpop.f32.mrb[100].mxu0 }
 0x1bf   :  { %v7923_v44 = vpop.f32.mrb[101].mxu0 }
 0x1c0   :  { %v7924_v45 = vadd.f32 %v7923_v44, %v7922_v38  ;;  %v7925_v48 = vpop.f32.mrb[102].mxu0  ;;  %v3895_v44 = vld [vmem:[#allocation2] sm:$0xff] }
 0x1c1   :  { %v7926_v24 = vpop.f32.mrb[103].mxu0 }
 0x1c2   :  { %v3678_v37 = vadd.f32 %v7924_v45, %v10697_v27  ;;  %v7927_v58 = vadd.f32 %v7926_v24, %v7925_v48 }
 0x1c4   :  { %v3681_v15 = vadd.f32 %v7927_v58, %v10700_v36 }
 0x1ce   :  { %v7962_v42 = vpop.f32.mrb[100].mxu1 }
 0x1cf   :  { %v7963_v33 = vpop.f32.mrb[101].mxu1 }
 0x1d0   :  { %v7964_v41 = vadd.f32 %v7963_v33, %v7962_v42  ;;  %v7965_v49 = vpop.f32.mrb[102].mxu1  ;;  %v3896_v33 = vld [vmem:[#allocation2 + $0x8] sm:$0xff] }
 0x1d1   :  { %v7966_v50 = vpop.f32.mrb[103].mxu1 }
 0x1d2   :  { %v7967_v34 = vadd.f32 %v7966_v50, %v7965_v49  ;;  %v10729_v53 = vadd.f32 %v7964_v41, %v3678_v37 }
 0x1d4   :  { %v10732_v54 = vadd.f32 %v7967_v34, %v3681_v15 }
 0x1d6   :  { %v7928_v55 = vpop.f32.mrb[104].mxu0  ;;  %v7968_v52 = vpop.f32.mrb[104].mxu1 }
 0x1d7   :  { %v7929_v59 = vpop.f32.mrb[105].mxu0  ;;  %v7969_v47 = vpop.f32.mrb[105].mxu1 }
 0x1d8   :  { %v7930_v57 = vadd.f32 %v7929_v59, %v7928_v55  ;;  %v7970_v62 = vadd.f32 %v7969_v47, %v7968_v52  ;;  %v7931_v43 = vpop.f32.mrb[106].mxu0  ;;  %v7971_v51 = vpop.f32.mrb[106].mxu1 }
 0x1d9   :  { %v7932_v46 = vpop.f32.mrb[107].mxu0  ;;  %v7972_v56 = vpop.f32.mrb[107].mxu1 }
 0x1da   :  { %v3686_v27 = vadd.f32 %v7930_v57, %v10715_v60  ;;  %v7933_v0 = vadd.f32 %v7932_v46, %v7931_v43  ;;  %v7973_v4 = vadd.f32 %v7972_v56, %v7971_v51  ;;  %v3898_v46 = vld [vmem:[#allocation2 + $0x18] sm:$0xff] }
 0x1dc   :  { %v10735_v61 = vadd.f32 %v7970_v62, %v3686_v27  ;;  %v3689_v36 = vadd.f32 %v7933_v0, %v10718_v63  ;;  %v3897_v62 = vld [vmem:[#allocation2 + $0x10] sm:$0xff] }
 0x1de   :  { %v10738_v9 = vadd.f32 %v7973_v4, %v3689_v36  ;;  %v7934_v10 = vpop.f32.mrb[108].mxu0  ;;  %v7974_v3 = vpop.f32.mrb[108].mxu1 }
 0x1df   :  { %v7935_v7 = vpop.f32.mrb[109].mxu0  ;;  %v7975_v6 = vpop.f32.mrb[109].mxu1 }
 0x1e0   :  { %v7936_v11 = vadd.f32 %v7935_v7, %v7934_v10  ;;  %v7937_v5 = vpop.f32.mrb[110].mxu0  ;;  %v7976_v13 = vadd.f32 %v7975_v6, %v7974_v3  ;;  %v7977_v1 = vpop.f32.mrb[110].mxu1 }
 0x1e1   :  { %v7938_v14 = vpop.f32.mrb[111].mxu0  ;;  %v7978_v60 = vpop.f32.mrb[111].mxu1 }
 0x1e2   :  { %v3694_v2 = vadd.f32 %v7936_v11, %v3629_v20  ;;  %v7939_v16 = vadd.f32 %v7938_v14, %v7937_v5  ;;  %v7979_v21 = vadd.f32 %v7978_v60, %v7977_v1 }
 0x1e4   :  { %v10740_v12 = vadd.f32 %v7976_v13, %v3694_v2  ;;  %v3697_v17 = vadd.f32 %v7939_v16, %v10722_v23  ;;  %v3899_v2 = vld [vmem:[#allocation2 + $0x20] sm:$0xff] }
 0x1e6   :  { %v10743_v63 = vadd.f32 %v7979_v21, %v3697_v17  ;;  %v8036_v26 = vpop.f32.mrb[112].mxu1  ;;  %v3900_v21 = vld [vmem:[#allocation2 + $0x28] sm:$0xff] }
 0x1e7   :  { %v8037_v29 = vpop.f32.mrb[113].mxu1 }
 0x1e8   :  { %v8038_v8 = vadd.f32 %v8037_v29, %v8036_v26  ;;  %v8039_v22 = vpop.f32.mrb[114].mxu1 }
 0x1e9   :  { %v8040_v35 = vpop.f32.mrb[115].mxu1 }
 0x1ea   :  { %v8041_v39 = vadd.f32 %v8040_v35, %v8039_v22 }
 0x1f0   :  { %v8042_v49 = vpop.f32.mrb[116].mxu1 }
 0x1f1   :  { %v7996_v25 = vpop.f32.mrb[112].mxu0  ;;  %v8043_v37 = vpop.f32.mrb[117].mxu1 }
 0x1f2   :  { %v7997_v28 = vpop.f32.mrb[113].mxu0  ;;  %v8044_v58 = vadd.f32 %v8043_v37, %v8042_v49  ;;  %v8045_v34 = vpop.f32.mrb[118].mxu1 }
 0x1f3   :  { %v7998_v19 = vadd.f32 %v7997_v28, %v7996_v25  ;;  %v7999_v18 = vpop.f32.mrb[114].mxu0  ;;  %v8046_v55 = vpop.f32.mrb[119].mxu1 }
 0x1f4   :  { %v8000_v31 = vpop.f32.mrb[115].mxu0  ;;  %v8047_v59 = vadd.f32 %v8046_v55, %v8045_v34 }
 0x1f5   :  { %v3800_v32 = vadd.f32 %v7998_v19, %v3735_v30  ;;  %v8001_v20 = vadd.f32 %v8000_v31, %v7999_v18 }
 0x1f7   :  { %v3865_v38 = vadd.f32 %v8038_v8, %v3800_v32  ;;  %v3803_v42 = vadd.f32 %v8001_v20, %v10726_v40 }
 0x1f8   :  { %v8048_v0 = vpop.f32.mrb[120].mxu1 }
 0x1f9   :  { %v3903_v23 = vadd.f32 %v3895_v44, %v3865_v38  ;;  %v3868_v45 = vadd.f32 %v8041_v39, %v3803_v42  ;;  %v8002_v41 = vpop.f32.mrb[116].mxu0  ;;  %v8049_v10 = vpop.f32.mrb[121].mxu1  ;;  %v3901_v38 = vld [vmem:[#allocation2 + $0x30] sm:$0xff] }
 0x1fa   :  { %v8003_v24 = vpop.f32.mrb[117].mxu0  ;;  %v8051_v7 = vpop.f32.mrb[122].mxu1 }
 0x1fb   :  { %3911 = vst.msk [vmem:[#allocation2] sm:$0xff] %vm1957_vm0, %v3903_v23  ;;  %v3904_v48 = vadd.f32 %v3896_v33, %v3868_v45  ;;  %v8004_v30 = vadd.f32 %v8003_v24, %v8002_v41  ;;  %v8005_v50 = vpop.f32.mrb[118].mxu0  ;;  %v8052_v5 = vpop.f32.mrb[123].mxu1  ;;  %v3902_v23 = vld [vmem:[#allocation2 + $0x38] sm:$0xff] }
 0x1fc   :  { %v8006_v15 = vpop.f32.mrb[119].mxu0  ;;  %v8053_v13 = vadd.f32 %v8052_v5, %v8051_v7  ;;  %v8826_v5 = vld [vmem:[%s10901_s3 + $0x10] sm:$0xff]  }
 0x1fd   :  { %3912 = vst.msk [vmem:[#allocation2 + $0x8] sm:$0xff] %vm1957_vm0, %v3904_v48  ;;  %v3808_v40 = vadd.f32 %v8004_v30, %v10729_v53  ;;  %v8007_v52 = vadd.f32 %v8006_v15, %v8005_v50  ;;  %v8050_v53 = vadd.f32 %v8049_v10, %v8048_v0  ;;  %v8825_v0 = vld [vmem:[%s10901_s3] sm:$0xff]   ;;  %8405 = vmatprep.subr.bf16.mxu1 %v8826_v5 }
 0x1fe   :  { %8397 = vmatprep.subr.bf16.mxu0 %v8825_v0  ;;  %8406 = vmatpush3.bf16.msra.mxu1 %v8826_v5 }
 0x1ff   :  { %v3873_v47 = vadd.f32 %v8044_v58, %v3808_v40  ;;  %v3811_v57 = vadd.f32 %v8007_v52, %v10732_v54  ;;  %8398 = vmatpush3.bf16.msra.mxu0 %v8825_v0 }
 0x200   :  { %v8054_v26 = vpop.f32.mrb[124].mxu1 }
 0x201   :  { %v3905_v43 = vadd.f32 %v3897_v62, %v3873_v47  ;;  %v3876_v51 = vadd.f32 %v8047_v59, %v3811_v57  ;;  %v8008_v56 = vpop.f32.mrb[120].mxu0  ;;  %v8055_v29 = vpop.f32.mrb[125].mxu1 }
 0x202   :  { %v8009_v4 = vpop.f32.mrb[121].mxu0  ;;  %v8057_v8 = vpop.f32.mrb[126].mxu1 }
 0x203   :  { %3913 = vst.msk [vmem:[#allocation2 + $0x10] sm:$0xff] %vm1957_vm0, %v3905_v43  ;;  %v3906_v27 = vadd.f32 %v3898_v46, %v3876_v51  ;;  %v8010_v36 = vadd.f32 %v8009_v4, %v8008_v56  ;;  %v8011_v3 = vpop.f32.mrb[122].mxu0  ;;  %v8058_v32 = vpop.f32.mrb[127].mxu1 }
 0x204   :  { %v8012_v11 = vpop.f32.mrb[123].mxu0  ;;  %v8059_v20 = vadd.f32 %v8058_v32, %v8057_v8 }
 0x205   :  { %3914 = vst.msk [vmem:[#allocation2 + $0x18] sm:$0xff] %vm1957_vm0, %v3906_v27  ;;  %v3816_v54 = vadd.f32 %v8010_v36, %v10735_v61  ;;  %v8013_v6 = vadd.f32 %v8012_v11, %v8011_v3  ;;  %v8056_v61 = vadd.f32 %v8055_v29, %v8054_v26  ;;  %v8828_v26 = vld [vmem:[%s10901_s3 + $0x18] sm:$0xff]  }
 0x206   :  { %8407 = vmatprep.subr.bf16.mxu1 %v8828_v26 }
 0x207   :  { %v3881_v1 = vadd.f32 %v8050_v53, %v3816_v54  ;;  %v3819_v14 = vadd.f32 %v8013_v6, %v10738_v9  ;;  %8408 = vmatpush3.bf16.msra.mxu1 %v8828_v26 }
 0x209   :  { %v3907_v16 = vadd.f32 %v3899_v2, %v3881_v1  ;;  %v3884_v60 = vadd.f32 %v8053_v13, %v3819_v14  ;;  %v8014_v17 = vpop.f32.mrb[124].mxu0 }
 0x20a   :  { %v8015_v28 = vpop.f32.mrb[125].mxu0 }
 0x20b   :  { %3915 = vst.msk [vmem:[#allocation2 + $0x20] sm:$0xff] %vm1957_vm0, %v3907_v16  ;;  %v3908_v25 = vadd.f32 %v3900_v21, %v3884_v60  ;;  %v8016_v19 = vadd.f32 %v8015_v28, %v8014_v17  ;;  %v8017_v18 = vpop.f32.mrb[126].mxu0 }
 0x20c   :  { %v8018_v22 = vpop.f32.mrb[127].mxu0 }
 0x20d   :  { %3916 = vst.msk [vmem:[#allocation2 + $0x28] sm:$0xff] %vm1957_vm0, %v3908_v25  ;;  %v3824_v9 = vadd.f32 %v8016_v19, %v10740_v12  ;;  %v8019_v31 = vadd.f32 %v8018_v22, %v8017_v18  ;;  %v8827_v25 = vld [vmem:[%s10901_s3 + $0x8] sm:$0xff]  }
 0x20e   :  { %8399 = vmatprep.subr.bf16.mxu0 %v8827_v25 }
 0x20f   :  { %v3889_v35 = vadd.f32 %v8056_v61, %v3824_v9  ;;  %v3827_v39 = vadd.f32 %v8019_v31, %v10743_v63  ;;  %8400 = vmatpush3.bf16.msra.mxu0 %v8827_v25 }
 0x211   :  { %v3909_v42 = vadd.f32 %v3901_v38, %v3889_v35  ;;  %v3892_v44 = vadd.f32 %v8059_v20, %v3827_v39  ;;  %v8076_v33 = vpop.f32.mrb[128].mxu0  ;;  %v8116_v48 = vpop.f32.mrb[128].mxu1 }
 0x212   :  { %v8077_v41 = vpop.f32.mrb[129].mxu0  ;;  %v8117_v49 = vpop.f32.mrb[129].mxu1 }
 0x213   :  { %3917 = vst.msk [vmem:[#allocation2 + $0x30] sm:$0xff] %vm1957_vm0, %v3909_v42  ;;  %v3910_v45 = vadd.f32 %v3902_v23, %v3892_v44  ;;  %v8078_v12 = vadd.f32 %v8077_v41, %v8076_v33  ;;  %v8118_v24 = vadd.f32 %v8117_v49, %v8116_v48  ;;  %v8079_v37 = vpop.f32.mrb[130].mxu0  ;;  %v8119_v30 = vpop.f32.mrb[130].mxu1  ;;  %v10791_v42 = vld [vmem:[%s10901_s3 + $0x20] sm:$0xff]  }
 0x214   :  { %v8080_v58 = vpop.f32.mrb[131].mxu0  ;;  %v8120_v50 = vpop.f32.mrb[131].mxu1  ;;  %8413 = vmatprep.subr.bf16.mxu0 %v10791_v42 }
 0x215   :  { %3918 = vst.msk [vmem:[#allocation2 + $0x38] sm:$0xff] %vm1957_vm0, %v3910_v45  ;;  %v10760_v63 = vadd.f32 %v8118_v24, %v8078_v12  ;;  %v8081_v34 = vadd.f32 %v8080_v58, %v8079_v37  ;;  %v8121_v15 = vadd.f32 %v8120_v50, %v8119_v30 }
 0x217   :  { %v10762_v55 = vadd.f32 %v8121_v15, %v8081_v34 }
 0x219   :  { %v8082_v40 = vpop.f32.mrb[132].mxu0  ;;  %v8122_v52 = vpop.f32.mrb[132].mxu1 }
 0x21a   :  { %v8083_v59 = vpop.f32.mrb[133].mxu0  ;;  %v8123_v57 = vpop.f32.mrb[133].mxu1 }
 0x21b   :  { %v8084_v47 = vadd.f32 %v8083_v59, %v8082_v40  ;;  %v8085_v62 = vpop.f32.mrb[134].mxu0  ;;  %v8124_v43 = vadd.f32 %v8123_v57, %v8122_v52  ;;  %v8125_v51 = vpop.f32.mrb[134].mxu1 }
 0x21c   :  { %v8086_v46 = vpop.f32.mrb[135].mxu0  ;;  %v8126_v27 = vpop.f32.mrb[135].mxu1 }
 0x21d   :  { %v8087_v56 = vadd.f32 %v8086_v46, %v8085_v62  ;;  %v10767_v4 = vadd.f32 %v8124_v43, %v8084_v47  ;;  %v8127_v36 = vadd.f32 %v8126_v27, %v8125_v51 }
 0x21f   :  { %v10769_v10 = vadd.f32 %v8127_v36, %v8087_v56 }
 0x221   :  { %v8088_v3 = vpop.f32.mrb[136].mxu0  ;;  %v8128_v53 = vpop.f32.mrb[136].mxu1 }
 0x222   :  { %v8089_v7 = vpop.f32.mrb[137].mxu0  ;;  %v8129_v54 = vpop.f32.mrb[137].mxu1 }
 0x223   :  { %v8090_v11 = vadd.f32 %v8089_v7, %v8088_v3  ;;  %v8091_v6 = vpop.f32.mrb[138].mxu0  ;;  %v8130_v13 = vadd.f32 %v8129_v54, %v8128_v53  ;;  %v8131_v1 = vpop.f32.mrb[138].mxu1 }
 0x224   :  { %v8092_v14 = vpop.f32.mrb[139].mxu0  ;;  %v8132_v16 = vpop.f32.mrb[139].mxu1 }
 0x225   :  { %v8093_v2 = vadd.f32 %v8092_v14, %v8091_v6  ;;  %v10774_v60 = vadd.f32 %v8130_v13, %v8090_v11  ;;  %v8133_v21 = vadd.f32 %v8132_v16, %v8131_v1 }
 0x227   :  { %v10776_v17 = vadd.f32 %v8133_v21, %v8093_v2 }
 0x229   :  { %v8094_v28 = vpop.f32.mrb[140].mxu0  ;;  %v8134_v19 = vpop.f32.mrb[140].mxu1 }
 0x22a   :  { %v8095_v29 = vpop.f32.mrb[141].mxu0  ;;  %v8135_v18 = vpop.f32.mrb[141].mxu1 }
 0x22b   :  { %v8096_v61 = vadd.f32 %v8095_v29, %v8094_v28  ;;  %v8136_v8 = vadd.f32 %v8135_v18, %v8134_v19  ;;  %v8097_v22 = vpop.f32.mrb[142].mxu0  ;;  %v8137_v9 = vpop.f32.mrb[142].mxu1 }
 0x22c   :  { %v8098_v31 = vpop.f32.mrb[143].mxu0  ;;  %v8138_v32 = vpop.f32.mrb[143].mxu1 }
 0x22d   :  { %v10784_v20 = vadd.f32 %v8136_v8, %v8096_v61  ;;  %v8099_v35 = vadd.f32 %v8098_v31, %v8097_v22  ;;  %v8139_v39 = vadd.f32 %v8138_v32, %v8137_v9 }
 0x22f   :  { %v10786_v38 = vadd.f32 %v8139_v39, %v8099_v35 }
 0x231   :  { %v8156_v44 = vpop.f32.mrb[144].mxu0  ;;  %v8196_v23 = vpop.f32.mrb[144].mxu1 }
 0x232   :  { %v8157_v45 = vpop.f32.mrb[145].mxu0  ;;  %v8197_v48 = vpop.f32.mrb[145].mxu1 }
 0x233   :  { %v8158_v33 = vadd.f32 %v8157_v45, %v8156_v44  ;;  %v8159_v41 = vpop.f32.mrb[146].mxu0  ;;  %v8198_v49 = vadd.f32 %v8197_v48, %v8196_v23  ;;  %v8199_v12 = vpop.f32.mrb[146].mxu1 }
 0x234   :  { %v8160_v24 = vpop.f32.mrb[147].mxu0  ;;  %v8200_v58 = vpop.f32.mrb[147].mxu1 }
 0x235   :  { %v5493_v37 = vadd.f32 %v8158_v33, %v10760_v63  ;;  %v8161_v30 = vadd.f32 %v8160_v24, %v8159_v41  ;;  %v8201_v50 = vadd.f32 %v8200_v58, %v8199_v12 }
 0x237   :  { %v5558_v34 = vadd.f32 %v8198_v49, %v5493_v37  ;;  %v5496_v15 = vadd.f32 %v8161_v30, %v10762_v55 }
 0x239   :  { %v10796_v40 = vadd.f32 %v8201_v50, %v5496_v15  ;;  %v8162_v52 = vpop.f32.mrb[148].mxu0  ;;  %v8202_v59 = vpop.f32.mrb[148].mxu1 }
 0x23a   :  { %v8163_v47 = vpop.f32.mrb[149].mxu0  ;;  %v8203_v62 = vpop.f32.mrb[149].mxu1 }
 0x23b   :  { %v8164_v57 = vadd.f32 %v8163_v47, %v8162_v52  ;;  %v8165_v43 = vpop.f32.mrb[150].mxu0  ;;  %v8204_v51 = vadd.f32 %v8203_v62, %v8202_v59  ;;  %v8205_v46 = vpop.f32.mrb[150].mxu1 }
 0x23c   :  { %v8166_v56 = vpop.f32.mrb[151].mxu0  ;;  %v8206_v0 = vpop.f32.mrb[151].mxu1 }
 0x23d   :  { %v5501_v27 = vadd.f32 %v8164_v57, %v10767_v4  ;;  %v8167_v63 = vadd.f32 %v8166_v56, %v8165_v43  ;;  %v8207_v36 = vadd.f32 %v8206_v0, %v8205_v46 }
 0x23f   :  { %v5566_v3 = vadd.f32 %v8204_v51, %v5501_v27  ;;  %v5504_v53 = vadd.f32 %v8167_v63, %v10769_v10 }
 0x241   :  { %v10800_v55 = vadd.f32 %v8207_v36, %v5504_v53  ;;  %v8168_v7 = vpop.f32.mrb[152].mxu0  ;;  %v8208_v11 = vpop.f32.mrb[152].mxu1 }
 0x242   :  { %v8169_v54 = vpop.f32.mrb[153].mxu0  ;;  %v8209_v6 = vpop.f32.mrb[153].mxu1 }
 0x243   :  { %v8170_v5 = vadd.f32 %v8169_v54, %v8168_v7  ;;  %v8210_v13 = vadd.f32 %v8209_v6, %v8208_v11  ;;  %v8171_v1 = vpop.f32.mrb[154].mxu0  ;;  %v8211_v14 = vpop.f32.mrb[154].mxu1 }
 0x244   :  { %v8172_v2 = vpop.f32.mrb[155].mxu0  ;;  %v8212_v16 = vpop.f32.mrb[155].mxu1 }
 0x245   :  { %v5509_v4 = vadd.f32 %v8170_v5, %v10774_v60  ;;  %v8173_v21 = vadd.f32 %v8172_v2, %v8171_v1  ;;  %v8213_v25 = vadd.f32 %v8212_v16, %v8211_v14 }
 0x247   :  { %v5574_v26 = vadd.f32 %v8210_v13, %v5509_v4  ;;  %v5512_v28 = vadd.f32 %v8173_v21, %v10776_v17 }
 0x249   :  { %v10804_v10 = vadd.f32 %v8213_v25, %v5512_v28  ;;  %v8174_v19 = vpop.f32.mrb[156].mxu0  ;;  %v8214_v29 = vpop.f32.mrb[156].mxu1 }
 0x24a   :  { %v8175_v18 = vpop.f32.mrb[157].mxu0  ;;  %v8215_v8 = vpop.f32.mrb[157].mxu1 }
 0x24b   :  { %v8176_v61 = vadd.f32 %v8175_v18, %v8174_v19  ;;  %v8177_v22 = vpop.f32.mrb[158].mxu0  ;;  %v8216_v9 = vadd.f32 %v8215_v8, %v8214_v29  ;;  %v8217_v31 = vpop.f32.mrb[158].mxu1 }
 0x24c   :  { %v8178_v32 = vpop.f32.mrb[159].mxu0  ;;  %v8218_v60 = vpop.f32.mrb[159].mxu1 }
 0x24d   :  { %v5517_v35 = vadd.f32 %v8176_v61, %v10784_v20  ;;  %v8179_v39 = vadd.f32 %v8178_v32, %v8177_v22  ;;  %v8219_v44 = vadd.f32 %v8218_v60, %v8217_v31 }
 0x24f   :  { %v5582_v23 = vadd.f32 %v8216_v9, %v5517_v35  ;;  %v5520_v45 = vadd.f32 %v8179_v39, %v10786_v38 }
 0x251   :  { %v10808_v17 = vadd.f32 %v8219_v44, %v5520_v45  ;;  %v8236_v33 = vpop.f32.mrb[160].mxu0  ;;  %v8276_v48 = vpop.f32.mrb[160].mxu1 }
 0x252   :  { %v8237_v41 = vpop.f32.mrb[161].mxu0  ;;  %v8277_v12 = vpop.f32.mrb[161].mxu1 }
 0x253   :  { %v8238_v49 = vadd.f32 %v8237_v41, %v8236_v33  ;;  %v8239_v24 = vpop.f32.mrb[162].mxu0  ;;  %v8278_v37 = vadd.f32 %v8277_v12, %v8276_v48  ;;  %v8279_v30 = vpop.f32.mrb[162].mxu1 }
 0x254   :  { %v8240_v58 = vpop.f32.mrb[163].mxu0  ;;  %v8280_v20 = vpop.f32.mrb[163].mxu1 }
 0x255   :  { %v5623_v50 = vadd.f32 %v8238_v49, %v5558_v34  ;;  %v8241_v15 = vadd.f32 %v8240_v58, %v8239_v24  ;;  %v8281_v52 = vadd.f32 %v8280_v20, %v8279_v30 }
 0x257   :  { %v5688_v59 = vadd.f32 %v8278_v37, %v5623_v50  ;;  %v5626_v47 = vadd.f32 %v8241_v15, %v10796_v40 }
 0x259   :  { %v10811_v57 = vadd.f32 %v8281_v52, %v5626_v47  ;;  %v8242_v38 = vpop.f32.mrb[164].mxu0  ;;  %v8282_v62 = vpop.f32.mrb[164].mxu1 }
 0x25a   :  { %v8243_v43 = vpop.f32.mrb[165].mxu0  ;;  %v8283_v51 = vpop.f32.mrb[165].mxu1 }
 0x25b   :  { %v8244_v46 = vadd.f32 %v8243_v43, %v8242_v38  ;;  %v8284_v56 = vadd.f32 %v8283_v51, %v8282_v62  ;;  %v8245_v27 = vpop.f32.mrb[166].mxu0  ;;  %v8285_v63 = vpop.f32.mrb[166].mxu1  ;;  %v5848_v51 = vld [vmem:[#allocation2] sm:$0xff] }
 0x25c   :  { %v8246_v0 = vpop.f32.mrb[167].mxu0  ;;  %v8286_v36 = vpop.f32.mrb[167].mxu1 }
 0x25d   :  { %v5631_v53 = vadd.f32 %v8244_v46, %v5566_v3  ;;  %v8247_v34 = vadd.f32 %v8246_v0, %v8245_v27  ;;  %v8287_v7 = vadd.f32 %v8286_v36, %v8285_v63  ;;  %v5849_v63 = vld [vmem:[#allocation2 + $0x8] sm:$0xff] }
 0x25f   :  { %v10813_v11 = vadd.f32 %v8284_v56, %v5631_v53  ;;  %v5634_v54 = vadd.f32 %v8247_v34, %v10800_v55 }
 0x261   :  { %v10816_v40 = vadd.f32 %v8287_v7, %v5634_v54  ;;  %v8248_v6 = vpop.f32.mrb[168].mxu0  ;;  %v8288_v5 = vpop.f32.mrb[168].mxu1 }
 0x262   :  { %v8249_v13 = vpop.f32.mrb[169].mxu0  ;;  %v8289_v14 = vpop.f32.mrb[169].mxu1 }
 0x263   :  { %v8250_v1 = vadd.f32 %v8249_v13, %v8248_v6  ;;  %v8251_v2 = vpop.f32.mrb[170].mxu0  ;;  %v8290_v16 = vadd.f32 %v8289_v14, %v8288_v5  ;;  %v8291_v4 = vpop.f32.mrb[170].mxu1 }
 0x264   :  { %v8252_v21 = vpop.f32.mrb[171].mxu0  ;;  %v8292_v3 = vpop.f32.mrb[171].mxu1 }
 0x265   :  { %v5639_v25 = vadd.f32 %v8250_v1, %v5574_v26  ;;  %v8253_v28 = vadd.f32 %v8252_v21, %v8251_v2  ;;  %v8293_v19 = vadd.f32 %v8292_v3, %v8291_v4  ;;  %v10836_v4 = vld [vmem:[%s10902_s2] ss:$0 sm:$0xff] }
 0x267   :  { %v10818_v29 = vadd.f32 %v8290_v16, %v5639_v25  ;;  %v5642_v18 = vadd.f32 %v8253_v28, %v10804_v10  ;;  %v5850_v16 = vld [vmem:[#allocation2 + $0x10] sm:$0xff] }
 0x269   :  { %v10821_v55 = vadd.f32 %v8293_v19, %v5642_v18  ;;  %v8254_v61 = vpop.f32.mrb[172].mxu0  ;;  %v8294_v8 = vpop.f32.mrb[172].mxu1  ;;  %v5851_v19 = vld [vmem:[#allocation2 + $0x18] sm:$0xff] }
 0x26a   :  { %v8255_v22 = vpop.f32.mrb[173].mxu0  ;;  %v8295_v31 = vpop.f32.mrb[173].mxu1 }
 0x26b   :  { %v8256_v9 = vadd.f32 %v8255_v22, %v8254_v61  ;;  %v8257_v32 = vpop.f32.mrb[174].mxu0  ;;  %v8296_v35 = vadd.f32 %v8295_v31, %v8294_v8  ;;  %v8297_v39 = vpop.f32.mrb[174].mxu1 }
 0x26c   :  { %v8258_v60 = vpop.f32.mrb[175].mxu0  ;;  %v8298_v45 = vpop.f32.mrb[175].mxu1 }
 0x26d   :  { %v5647_v44 = vadd.f32 %v8256_v9, %v5582_v23  ;;  %v8259_v26 = vadd.f32 %v8258_v60, %v8257_v32  ;;  %v8299_v33 = vadd.f32 %v8298_v45, %v8297_v39 }
 0x26f   :  { %v10823_v48 = vadd.f32 %v8296_v35, %v5647_v44  ;;  %v5650_v41 = vadd.f32 %v8259_v26, %v10808_v17 }
 0x271   :  { %v10826_v10 = vadd.f32 %v8299_v33, %v5650_v41  ;;  %v8316_v49 = vpop.f32.mrb[176].mxu0  ;;  %v8356_v12 = vpop.f32.mrb[176].mxu1 }
 0x272   :  { %v8317_v24 = vpop.f32.mrb[177].mxu0  ;;  %v8357_v37 = vpop.f32.mrb[177].mxu1 }
 0x273   :  { %v8318_v30 = vadd.f32 %v8317_v24, %v8316_v49  ;;  %v8358_v58 = vadd.f32 %v8357_v37, %v8356_v12  ;;  %v8319_v50 = vpop.f32.mrb[178].mxu0  ;;  %v8359_v15 = vpop.f32.mrb[178].mxu1  ;;  %v5852_v37 = vld [vmem:[#allocation2 + $0x20] sm:$0xff] }
 0x274   :  { %v8320_v20 = vpop.f32.mrb[179].mxu0  ;;  %v8360_v52 = vpop.f32.mrb[179].mxu1 }
 0x275   :  { %v5753_v23 = vadd.f32 %v8318_v30, %v5688_v59  ;;  %v8321_v47 = vadd.f32 %v8320_v20, %v8319_v50  ;;  %v8361_v38 = vadd.f32 %v8360_v52, %v8359_v15 }
 0x277   :  { %v5818_v62 = vadd.f32 %v8358_v58, %v5753_v23  ;;  %v5756_v43 = vadd.f32 %v8321_v47, %v10811_v57  ;;  %v5853_v23 = vld [vmem:[#allocation2 + $0x28] sm:$0xff] }
 0x279   :  { %v5856_v17 = vadd.f32 %v5848_v51, %v5818_v62  ;;  %v5821_v46 = vadd.f32 %v8361_v38, %v5756_v43  ;;  %v8322_v56 = vpop.f32.mrb[180].mxu0  ;;  %v8362_v27 = vpop.f32.mrb[180].mxu1 }
 0x27a   :  { %v8323_v0 = vpop.f32.mrb[181].mxu0  ;;  %v8363_v36 = vpop.f32.mrb[181].mxu1 }
 0x27b   :  { %5864 = vst.msk [vmem:[#allocation2] sm:$0xff] %vm1957_vm0, %v5856_v17  ;;  %v5857_v53 = vadd.f32 %v5849_v63, %v5821_v46  ;;  %v8324_v34 = vadd.f32 %v8323_v0, %v8322_v56  ;;  %v8364_v7 = vadd.f32 %v8363_v36, %v8362_v27  ;;  %v8325_v54 = vpop.f32.mrb[182].mxu0  ;;  %v8365_v59 = vpop.f32.mrb[182].mxu1 }
 0x27c   :  { %v8326_v6 = vpop.f32.mrb[183].mxu0  ;;  %v8366_v5 = vpop.f32.mrb[183].mxu1 }
 0x27d   :  { %5865 = vst.msk [vmem:[#allocation2 + $0x8] sm:$0xff] %vm1957_vm0, %v5857_v53  ;;  %v5761_v57 = vadd.f32 %v8324_v34, %v10813_v11  ;;  %v8327_v13 = vadd.f32 %v8326_v6, %v8325_v54  ;;  %v8367_v1 = vadd.f32 %v8366_v5, %v8365_v59  ;;  %v5854_v6 = vld [vmem:[#allocation2 + $0x30] sm:$0xff] }
 0x27f   :  { %v5826_v14 = vadd.f32 %v8364_v7, %v5761_v57  ;;  %v5764_v2 = vadd.f32 %v8327_v13, %v10816_v40 }
 0x281   :  { %v5858_v21 = vadd.f32 %v5850_v16, %v5826_v14  ;;  %v5829_v25 = vadd.f32 %v8367_v1, %v5764_v2  ;;  %v8328_v28 = vpop.f32.mrb[184].mxu0  ;;  %v8368_v3 = vpop.f32.mrb[184].mxu1  ;;  %v5855_v14 = vld [vmem:[#allocation2 + $0x38] sm:$0xff] }
 0x282   :  { %v8329_v18 = vpop.f32.mrb[185].mxu0  ;;  %v8369_v61 = vpop.f32.mrb[185].mxu1  ;;  %v5872_v8 = vld [vmem:[#allocation2] sm:$0xff] }
 0x283   :  { %5866 = vst.msk [vmem:[#allocation2 + $0x10] sm:$0xff] %vm1957_vm0, %v5858_v21  ;;  %v5859_v11 = vadd.f32 %v5851_v19, %v5829_v25  ;;  %v8330_v22 = vadd.f32 %v8329_v18, %v8328_v28  ;;  %v8370_v9 = vadd.f32 %v8369_v61, %v8368_v3  ;;  %v8331_v40 = vpop.f32.mrb[186].mxu0  ;;  %v8371_v31 = vpop.f32.mrb[186].mxu1  ;;  %v5887_v32 = vadd.f32 %v10836_v4, %v5872_v8  ;;  %v8830_v19 = vld [vmem:[%s10901_s3 + $0x28] sm:$0xff]  }
 0x284   :  { %v8332_v35 = vpop.f32.mrb[187].mxu0  ;;  %v8372_v39 = vpop.f32.mrb[187].mxu1  ;;  %v5873_v60 = vld [vmem:[#allocation2 + $0x8] sm:$0xff] }
 0x285   :  { %5867 = vst.msk [vmem:[#allocation2 + $0x18] sm:$0xff] %vm1957_vm0, %v5859_v11  ;;  %v5769_v44 = vadd.f32 %v8330_v22, %v10818_v29  ;;  %v8333_v26 = vadd.f32 %v8332_v35, %v8331_v40  ;;  %v8373_v45 = vadd.f32 %v8372_v39, %v8371_v31  ;;  %v5888_v33 = vadd.f32 %v10836_v4, %v5873_v60 }
 0x286   :  { %v5895_v12 = vmax.f32 %v5887_v32, 0.0  ;;  %v8835_v39 = vmov 0.0|0.0  }
 0x287   :  { %v5834_v41 = vadd.f32 %v8370_v9, %v5769_v44  ;;  %v5772_v49 = vadd.f32 %v8333_v26, %v10821_v55  ;;  %v5896_v24 = vmax.f32 %v5888_v33, 0.0  ;;  %8432 = vmatprep.subr.bf16.mxu1 %v8835_v39 }
 0x289   :  { %v5860_v30 = vadd.f32 %v5852_v37, %v5834_v41  ;;  %v5837_v58 = vadd.f32 %v8373_v45, %v5772_v49  ;;  %v8334_v50 = vpop.f32.mrb[188].mxu0  ;;  %v8374_v15 = vpop.f32.mrb[188].mxu1  ;;  %v5903_v20 = vpack.c.bf16 %v5896_v24, %v5895_v12 }
 0x28a   :  { %v5874_v52 = vld [vmem:[#allocation2 + $0x10] sm:$0xff]  ;;  %v8335_v47 = vpop.f32.mrb[189].mxu0  ;;  %v8375_v38 = vpop.f32.mrb[189].mxu1 }
 0x28b   :  { %v5889_v29 = vadd.f32 %v10836_v4, %v5874_v52  ;;  %5868 = vst.msk [vmem:[#allocation2 + $0x20] sm:$0xff] %vm1957_vm0, %v5860_v30  ;;  %v5861_v62 = vadd.f32 %v5853_v23, %v5837_v58  ;;  %v8336_v43 = vadd.f32 %v8335_v47, %v8334_v50  ;;  %v8337_v51 = vpop.f32.mrb[190].mxu0  ;;  %v8376_v55 = vadd.f32 %v8375_v38, %v8374_v15  ;;  %v8377_v17 = vpop.f32.mrb[190].mxu1 }
 0x28c   :  { %5907 = vst.msk [vmem:[#allocation3] sm:$0xff] %vm1957_vm0, %v5903_v20  ;;  %v5875_v46 = vld [vmem:[#allocation2 + $0x18] sm:$0xff]  ;;  %v8338_v56 = vpop.f32.mrb[191].mxu0  ;;  %v8378_v27 = vpop.f32.mrb[191].mxu1 }
 0x28d   :  { %v5890_v63 = vadd.f32 %v10836_v4, %v5875_v46  ;;  %5869 = vst.msk [vmem:[#allocation2 + $0x28] sm:$0xff] %vm1957_vm0, %v5861_v62  ;;  %v5777_v0 = vadd.f32 %v8336_v43, %v10823_v48  ;;  %v8339_v36 = vadd.f32 %v8338_v56, %v8337_v51  ;;  %v8379_v53 = vadd.f32 %v8378_v27, %v8377_v17  ;;  %v7415_v27 = vld [vmem:[%s10903_s4] ss:$0 sm:$0xff] }
 0x28e   :  { %v5897_v34 = vmax.f32 %v5889_v29, 0.0 }
 0x28f   :  { %v5898_v7 = vmax.f32 %v5890_v63, 0.0  ;;  %v5842_v54 = vadd.f32 %v8376_v55, %v5777_v0  ;;  %v5780_v59 = vadd.f32 %v8339_v36, %v10826_v10  ;;  %v6190_v36 = vlaneseq }
 0x291   :  { %v5862_v5 = vadd.f32 %v5854_v6, %v5842_v54  ;;  %v5845_v57 = vadd.f32 %v8379_v53, %v5780_v59  ;;  %v5904_v13 = vpack.c.bf16 %v5898_v7, %v5897_v34 }
 0x292   :  { %v5876_v1 = vld [vmem:[#allocation2 + $0x20] sm:$0xff] }
 0x293   :  { %v5911_v2 = vld [vmem:[#allocation3] sm:$0xff]  ;;  %v5891_v16 = vadd.f32 %v10836_v4, %v5876_v1  ;;  %5870 = vst.msk [vmem:[#allocation2 + $0x30] sm:$0xff] %vm1957_vm0, %v5862_v5  ;;  %v5863_v21 = vadd.f32 %v5855_v14, %v5845_v57  ;;  %5908 = vst.msk [vmem:[#allocation3 + $0x8] sm:$0xff] %vm1957_vm0, %v5904_v13  ;;  %v6193_v13 = vand.u32 127, %v6190_v36 }
 0x294   :  { %8401 = vmatprep.mubr.msk.bf16.mxu0 %vm1957_vm0, %v5911_v2  ;;  %v5877_v48 = vld [vmem:[#allocation2 + $0x28] sm:$0xff]  ;;  %v7416_v57 = vld [vmem:[%s10904_s5] ss:$0 sm:$0xff] }
 0x295   :  { %v5892_v25 = vadd.f32 %v10836_v4, %v5877_v48  ;;  %5871 = vst.msk [vmem:[#allocation2 + $0x38] sm:$0xff] %vm1957_vm0, %v5863_v21  ;;  %v5899_v10 = vmax.f32 %v5891_v16, 0.0  ;;  %v6191_v48 = vshrl.u32 %v6190_v36, 7 }
 0x297   :  { %v5900_v28 = vmax.f32 %v5892_v25, 0.0  ;;  %v6198_v25 = vand.u32 15, %v6193_v13 }
 0x299   :  { %v5905_v3 = vpack.c.bf16 %v5900_v28, %v5899_v10  ;;  %vm6206_vm2 = vcmp.eq.s32.totalorder %v6198_v25, %v6191_v48 }
 0x29a   :  { %v5878_v18 = vld [vmem:[#allocation2 + $0x30] sm:$0xff]  ;;  %v5912_v61 = vld [vmem:[#allocation3 + $0x8] sm:$0xff] }
 0x29b   :  { %8402 = vmatmul.mubr.msk.bf16.vlgmr.msra.gmra.mrb[192].mxu0 %vm1957_vm0, %v5912_v61  ;;  %8409 = vmatprep.mubr.msk.bf16.mxu1 %vm1957_vm0, %v5912_v61  ;;  %5909 = vst.msk [vmem:[#allocation3 + $0x10] sm:$0xff] %vm1957_vm0, %v5905_v3  ;;  %v5893_v8 = vadd.f32 %v10836_v4, %v5878_v18  ;;  %v12_v61 = vstv %s10905_s6 }
 0x29c   :  { %v5879_v11 = vld [vmem:[#allocation2 + $0x38] sm:$0xff]  ;;  %8414 = vmatpush3.bf16.msra.mxu0 %v10791_v42  ;;  %v8837_v42 = vmov 0.0   ;;  %13 = vst [vmem:[#allocation5] sm:$0x1] %v12_v61 }
 0x29d   :  { %8415 = vmatprep.subr.bf16.mxu0 %v8830_v19  ;;  %v5894_v22 = vadd.f32 %v10836_v4, %v5879_v11  ;;  %v5901_v9 = vmax.f32 %v5893_v8, 0.0  ;;  %v7417_v18 = vsel %vm6206_vm2, 1.0, %v8837_v42 }
 0x29f   :  { %v5902_v40 = vmax.f32 %v5894_v22, 0.0 }
 0x2a0   :  { %8416 = vmatpush3.bf16.msra.mxu0 %v8830_v19 }
 0x2a1   :  { %v5906_v31 = vpack.c.bf16 %v5902_v40, %v5901_v9 }
 0x2a2   :  { %v5989_v32 = vld [vmem:[#allocation3 + $0x10] sm:$0xff] }
 0x2a3   :  { %8410 = vmatmul.mubr.msk.bf16.vlgmr.msra.gmra.mrb[192].mxu1 %vm1957_vm0, %v5989_v32  ;;  %8417 = vmatprep.mubr.msk.bf16.mxu0 %vm1957_vm0, %v5989_v32  ;;  %5910 = vst.msk [vmem:[#allocation3 + $0x18] sm:$0xff] %vm1957_vm0, %v5906_v31  ;;  %v7419_v9 = vld [vmem:[#allocation5] ss:$0 sm:$0xff] }
 0x2a4   :  { %8429 = vmatprep.mubr.msk.f32.mxu1 %vm8836_vm1, %v8837_v42 }
 0x2aa   :  { %v6075_v35 = vld [vmem:[#allocation3 + $0x18] sm:$0xff] }
 0x2ab   :  { %8418 = vmatmul.mubr.msk.bf16.vlgmr.msra.gmra.mrb[196].mxu0 %vm1957_vm0, %v6075_v35 }
 0x36e   :  { %v8403_v4 = vpop.f32.mrb[192].mxu0 }
 0x36f   :  { %5986 = vst.msk [vmem:[#allocation4 + $0x10] sm:$0xff] %vm1957_vm0, %v8403_v4  ;;  %v5969_v60 = vpop.f32.mrb[193].mxu0 }
 0x370   :  { %5984 = vst.msk [vmem:[#allocation4] sm:$0xff] %vm1957_vm0, %v5969_v60  ;;  %v8404_v44 = vpop.f32.mrb[194].mxu0 }
 0x371   :  { %5987 = vst.msk [vmem:[#allocation4 + $0x18] sm:$0xff] %vm1957_vm0, %v8404_v44  ;;  %v5972_v26 = vpop.f32.mrb[195].mxu0 }
 0x372   :  { %5985 = vst.msk [vmem:[#allocation4 + $0x8] sm:$0xff] %vm1957_vm0, %v5972_v26 }
 0x376   :  { %v8411_v45 = vpop.f32.mrb[192].mxu1  ;;  %v6064_v33 = vld [vmem:[#allocation4 + $0x10] sm:$0xff] }
 0x377   :  { %v6068_v41 = vadd.f32 %v8411_v45, %v6064_v33  ;;  %v6047_v49 = vpop.f32.mrb[193].mxu1  ;;  %v6062_v12 = vld [vmem:[#allocation4] sm:$0xff] }
 0x378   :  { %v6066_v24 = vadd.f32 %v6062_v12, %v6047_v49  ;;  %v8412_v37 = vpop.f32.mrb[194].mxu1  ;;  %v6065_v30 = vld [vmem:[#allocation4 + $0x18] sm:$0xff] }
 0x379   :  { %6072 = vst.msk [vmem:[#allocation4 + $0x10] sm:$0xff] %vm1957_vm0, %v6068_v41  ;;  %v6069_v58 = vadd.f32 %v8412_v37, %v6065_v30  ;;  %v6050_v50 = vpop.f32.mrb[195].mxu1  ;;  %v6063_v15 = vld [vmem:[#allocation4 + $0x8] sm:$0xff] }
 0x37a   :  { %6070 = vst.msk [vmem:[#allocation4] sm:$0xff] %vm1957_vm0, %v6066_v24  ;;  %v6067_v20 = vadd.f32 %v6063_v15, %v6050_v50 }
 0x37b   :  { %6073 = vst.msk [vmem:[#allocation4 + $0x18] sm:$0xff] %vm1957_vm0, %v6069_v58 }
 0x37c   :  { %6071 = vst.msk [vmem:[#allocation4 + $0x8] sm:$0xff] %vm1957_vm0, %v6067_v20 }
 0x37e   :  { %v8419_v52 = vpop.f32.mrb[196].mxu0 }
 0x37f   :  { %v6133_v23 = vpop.f32.mrb[197].mxu0 }
 0x380   :  { %v6150_v47 = vld [vmem:[#allocation4 + $0x10] sm:$0xff]  ;;  %v8420_v38 = vpop.f32.mrb[198].mxu0 }
 0x381   :  { %v6154_v29 = vadd.f32 %v8419_v52, %v6150_v47  ;;  %v6148_v62 = vld [vmem:[#allocation4] sm:$0xff]  ;;  %v6136_v43 = vpop.f32.mrb[199].mxu0 }
 0x382   :  { %v6152_v51 = vadd.f32 %v6148_v62, %v6133_v23  ;;  %v6151_v55 = vld [vmem:[#allocation4 + $0x18] sm:$0xff] }
 0x383   :  { %6158 = vst.msk [vmem:[#allocation4 + $0x10] sm:$0xff] %vm1957_vm0, %v6154_v29  ;;  %v6155_v17 = vadd.f32 %v8420_v38, %v6151_v55  ;;  %v6149_v46 = vld [vmem:[#allocation4 + $0x8] sm:$0xff] }
 0x384   :  { %6156 = vst.msk [vmem:[#allocation4] sm:$0xff] %vm1957_vm0, %v6152_v51  ;;  %v6153_v56 = vadd.f32 %v6149_v46, %v6136_v43 }
 0x385   :  { %6159 = vst.msk [vmem:[#allocation4 + $0x18] sm:$0xff] %vm1957_vm0, %v6155_v17 }
 0x386   :  { %6157 = vst.msk [vmem:[#allocation4 + $0x8] sm:$0xff] %vm1957_vm0, %v6153_v56 }
 0x38a   :  { %v6162_v0 = vld [vmem:[#allocation4 + $0x10] sm:$0xff] }
 0x38b   :  { %v6160_v63 = vld [vmem:[#allocation4] sm:$0xff]  ;;  %v6173_v5 = vadd.f32 %v7415_v27, %v6162_v0 }
 0x38c   :  { %v6171_v53 = vadd.f32 %v7415_v27, %v6160_v63  ;;  %v6163_v34 = vld [vmem:[#allocation4 + $0x18] sm:$0xff] }
 0x38d   :  { %v6161_v7 = vld [vmem:[#allocation4 + $0x8] sm:$0xff]  ;;  %v6174_v54 = vadd.f32 %v7415_v27, %v6163_v34  ;;  %v6177_v21 = vmax.f32 %v6173_v5, 0.0 }
 0x38e   :  { %v6172_v59 = vadd.f32 %v7415_v27, %v6161_v7  ;;  %v6175_v6 = vmax.f32 %v6171_v53, 0.0 }
 0x38f   :  { %v6178_v14 = vmax.f32 %v6174_v54, 0.0  ;;  %v6188_v3 = vmul.f32 %v7416_v57, %v6177_v21 }
 0x390   :  { %v6176_v1 = vmax.f32 %v6172_v59, 0.0  ;;  %v6186_v2 = vmul.f32 %v7416_v57, %v6175_v6 }
 0x391   :  { %v6189_v28 = vmul.f32 %v7416_v57, %v6178_v14 }
 0x392   :  { %v6187_v16 = vmul.f32 %v7416_v57, %v6176_v1 }
 0x393   :  { %v8436_v19 = vpack.c.bf16 %v6189_v28, %v6188_v3 }
 0x394   :  { %v8433_v10 = vpack.c.bf16 %v6187_v16, %v6186_v2 }
 0x396   :  { %8434 = vmatpush3.bf16.msra.mxu1 %v8433_v10 }
 0x397   :  { %8435 = vmatprep.subr.bf16.mxu1 %v8835_v39 }
 0x39a   :  { %8437 = vmatpush3.bf16.msra.mxu1 %v8436_v19 }
 0x39d   :  { %8430 = vmatmul.mubr.msk.f32.vlgmr.msra.gmra.mrb[196].mxu1 %vm1957_vm0, %v7417_v18 }
 0x470   :  { %v6278_v8 = vpop.f32.mrb[196].mxu1 }
 0x471   :  { %v8431_v11 = vpop.f32.mrb[197].mxu1  ;;  %v6283_v22 = vsel %vm6282_vm3, %v6278_v8, 0.0 }
 0x472   :  { %6284 = vadd.xlane.f32.xlu0 %v6283_v22 }
 0x4ff   :  { %v6285_v40 = vpop.xlane.xlu0 %6284 }
 0x500   :  { %v6293_v31 = vadd.f32 %v7419_v9, %v6285_v40 }
 0x502   :  { %v6294_v32 = vsub.f32 0.0, %v6293_v31 }
 0x504   :  { %v6295_v35 = vmul.f32 1.442695, %v6294_v32 }
 0x506   :  { %8831 = vpow2.f32 %v6295_v35 }
 0x510   :  { %v8832_v39 = vpop.eup %8831 }
 0x511   :  { %v6297_v42 = vadd.f32 1.0, %v8832_v39 }
 0x513   :  { %8833 = vrcp.f32 %v6297_v42 }
 0x51d   :  { %v8834_v4 = vpop.eup %8833 }
 0x51e   :  { %6301 = vst.msk [vmem:[%s10906_s7] sm:$0x3] %vm6300_vm4, %v8834_v4 }

</bundles_post_ra>
